<compile_context>
chip_gen: v5e
topology: v5e:2x2
jax: 0.10.0
libtpu: 0.0.40
codegen_flags: <defaults>
</compile_context>

<pallas_src>
import functools

import jax
import jax.numpy as jnp
from jax.experimental import pallas as pl
from jax.experimental.pallas import tpu as pltpu


def _spatial_attention_kernel(w_ref, x_ref, o_ref,
                              sum_acc, max_acc, pad_avg, pad_max,
                              *, C, W, HW, ks, pad, off):
    # w_ref   : (2*ks*ks,) f32 SMEM   conv weight, [avg-plane | max-plane]
    # x_ref   : (Bt, Ct, HW)          one (batch-tile, channel-chunk) block
    # o_ref   : (Bt, HW)
    # sum_acc : (Bt, HW) f32 VMEM     running channel sum
    # max_acc : (Bt, HW) f32 VMEM     running channel max
    # pad_avg : (Bt, (H+2p)*W + 2p)   row-padded flattened avg plane (f32)
    # pad_max : (Bt, (H+2p)*W + 2p)   row-padded flattened max plane (f32)
    c = pl.program_id(1)
    nc = pl.num_programs(1)

    @pl.when(c == 0)
    def _init():
        sum_acc[...] = jnp.zeros(sum_acc.shape, sum_acc.dtype)
        max_acc[...] = jnp.full(max_acc.shape, -jnp.inf, max_acc.dtype)
        # Zero the padded planes once per batch tile: the interior is
        # overwritten at finalize; only the border needs to stay 0.
        pad_avg[...] = jnp.zeros(pad_avg.shape, pad_avg.dtype)
        pad_max[...] = jnp.zeros(pad_max.shape, pad_max.dtype)

    # ---- streamed channel reduction over this channel chunk ----
    xb = x_ref[...].astype(jnp.float32)                       # (Bt, Ct, HW)
    sum_acc[...] = sum_acc[...] + jnp.sum(xb, axis=1)
    max_acc[...] = jnp.maximum(max_acc[...], jnp.max(xb, axis=1))

    # ---- conv + sigmoid, once per batch tile ----
    @pl.when(c == nc - 1)
    def _finalize():
        bt = o_ref.shape[0]
        avg = sum_acc[...] * (1.0 / C)                        # (Bt, HW) f32
        pad_avg[:, pl.ds(off, HW)] = avg
        pad_max[:, pl.ds(off, HW)] = max_acc[...]

        col = jax.lax.broadcasted_iota(jnp.int32, (bt, HW), 1) % W
        acc = jnp.zeros((bt, HW), dtype=jnp.float32)
        for kw in range(ks):                                  # column taps
            cc = col + (kw - pad)
            valid = (cc >= 0) & (cc < W)                      # column validity
            for kh in range(ks):                              # row taps
                s = kh * W + kw                               # static lane offset
                ta = pad_avg[:, pl.ds(s, HW)]
                tm = pad_max[:, pl.ds(s, HW)]
                wa = w_ref[kh * ks + kw]                      # SMEM scalar
                wm = w_ref[ks * ks + kh * ks + kw]
                acc = acc + jnp.where(valid, wa * ta + wm * tm, 0.0)

        o_ref[...] = jax.nn.sigmoid(acc).astype(o_ref.dtype)


def _round_up(v, m):
    return ((v + m - 1) // m) * m


def _divisors(n):
    return [d for d in range(1, n + 1) if n % d == 0]


def _vmem_limit_bytes():
    try:
        cap = int(pltpu.get_tpu_info().vmem_capacity_bytes)
    except Exception:
        cap = 64 * 1024 * 1024                    # conservative default (v7x)
    if cap >= 128 * 1024 * 1024:
        return 100 * 1024 * 1024                  # v5e / v6e: use most of 128 MiB
    return cap * 3 // 4                           # v7x: ~48 MiB of 64 MiB


def _pick_tiles(B, C, HW, L, in_isz, out_isz, budget):
    """Pick (Bt, Ct): the largest block (by volume) whose tile-padded VMEM
    footprint fits `budget`; prefers sublane-aligned dims and >= 2 batch grid
    steps (megacore).  Raises if even a (1, 1) block does not fit."""
    sub_in = {4: 8, 2: 16, 1: 32}.get(in_isz, 8)
    sub_out = {4: 8, 2: 16, 1: 32}.get(out_isz, 8)
    hw_r = _round_up(HW, 128)
    l_r = _round_up(L, 128)

    def footprint(bt, ct):
        inp = 2 * bt * _round_up(ct, sub_in) * hw_r * in_isz     # dbl-buffered x
        outp = 2 * _round_up(bt, sub_out) * hw_r * out_isz       # dbl-buffered out
        scr = 2 * _round_up(bt, 8) * hw_r * 4                    # sum/max acc
        scr += 2 * _round_up(bt, 8) * l_r * 4                    # padded planes
        tmp = 4 * _round_up(bt, 8) * hw_r * 4                    # live f32 temps
        return inp + outp + scr + tmp

    b_all, c_all = _divisors(B), _divisors(C)
    b_ali = [d for d in b_all if d == B or d % 8 == 0]
    c_ali = [d for d in c_all if d == C or d % sub_in == 0]

    def search(bs, cs):
        fits = [(bt, ct) for bt in bs for ct in cs
                if footprint(bt, ct) <= budget]
        if not fits:
            return None
        multi = [t for t in fits if B // t[0] >= 2]
        pool = multi if multi else fits
        return max(pool, key=lambda t: (t[0] * t[1], t[1]))

    pick = search(b_ali, c_ali) or search(b_all, c_all)
    if pick is None:
        # TODO(synk): add an H*W grid axis for extreme spatial sizes.
        raise ValueError(
            "SpatialAttention: even a (Bt=1, Ct=1) block exceeds the VMEM "
            f"budget ({budget} bytes) for B={B}, C={C}, H*W={HW}.")
    return pick


def spatial_attention(x, conv_w):
    """x: (B, C, H, W).  conv_w: (1, 2, ks, ks) PyTorch Conv2d weight layout.
    Returns sigmoid(conv([mean_c(x), max_c(x)])) with shape (B, 1, H, W)."""
    B, C, H, W = x.shape
    out_ch, in_ch, ks, ks2 = conv_w.shape
    assert out_ch == 1 and in_ch == 2 and ks == ks2 and ks in (3, 7)
    pad = ks // 2
    HW = H * W
    L = (H + 2 * pad) * W + 2 * pad              # row-padded flat plane + col slack
    off = pad * W + pad                          # interior start in padded plane

    w_flat = conv_w.reshape(-1).astype(jnp.float32)          # (2*ks*ks,) -> SMEM

    vmem_limit = _vmem_limit_bytes()
    budget = int(vmem_limit * 0.9)
    isz = jnp.dtype(x.dtype).itemsize
    Bt, Ct = _pick_tiles(B, C, HW, L, isz, isz, budget)

    x_flat = x.reshape(B, C, HW)                 # free layout change (NCHW)

    kernel = functools.partial(_spatial_attention_kernel,
                               C=C, W=W, HW=HW, ks=ks, pad=pad, off=off)

    out = pl.pallas_call(
        kernel,
        out_shape=jax.ShapeDtypeStruct((B, HW), x.dtype),
        grid_spec=pltpu.PrefetchScalarGridSpec(
            num_scalar_prefetch=1,                           # conv weights -> SMEM
            grid=(B // Bt, C // Ct),                         # (batch, channel-reduce)
            in_specs=[
                pl.BlockSpec((Bt, Ct, HW), lambda i, c, w: (i, c, 0)),
            ],
            out_specs=pl.BlockSpec((Bt, HW), lambda i, c, w: (i, 0)),
            scratch_shapes=[
                pltpu.VMEM((Bt, HW), jnp.float32),           # running sum
                pltpu.VMEM((Bt, HW), jnp.float32),           # running max
                pltpu.VMEM((Bt, L), jnp.float32),            # padded avg plane
                pltpu.VMEM((Bt, L), jnp.float32),            # padded max plane
            ],
        ),
        compiler_params=pltpu.CompilerParams(
            dimension_semantics=("parallel", "arbitrary"),
            vmem_limit_bytes=vmem_limit),
    )(w_flat, x_flat)

    return out.reshape(B, 1, H, W)


def _reference(x, conv_w):
    avg = jnp.mean(x, axis=1, keepdims=True)
    mx = jnp.max(x, axis=1, keepdims=True)
    xin = jnp.concatenate([avg, mx], axis=1)                 # (B, 2, H, W)
    pad = conv_w.shape[-1] // 2
    y = jax.lax.conv_general_dilated(
        xin, conv_w, window_strides=(1, 1),
        padding=((pad, pad), (pad, pad)),
        dimension_numbers=("NCHW", "OIHW", "NCHW"))
    return jax.nn.sigmoid(y)


if __name__ == "__main__":
    # Small shapes consistent with the module forward: x (B, C, H, W), 7x7 conv.
    B, C, H, W = 2, 4, 16, 16
    ks = 7

    key = jax.random.PRNGKey(0)
    kx, kkw = jax.random.split(key)
    x = jax.random.normal(kx, (B, C, H, W), dtype=jnp.float32)
    conv_w = jax.random.normal(kkw, (1, 2, ks, ks), dtype=jnp.float32) * 0.1

    out = spatial_attention(x, conv_w)
    out = jax.block_until_ready(out)

    ref = _reference(x, conv_w)
    assert out.shape == (B, 1, H, W)
    assert jnp.allclose(out, ref, atol=1e-5, rtol=1e-5), "mismatch vs reference"

    print("KERNEL_OK")
</pallas_src>

<mosaic_0001>
module attributes {stable_mosaic.version = 11 : i64} {
  func.func @_spatial_attention_kernel(%arg0: i32, %arg1: i32, %arg2: memref<98xf32, #tpu.memory_space<smem>>, %arg3: memref<2x4x256xf32, #tpu.memory_space<vmem>>, %arg4: memref<2x256xf32, #tpu.memory_space<vmem>>, %arg5: memref<2x256xf32, #tpu.memory_space<vmem>>, %arg6: memref<2x256xf32, #tpu.memory_space<vmem>>, %arg7: memref<2x358xf32, #tpu.memory_space<vmem>>, %arg8: memref<2x358xf32, #tpu.memory_space<vmem>>) attributes {dimension_semantics = [#tpu.dimension_semantics<parallel>, #tpu.dimension_semantics<arbitrary>], iteration_bounds = array<i64: 1, 1>, scalar_prefetch = 1 : i64, scratch_operands = 4 : i64, tpu.core_type = #tpu.core_type<tc>, window_params = [{transform_indices = @transform_0, window_bounds = array<i64: 2, 4, 256>}, {transform_indices = @transform_1, window_bounds = array<i64: 2, 256>}]} {
    %c0_i32 = arith.constant 0 : i32
    %0 = arith.cmpi eq, %arg1, %c0_i32 : i32
    %1 = arith.extui %0 : i1 to i32
    %c0_i32_0 = arith.constant 0 : i32
    %2 = arith.cmpi ne, %1, %c0_i32_0 : i32
    scf.if %2 {
      %cst_14 = arith.constant 0.000000e+00 : f32
      %15 = vector.broadcast %cst_14 : f32 to vector<2x256xf32>
      %c0_15 = arith.constant 0 : index
      %c0_16 = arith.constant 0 : index
      %16 = vector.load %arg5[%c0_15, %c0_16] : memref<2x256xf32, #tpu.memory_space<vmem>>, vector<2x256xf32>
      tpu.vector_store %arg5[%c0_15, %c0_16], %15 {strides = array<i32>} : memref<2x256xf32, #tpu.memory_space<vmem>>, vector<2x256xf32>,
      %cst_17 = arith.constant 0xFF800000 : f32
      %17 = vector.broadcast %cst_17 : f32 to vector<2x256xf32>
      %c0_18 = arith.constant 0 : index
      %c0_19 = arith.constant 0 : index
      %18 = vector.load %arg6[%c0_18, %c0_19] : memref<2x256xf32, #tpu.memory_space<vmem>>, vector<2x256xf32>
      tpu.vector_store %arg6[%c0_18, %c0_19], %17 {strides = array<i32>} : memref<2x256xf32, #tpu.memory_space<vmem>>, vector<2x256xf32>,
      %cst_20 = arith.constant 0.000000e+00 : f32
      %19 = vector.broadcast %cst_20 : f32 to vector<2x358xf32>
      %c0_21 = arith.constant 0 : index
      %c0_22 = arith.constant 0 : index
      %20 = vector.load %arg7[%c0_21, %c0_22] : memref<2x358xf32, #tpu.memory_space<vmem>>, vector<2x358xf32>
      tpu.vector_store %arg7[%c0_21, %c0_22], %19 {strides = array<i32>} : memref<2x358xf32, #tpu.memory_space<vmem>>, vector<2x358xf32>,
      %cst_23 = arith.constant 0.000000e+00 : f32
      %21 = vector.broadcast %cst_23 : f32 to vector<2x358xf32>
      %c0_24 = arith.constant 0 : index
      %c0_25 = arith.constant 0 : index
      %22 = vector.load %arg8[%c0_24, %c0_25] : memref<2x358xf32, #tpu.memory_space<vmem>>, vector<2x358xf32>
      tpu.vector_store %arg8[%c0_24, %c0_25], %21 {strides = array<i32>} : memref<2x358xf32, #tpu.memory_space<vmem>>, vector<2x358xf32>,
    } else {
    }
    %c0 = arith.constant 0 : index
    %c0_1 = arith.constant 0 : index
    %c0_2 = arith.constant 0 : index
    %3 = vector.load %arg3[%c0, %c0_1, %c0_2] : memref<2x4x256xf32, #tpu.memory_space<vmem>>, vector<2x4x256xf32>
    %c0_3 = arith.constant 0 : index
    %c0_4 = arith.constant 0 : index
    %4 = vector.load %arg5[%c0_3, %c0_4] : memref<2x256xf32, #tpu.memory_space<vmem>>, vector<2x256xf32>
    %cst = arith.constant dense<0.000000e+00> : vector<2x256xf32>
    %5 = vector.multi_reduction <add>, %3, %cst [1] : vector<2x4x256xf32> to vector<2x256xf32>
    %6 = arith.addf %4, %5 : vector<2x256xf32>
    %c0_5 = arith.constant 0 : index
    %c0_6 = arith.constant 0 : index
    %7 = vector.load %arg5[%c0_5, %c0_6] : memref<2x256xf32, #tpu.memory_space<vmem>>, vector<2x256xf32>
    tpu.vector_store %arg5[%c0_5, %c0_6], %6 {strides = array<i32>} : memref<2x256xf32, #tpu.memory_space<vmem>>, vector<2x256xf32>,
    %c0_7 = arith.constant 0 : index
    %c0_8 = arith.constant 0 : index
    %8 = vector.load %arg6[%c0_7, %c0_8] : memref<2x256xf32, #tpu.memory_space<vmem>>, vector<2x256xf32>
    %cst_9 = arith.constant dense<0xFF800000> : vector<2x256xf32>
    %9 = vector.multi_reduction <maximumf>, %3, %cst_9 [1] : vector<2x4x256xf32> to vector<2x256xf32>
    %10 = arith.maximumf %8, %9 : vector<2x256xf32>
    %c0_10 = arith.constant 0 : index
    %c0_11 = arith.constant 0 : index
    %11 = vector.load %arg6[%c0_10, %c0_11] : memref<2x256xf32, #tpu.memory_space<vmem>>, vector<2x256xf32>
    tpu.vector_store %arg6[%c0_10, %c0_11], %10 {strides = array<i32>} : memref<2x256xf32, #tpu.memory_space<vmem>>, vector<2x256xf32>,
    %c0_i32_12 = arith.constant 0 : i32
    %12 = arith.cmpi eq, %arg1, %c0_i32_12 : i32
    %13 = arith.extui %12 : i1 to i32
    %c0_i32_13 = arith.constant 0 : i32
    %14 = arith.cmpi ne, %13, %c0_i32_13 : i32
    scf.if %14 {
      %c0_14 = arith.constant 0 : index
      %c0_15 = arith.constant 0 : index
      %15 = vector.load %arg5[%c0_14, %c0_15] : memref<2x256xf32, #tpu.memory_space<vmem>>, vector<2x256xf32>
      %cst_16 = arith.constant 2.500000e-01 : f32
      %16 = vector.broadcast %cst_16 : f32 to vector<2x256xf32>
      %17 = arith.mulf %15, %16 : vector<2x256xf32>
      %c0_17 = arith.constant 0 : index
      %c51 = arith.constant 51 : index
      %18 = vector.load %arg7[%c0_17, %c51] : memref<2x358xf32, #tpu.memory_space<vmem>>, vector<2x256xf32>
      tpu.vector_store %arg7[%c0_17, %c51], %17 {strides = array<i32>} : memref<2x358xf32, #tpu.memory_space<vmem>>, vector<2x256xf32>,
      %c0_18 = arith.constant 0 : index
      %c0_19 = arith.constant 0 : index
      %19 = vector.load %arg6[%c0_18, %c0_19] : memref<2x256xf32, #tpu.memory_space<vmem>>, vector<2x256xf32>
      %c0_20 = arith.constant 0 : index
      %c51_21 = arith.constant 51 : index
      %20 = vector.load %arg8[%c0_20, %c51_21] : memref<2x358xf32, #tpu.memory_space<vmem>>, vector<2x256xf32>
      tpu.vector_store %arg8[%c0_20, %c51_21], %19 {strides = array<i32>} : memref<2x358xf32, #tpu.memory_space<vmem>>, vector<2x256xf32>,
      %21 = tpu.iota {dimensions = array<i32: 1>} : vector<2x256xi32>
      %c16_i32 = arith.constant 16 : i32
      %c0_i32_22 = arith.constant 0 : i32
      %22 = arith.cmpi eq, %c16_i32, %c0_i32_22 : i32
      %c1_i32 = arith.constant 1 : i32
      %23 = arith.select %22, %c1_i32, %c16_i32 : i32
      %24 = vector.broadcast %23 : i32 to vector<2x256xi32>
      %25 = arith.remsi %21, %24 : vector<2x256xi32>
      %c0_i32_23 = arith.constant 0 : i32
      %26 = vector.broadcast %c0_i32_23 : i32 to vector<2x256xi32>
      %27 = arith.cmpi ne, %25, %26 : vector<2x256xi32>
      %c0_i32_24 = arith.constant 0 : i32
      %28 = vector.broadcast %c0_i32_24 : i32 to vector<2x256xi32>
      %29 = arith.cmpi slt, %25, %28 : vector<2x256xi32>
      %c0_i32_25 = arith.constant 0 : i32
      %30 = arith.cmpi slt, %23, %c0_i32_25 : i32
      %31 = vector.broadcast %30 : i1 to vector<2x256xi1>
      %32 = vector.broadcast %31 : vector<2x256xi1> to vector<2x256xi1>
      %33 = arith.xori %29, %32 : vector<2x256xi1>
      %34 = arith.andi %33, %27 : vector<2x256xi1>
      %35 = vector.broadcast %23 : i32 to vector<2x256xi32>
      %36 = arith.addi %25, %35 : vector<2x256xi32>
      %37 = arith.select %34, %36, %25 : vector<2x256xi1>, vector<2x256xi32>
      %cst_26 = arith.constant 0.000000e+00 : f32
      %38 = vector.broadcast %cst_26 : f32 to vector<2x256xf32>
      %c-3_i32 = arith.constant -3 : i32
      %39 = vector.broadcast %c-3_i32 : i32 to vector<2x256xi32>
      %40 = arith.addi %37, %39 : vector<2x256xi32>
      %c0_i32_27 = arith.constant 0 : i32
      %41 = vector.broadcast %c0_i32_27 : i32 to vector<2x256xi32>
      %42 = arith.cmpi sge, %40, %41 : vector<2x256xi32>
      %c16_i32_28 = arith.constant 16 : i32
      %43 = vector.broadcast %c16_i32_28 : i32 to vector<2x256xi32>
      %44 = arith.cmpi slt, %40, %43 : vector<2x256xi32>
      %45 = arith.andi %42, %44 : vector<2x256xi1>
      %c0_29 = arith.constant 0 : index
      %c0_30 = arith.constant 0 : index
      %46 = vector.load %arg7[%c0_29, %c0_30] : memref<2x358xf32, #tpu.memory_space<vmem>>, vector<2x256xf32>
      %c0_31 = arith.constant 0 : index
      %c0_32 = arith.constant 0 : index
      %47 = vector.load %arg8[%c0_31, %c0_32] : memref<2x358xf32, #tpu.memory_space<vmem>>, vector<2x256xf32>
      %c0_33 = arith.constant 0 : index
      %48 = memref.load %arg2[%c0_33] : memref<98xf32, #tpu.memory_space<smem>>
      %c49 = arith.constant 49 : index
      %49 = memref.load %arg2[%c49] : memref<98xf32, #tpu.memory_space<smem>>
      %50 = vector.broadcast %48 : f32 to vector<2x256xf32>
      %51 = arith.mulf %50, %46 : vector<2x256xf32>
      %52 = vector.broadcast %49 : f32 to vector<2x256xf32>
      %53 = arith.mulf %52, %47 : vector<2x256xf32>
      %54 = arith.addf %51, %53 : vector<2x256xf32>
      %cst_34 = arith.constant 0.000000e+00 : f32
      %55 = vector.broadcast %cst_34 : f32 to vector<2x256xf32>
      %56 = arith.select %45, %54, %55 : vector<2x256xi1>, vector<2x256xf32>
      %57 = arith.addf %38, %56 : vector<2x256xf32>
      %c0_35 = arith.constant 0 : index
      %c16 = arith.constant 16 : index
      %58 = vector.load %arg7[%c0_35, %c16] : memref<2x358xf32, #tpu.memory_space<vmem>>, vector<2x256xf32>
      %c0_36 = arith.constant 0 : index
      %c16_37 = arith.constant 16 : index
      %59 = vector.load %arg8[%c0_36, %c16_37] : memref<2x358xf32, #tpu.memory_space<vmem>>, vector<2x256xf32>
      %c7 = arith.constant 7 : index
      %60 = memref.load %arg2[%c7] : memref<98xf32, #tpu.memory_space<smem>>
      %c56 = arith.constant 56 : index
      %61 = memref.load %arg2[%c56] : memref<98xf32, #tpu.memory_space<smem>>
      %62 = vector.broadcast %60 : f32 to vector<2x256xf32>
      %63 = arith.mulf %62, %58 : vector<2x256xf32>
      %64 = vector.broadcast %61 : f32 to vector<2x256xf32>
      %65 = arith.mulf %64, %59 : vector<2x256xf32>
      %66 = arith.addf %63, %65 : vector<2x256xf32>
      %cst_38 = arith.constant 0.000000e+00 : f32
      %67 = vector.broadcast %cst_38 : f32 to vector<2x256xf32>
      %68 = arith.select %45, %66, %67 : vector<2x256xi1>, vector<2x256xf32>
      %69 = arith.addf %57, %68 : vector<2x256xf32>
      %c0_39 = arith.constant 0 : index
      %c32 = arith.constant 32 : index
      %70 = vector.load %arg7[%c0_39, %c32] : memref<2x358xf32, #tpu.memory_space<vmem>>, vector<2x256xf32>
      %c0_40 = arith.constant 0 : index
      %c32_41 = arith.constant 32 : index
      %71 = vector.load %arg8[%c0_40, %c32_41] : memref<2x358xf32, #tpu.memory_space<vmem>>, vector<2x256xf32>
      %c14 = arith.constant 14 : index
      %72 = memref.load %arg2[%c14] : memref<98xf32, #tpu.memory_space<smem>>
      %c63 = arith.constant 63 : index
      %73 = memref.load %arg2[%c63] : memref<98xf32, #tpu.memory_space<smem>>
      %74 = vector.broadcast %72 : f32 to vector<2x256xf32>
      %75 = arith.mulf %74, %70 : vector<2x256xf32>
      %76 = vector.broadcast %73 : f32 to vector<2x256xf32>
      %77 = arith.mulf %76, %71 : vector<2x256xf32>
      %78 = arith.addf %75, %77 : vector<2x256xf32>
      %cst_42 = arith.constant 0.000000e+00 : f32
      %79 = vector.broadcast %cst_42 : f32 to vector<2x256xf32>
      %80 = arith.select %45, %78, %79 : vector<2x256xi1>, vector<2x256xf32>
      %81 = arith.addf %69, %80 : vector<2x256xf32>
      %c0_43 = arith.constant 0 : index
      %c48 = arith.constant 48 : index
      %82 = vector.load %arg7[%c0_43, %c48] : memref<2x358xf32, #tpu.memory_space<vmem>>, vector<2x256xf32>
      %c0_44 = arith.constant 0 : index
      %c48_45 = arith.constant 48 : index
      %83 = vector.load %arg8[%c0_44, %c48_45] : memref<2x358xf32, #tpu.memory_space<vmem>>, vector<2x256xf32>
      %c21 = arith.constant 21 : index
      %84 = memref.load %arg2[%c21] : memref<98xf32, #tpu.memory_space<smem>>
      %c70 = arith.constant 70 : index
      %85 = memref.load %arg2[%c70] : memref<98xf32, #tpu.memory_space<smem>>
      %86 = vector.broadcast %84 : f32 to vector<2x256xf32>
      %87 = arith.mulf %86, %82 : vector<2x256xf32>
      %88 = vector.broadcast %85 : f32 to vector<2x256xf32>
      %89 = arith.mulf %88, %83 : vector<2x256xf32>
      %90 = arith.addf %87, %89 : vector<2x256xf32>
      %cst_46 = arith.constant 0.000000e+00 : f32
      %91 = vector.broadcast %cst_46 : f32 to vector<2x256xf32>
      %92 = arith.select %45, %90, %91 : vector<2x256xi1>, vector<2x256xf32>
      %93 = arith.addf %81, %92 : vector<2x256xf32>
      %c0_47 = arith.constant 0 : index
      %c64 = arith.constant 64 : index
      %94 = vector.load %arg7[%c0_47, %c64] : memref<2x358xf32, #tpu.memory_space<vmem>>, vector<2x256xf32>
      %c0_48 = arith.constant 0 : index
      %c64_49 = arith.constant 64 : index
      %95 = vector.load %arg8[%c0_48, %c64_49] : memref<2x358xf32, #tpu.memory_space<vmem>>, vector<2x256xf32>
      %c28 = arith.constant 28 : index
      %96 = memref.load %arg2[%c28] : memref<98xf32, #tpu.memory_space<smem>>
      %c77 = arith.constant 77 : index
      %97 = memref.load %arg2[%c77] : memref<98xf32, #tpu.memory_space<smem>>
      %98 = vector.broadcast %96 : f32 to vector<2x256xf32>
      %99 = arith.mulf %98, %94 : vector<2x256xf32>
      %100 = vector.broadcast %97 : f32 to vector<2x256xf32>
      %101 = arith.mulf %100, %95 : vector<2x256xf32>
      %102 = arith.addf %99, %101 : vector<2x256xf32>
      %cst_50 = arith.constant 0.000000e+00 : f32
      %103 = vector.broadcast %cst_50 : f32 to vector<2x256xf32>
      %104 = arith.select %45, %102, %103 : vector<2x256xi1>, vector<2x256xf32>
      %105 = arith.addf %93, %104 : vector<2x256xf32>
      %c0_51 = arith.constant 0 : index
      %c80 = arith.constant 80 : index
      %106 = vector.load %arg7[%c0_51, %c80] : memref<2x358xf32, #tpu.memory_space<vmem>>, vector<2x256xf32>
      %c0_52 = arith.constant 0 : index
      %c80_53 = arith.constant 80 : index
      %107 = vector.load %arg8[%c0_52, %c80_53] : memref<2x358xf32, #tpu.memory_space<vmem>>, vector<2x256xf32>
      %c35 = arith.constant 35 : index
      %108 = memref.load %arg2[%c35] : memref<98xf32, #tpu.memory_space<smem>>
      %c84 = arith.constant 84 : index
      %109 = memref.load %arg2[%c84] : memref<98xf32, #tpu.memory_space<smem>>
      %110 = vector.broadcast %108 : f32 to vector<2x256xf32>
      %111 = arith.mulf %110, %106 : vector<2x256xf32>
      %112 = vector.broadcast %109 : f32 to vector<2x256xf32>
      %113 = arith.mulf %112, %107 : vector<2x256xf32>
      %114 = arith.addf %111, %113 : vector<2x256xf32>
      %cst_54 = arith.constant 0.000000e+00 : f32
      %115 = vector.broadcast %cst_54 : f32 to vector<2x256xf32>
      %116 = arith.select %45, %114, %115 : vector<2x256xi1>, vector<2x256xf32>
      %117 = arith.addf %105, %116 : vector<2x256xf32>
      %c0_55 = arith.constant 0 : index
      %c96 = arith.constant 96 : index
      %118 = vector.load %arg7[%c0_55, %c96] : memref<2x358xf32, #tpu.memory_space<vmem>>, vector<2x256xf32>
      %c0_56 = arith.constant 0 : index
      %c96_57 = arith.constant 96 : index
      %119 = vector.load %arg8[%c0_56, %c96_57] : memref<2x358xf32, #tpu.memory_space<vmem>>, vector<2x256xf32>
      %c42 = arith.constant 42 : index
      %120 = memref.load %arg2[%c42] : memref<98xf32, #tpu.memory_space<smem>>
      %c91 = arith.constant 91 : index
      %121 = memref.load %arg2[%c91] : memref<98xf32, #tpu.memory_space<smem>>
      %122 = vector.broadcast %120 : f32 to vector<2x256xf32>
      %123 = arith.mulf %122, %118 : vector<2x256xf32>
      %124 = vector.broadcast %121 : f32 to vector<2x256xf32>
      %125 = arith.mulf %124, %119 : vector<2x256xf32>
      %126 = arith.addf %123, %125 : vector<2x256xf32>
      %cst_58 = arith.constant 0.000000e+00 : f32
      %127 = vector.broadcast %cst_58 : f32 to vector<2x256xf32>
      %128 = arith.select %45, %126, %127 : vector<2x256xi1>, vector<2x256xf32>
      %129 = arith.addf %117, %128 : vector<2x256xf32>
      %c-2_i32 = arith.constant -2 : i32
      %130 = vector.broadcast %c-2_i32 : i32 to vector<2x256xi32>
      %131 = arith.addi %37, %130 : vector<2x256xi32>
      %c0_i32_59 = arith.constant 0 : i32
      %132 = vector.broadcast %c0_i32_59 : i32 to vector<2x256xi32>
      %133 = arith.cmpi sge, %131, %132 : vector<2x256xi32>
      %c16_i32_60 = arith.constant 16 : i32
      %134 = vector.broadcast %c16_i32_60 : i32 to vector<2x256xi32>
      %135 = arith.cmpi slt, %131, %134 : vector<2x256xi32>
      %136 = arith.andi %133, %135 : vector<2x256xi1>
      %c0_61 = arith.constant 0 : index
      %c1 = arith.constant 1 : index
      %137 = vector.load %arg7[%c0_61, %c1] : memref<2x358xf32, #tpu.memory_space<vmem>>, vector<2x256xf32>
      %c0_62 = arith.constant 0 : index
      %c1_63 = arith.constant 1 : index
      %138 = vector.load %arg8[%c0_62, %c1_63] : memref<2x358xf32, #tpu.memory_space<vmem>>, vector<2x256xf32>
      %c1_64 = arith.constant 1 : index
      %139 = memref.load %arg2[%c1_64] : memref<98xf32, #tpu.memory_space<smem>>
      %c50 = arith.constant 50 : index
      %140 = memref.load %arg2[%c50] : memref<98xf32, #tpu.memory_space<smem>>
      %141 = vector.broadcast %139 : f32 to vector<2x256xf32>
      %142 = arith.mulf %141, %137 : vector<2x256xf32>
      %143 = vector.broadcast %140 : f32 to vector<2x256xf32>
      %144 = arith.mulf %143, %138 : vector<2x256xf32>
      %145 = arith.addf %142, %144 : vector<2x256xf32>
      %cst_65 = arith.constant 0.000000e+00 : f32
      %146 = vector.broadcast %cst_65 : f32 to vector<2x256xf32>
      %147 = arith.select %136, %145, %146 : vector<2x256xi1>, vector<2x256xf32>
      %148 = arith.addf %129, %147 : vector<2x256xf32>
      %c0_66 = arith.constant 0 : index
      %c17 = arith.constant 17 : index
      %149 = vector.load %arg7[%c0_66, %c17] : memref<2x358xf32, #tpu.memory_space<vmem>>, vector<2x256xf32>
      %c0_67 = arith.constant 0 : index
      %c17_68 = arith.constant 17 : index
      %150 = vector.load %arg8[%c0_67, %c17_68] : memref<2x358xf32, #tpu.memory_space<vmem>>, vector<2x256xf32>
      %c8 = arith.constant 8 : index
      %151 = memref.load %arg2[%c8] : memref<98xf32, #tpu.memory_space<smem>>
      %c57 = arith.constant 57 : index
      %152 = memref.load %arg2[%c57] : memref<98xf32, #tpu.memory_space<smem>>
      %153 = vector.broadcast %151 : f32 to vector<2x256xf32>
      %154 = arith.mulf %153, %149 : vector<2x256xf32>
      %155 = vector.broadcast %152 : f32 to vector<2x256xf32>
      %156 = arith.mulf %155, %150 : vector<2x256xf32>
      %157 = arith.addf %154, %156 : vector<2x256xf32>
      %cst_69 = arith.constant 0.000000e+00 : f32
      %158 = vector.broadcast %cst_69 : f32 to vector<2x256xf32>
      %159 = arith.select %136, %157, %158 : vector<2x256xi1>, vector<2x256xf32>
      %160 = arith.addf %148, %159 : vector<2x256xf32>
      %c0_70 = arith.constant 0 : index
      %c33 = arith.constant 33 : index
      %161 = vector.load %arg7[%c0_70, %c33] : memref<2x358xf32, #tpu.memory_space<vmem>>, vector<2x256xf32>
      %c0_71 = arith.constant 0 : index
      %c33_72 = arith.constant 33 : index
      %162 = vector.load %arg8[%c0_71, %c33_72] : memref<2x358xf32, #tpu.memory_space<vmem>>, vector<2x256xf32>
      %c15 = arith.constant 15 : index
      %163 = memref.load %arg2[%c15] : memref<98xf32, #tpu.memory_space<smem>>
      %c64_73 = arith.constant 64 : index
      %164 = memref.load %arg2[%c64_73] : memref<98xf32, #tpu.memory_space<smem>>
      %165 = vector.broadcast %163 : f32 to vector<2x256xf32>
      %166 = arith.mulf %165, %161 : vector<2x256xf32>
      %167 = vector.broadcast %164 : f32 to vector<2x256xf32>
      %168 = arith.mulf %167, %162 : vector<2x256xf32>
      %169 = arith.addf %166, %168 : vector<2x256xf32>
      %cst_74 = arith.constant 0.000000e+00 : f32
      %170 = vector.broadcast %cst_74 : f32 to vector<2x256xf32>
      %171 = arith.select %136, %169, %170 : vector<2x256xi1>, vector<2x256xf32>
      %172 = arith.addf %160, %171 : vector<2x256xf32>
      %c0_75 = arith.constant 0 : index
      %c49_76 = arith.constant 49 : index
      %173 = vector.load %arg7[%c0_75, %c49_76] : memref<2x358xf32, #tpu.memory_space<vmem>>, vector<2x256xf32>
      %c0_77 = arith.constant 0 : index
      %c49_78 = arith.constant 49 : index
      %174 = vector.load %arg8[%c0_77, %c49_78] : memref<2x358xf32, #tpu.memory_space<vmem>>, vector<2x256xf32>
      %c22 = arith.constant 22 : index
      %175 = memref.load %arg2[%c22] : memref<98xf32, #tpu.memory_space<smem>>
      %c71 = arith.constant 71 : index
      %176 = memref.load %arg2[%c71] : memref<98xf32, #tpu.memory_space<smem>>
      %177 = vector.broadcast %175 : f32 to vector<2x256xf32>
      %178 = arith.mulf %177, %173 : vector<2x256xf32>
      %179 = vector.broadcast %176 : f32 to vector<2x256xf32>
      %180 = arith.mulf %179, %174 : vector<2x256xf32>
      %181 = arith.addf %178, %180 : vector<2x256xf32>
      %cst_79 = arith.constant 0.000000e+00 : f32
      %182 = vector.broadcast %cst_79 : f32 to vector<2x256xf32>
      %183 = arith.select %136, %181, %182 : vector<2x256xi1>, vector<2x256xf32>
      %184 = arith.addf %172, %183 : vector<2x256xf32>
      %c0_80 = arith.constant 0 : index
      %c65 = arith.constant 65 : index
      %185 = vector.load %arg7[%c0_80, %c65] : memref<2x358xf32, #tpu.memory_space<vmem>>, vector<2x256xf32>
      %c0_81 = arith.constant 0 : index
      %c65_82 = arith.constant 65 : index
      %186 = vector.load %arg8[%c0_81, %c65_82] : memref<2x358xf32, #tpu.memory_space<vmem>>, vector<2x256xf32>
      %c29 = arith.constant 29 : index
      %187 = memref.load %arg2[%c29] : memref<98xf32, #tpu.memory_space<smem>>
      %c78 = arith.constant 78 : index
      %188 = memref.load %arg2[%c78] : memref<98xf32, #tpu.memory_space<smem>>
      %189 = vector.broadcast %187 : f32 to vector<2x256xf32>
      %190 = arith.mulf %189, %185 : vector<2x256xf32>
      %191 = vector.broadcast %188 : f32 to vector<2x256xf32>
      %192 = arith.mulf %191, %186 : vector<2x256xf32>
      %193 = arith.addf %190, %192 : vector<2x256xf32>
      %cst_83 = arith.constant 0.000000e+00 : f32
      %194 = vector.broadcast %cst_83 : f32 to vector<2x256xf32>
      %195 = arith.select %136, %193, %194 : vector<2x256xi1>, vector<2x256xf32>
      %196 = arith.addf %184, %195 : vector<2x256xf32>
      %c0_84 = arith.constant 0 : index
      %c81 = arith.constant 81 : index
      %197 = vector.load %arg7[%c0_84, %c81] : memref<2x358xf32, #tpu.memory_space<vmem>>, vector<2x256xf32>
      %c0_85 = arith.constant 0 : index
      %c81_86 = arith.constant 81 : index
      %198 = vector.load %arg8[%c0_85, %c81_86] : memref<2x358xf32, #tpu.memory_space<vmem>>, vector<2x256xf32>
      %c36 = arith.constant 36 : index
      %199 = memref.load %arg2[%c36] : memref<98xf32, #tpu.memory_space<smem>>
      %c85 = arith.constant 85 : index
      %200 = memref.load %arg2[%c85] : memref<98xf32, #tpu.memory_space<smem>>
      %201 = vector.broadcast %199 : f32 to vector<2x256xf32>
      %202 = arith.mulf %201, %197 : vector<2x256xf32>
      %203 = vector.broadcast %200 : f32 to vector<2x256xf32>
      %204 = arith.mulf %203, %198 : vector<2x256xf32>
      %205 = arith.addf %202, %204 : vector<2x256xf32>
      %cst_87 = arith.constant 0.000000e+00 : f32
      %206 = vector.broadcast %cst_87 : f32 to vector<2x256xf32>
      %207 = arith.select %136, %205, %206 : vector<2x256xi1>, vector<2x256xf32>
      %208 = arith.addf %196, %207 : vector<2x256xf32>
      %c0_88 = arith.constant 0 : index
      %c97 = arith.constant 97 : index
      %209 = vector.load %arg7[%c0_88, %c97] : memref<2x358xf32, #tpu.memory_space<vmem>>, vector<2x256xf32>
      %c0_89 = arith.constant 0 : index
      %c97_90 = arith.constant 97 : index
      %210 = vector.load %arg8[%c0_89, %c97_90] : memref<2x358xf32, #tpu.memory_space<vmem>>, vector<2x256xf32>
      %c43 = arith.constant 43 : index
      %211 = memref.load %arg2[%c43] : memref<98xf32, #tpu.memory_space<smem>>
      %c92 = arith.constant 92 : index
      %212 = memref.load %arg2[%c92] : memref<98xf32, #tpu.memory_space<smem>>
      %213 = vector.broadcast %211 : f32 to vector<2x256xf32>
      %214 = arith.mulf %213, %209 : vector<2x256xf32>
      %215 = vector.broadcast %212 : f32 to vector<2x256xf32>
      %216 = arith.mulf %215, %210 : vector<2x256xf32>
      %217 = arith.addf %214, %216 : vector<2x256xf32>
      %cst_91 = arith.constant 0.000000e+00 : f32
      %218 = vector.broadcast %cst_91 : f32 to vector<2x256xf32>
      %219 = arith.select %136, %217, %218 : vector<2x256xi1>, vector<2x256xf32>
      %220 = arith.addf %208, %219 : vector<2x256xf32>
      %c-1_i32 = arith.constant -1 : i32
      %221 = vector.broadcast %c-1_i32 : i32 to vector<2x256xi32>
      %222 = arith.addi %37, %221 : vector<2x256xi32>
      %c0_i32_92 = arith.constant 0 : i32
      %223 = vector.broadcast %c0_i32_92 : i32 to vector<2x256xi32>
      %224 = arith.cmpi sge, %222, %223 : vector<2x256xi32>
      %c16_i32_93 = arith.constant 16 : i32
      %225 = vector.broadcast %c16_i32_93 : i32 to vector<2x256xi32>
      %226 = arith.cmpi slt, %222, %225 : vector<2x256xi32>
      %227 = arith.andi %224, %226 : vector<2x256xi1>
      %c0_94 = arith.constant 0 : index
      %c2 = arith.constant 2 : index
      %228 = vector.load %arg7[%c0_94, %c2] : memref<2x358xf32, #tpu.memory_space<vmem>>, vector<2x256xf32>
      %c0_95 = arith.constant 0 : index
      %c2_96 = arith.constant 2 : index
      %229 = vector.load %arg8[%c0_95, %c2_96] : memref<2x358xf32, #tpu.memory_space<vmem>>, vector<2x256xf32>
      %c2_97 = arith.constant 2 : index
      %230 = memref.load %arg2[%c2_97] : memref<98xf32, #tpu.memory_space<smem>>
      %c51_98 = arith.constant 51 : index
      %231 = memref.load %arg2[%c51_98] : memref<98xf32, #tpu.memory_space<smem>>
      %232 = vector.broadcast %230 : f32 to vector<2x256xf32>
      %233 = arith.mulf %232, %228 : vector<2x256xf32>
      %234 = vector.broadcast %231 : f32 to vector<2x256xf32>
      %235 = arith.mulf %234, %229 : vector<2x256xf32>
      %236 = arith.addf %233, %235 : vector<2x256xf32>
      %cst_99 = arith.constant 0.000000e+00 : f32
      %237 = vector.broadcast %cst_99 : f32 to vector<2x256xf32>
      %238 = arith.select %227, %236, %237 : vector<2x256xi1>, vector<2x256xf32>
      %239 = arith.addf %220, %238 : vector<2x256xf32>
      %c0_100 = arith.constant 0 : index
      %c18 = arith.constant 18 : index
      %240 = vector.load %arg7[%c0_100, %c18] : memref<2x358xf32, #tpu.memory_space<vmem>>, vector<2x256xf32>
      %c0_101 = arith.constant 0 : index
      %c18_102 = arith.constant 18 : index
      %241 = vector.load %arg8[%c0_101, %c18_102] : memref<2x358xf32, #tpu.memory_space<vmem>>, vector<2x256xf32>
      %c9 = arith.constant 9 : index
      %242 = memref.load %arg2[%c9] : memref<98xf32, #tpu.memory_space<smem>>
      %c58 = arith.constant 58 : index
      %243 = memref.load %arg2[%c58] : memref<98xf32, #tpu.memory_space<smem>>
      %244 = vector.broadcast %242 : f32 to vector<2x256xf32>
      %245 = arith.mulf %244, %240 : vector<2x256xf32>
      %246 = vector.broadcast %243 : f32 to vector<2x256xf32>
      %247 = arith.mulf %246, %241 : vector<2x256xf32>
      %248 = arith.addf %245, %247 : vector<2x256xf32>
      %cst_103 = arith.constant 0.000000e+00 : f32
      %249 = vector.broadcast %cst_103 : f32 to vector<2x256xf32>
      %250 = arith.select %227, %248, %249 : vector<2x256xi1>, vector<2x256xf32>
      %251 = arith.addf %239, %250 : vector<2x256xf32>
      %c0_104 = arith.constant 0 : index
      %c34 = arith.constant 34 : index
      %252 = vector.load %arg7[%c0_104, %c34] : memref<2x358xf32, #tpu.memory_space<vmem>>, vector<2x256xf32>
      %c0_105 = arith.constant 0 : index
      %c34_106 = arith.constant 34 : index
      %253 = vector.load %arg8[%c0_105, %c34_106] : memref<2x358xf32, #tpu.memory_space<vmem>>, vector<2x256xf32>
      %c16_107 = arith.constant 16 : index
      %254 = memref.load %arg2[%c16_107] : memref<98xf32, #tpu.memory_space<smem>>
      %c65_108 = arith.constant 65 : index
      %255 = memref.load %arg2[%c65_108] : memref<98xf32, #tpu.memory_space<smem>>
      %256 = vector.broadcast %254 : f32 to vector<2x256xf32>
      %257 = arith.mulf %256, %252 : vector<2x256xf32>
      %258 = vector.broadcast %255 : f32 to vector<2x256xf32>
      %259 = arith.mulf %258, %253 : vector<2x256xf32>
      %260 = arith.addf %257, %259 : vector<2x256xf32>
      %cst_109 = arith.constant 0.000000e+00 : f32
      %261 = vector.broadcast %cst_109 : f32 to vector<2x256xf32>
      %262 = arith.select %227, %260, %261 : vector<2x256xi1>, vector<2x256xf32>
      %263 = arith.addf %251, %262 : vector<2x256xf32>
      %c0_110 = arith.constant 0 : index
      %c50_111 = arith.constant 50 : index
      %264 = vector.load %arg7[%c0_110, %c50_111] : memref<2x358xf32, #tpu.memory_space<vmem>>, vector<2x256xf32>
      %c0_112 = arith.constant 0 : index
      %c50_113 = arith.constant 50 : index
      %265 = vector.load %arg8[%c0_112, %c50_113] : memref<2x358xf32, #tpu.memory_space<vmem>>, vector<2x256xf32>
      %c23 = arith.constant 23 : index
      %266 = memref.load %arg2[%c23] : memref<98xf32, #tpu.memory_space<smem>>
      %c72 = arith.constant 72 : index
      %267 = memref.load %arg2[%c72] : memref<98xf32, #tpu.memory_space<smem>>
      %268 = vector.broadcast %266 : f32 to vector<2x256xf32>
      %269 = arith.mulf %268, %264 : vector<2x256xf32>
      %270 = vector.broadcast %267 : f32 to vector<2x256xf32>
      %271 = arith.mulf %270, %265 : vector<2x256xf32>
      %272 = arith.addf %269, %271 : vector<2x256xf32>
      %cst_114 = arith.constant 0.000000e+00 : f32
      %273 = vector.broadcast %cst_114 : f32 to vector<2x256xf32>
      %274 = arith.select %227, %272, %273 : vector<2x256xi1>, vector<2x256xf32>
      %275 = arith.addf %263, %274 : vector<2x256xf32>
      %c0_115 = arith.constant 0 : index
      %c66 = arith.constant 66 : index
      %276 = vector.load %arg7[%c0_115, %c66] : memref<2x358xf32, #tpu.memory_space<vmem>>, vector<2x256xf32>
      %c0_116 = arith.constant 0 : index
      %c66_117 = arith.constant 66 : index
      %277 = vector.load %arg8[%c0_116, %c66_117] : memref<2x358xf32, #tpu.memory_space<vmem>>, vector<2x256xf32>
      %c30 = arith.constant 30 : index
      %278 = memref.load %arg2[%c30] : memref<98xf32, #tpu.memory_space<smem>>
      %c79 = arith.constant 79 : index
      %279 = memref.load %arg2[%c79] : memref<98xf32, #tpu.memory_space<smem>>
      %280 = vector.broadcast %278 : f32 to vector<2x256xf32>
      %281 = arith.mulf %280, %276 : vector<2x256xf32>
      %282 = vector.broadcast %279 : f32 to vector<2x256xf32>
      %283 = arith.mulf %282, %277 : vector<2x256xf32>
      %284 = arith.addf %281, %283 : vector<2x256xf32>
      %cst_118 = arith.constant 0.000000e+00 : f32
      %285 = vector.broadcast %cst_118 : f32 to vector<2x256xf32>
      %286 = arith.select %227, %284, %285 : vector<2x256xi1>, vector<2x256xf32>
      %287 = arith.addf %275, %286 : vector<2x256xf32>
      %c0_119 = arith.constant 0 : index
      %c82 = arith.constant 82 : index
      %288 = vector.load %arg7[%c0_119, %c82] : memref<2x358xf32, #tpu.memory_space<vmem>>, vector<2x256xf32>
      %c0_120 = arith.constant 0 : index
      %c82_121 = arith.constant 82 : index
      %289 = vector.load %arg8[%c0_120, %c82_121] : memref<2x358xf32, #tpu.memory_space<vmem>>, vector<2x256xf32>
      %c37 = arith.constant 37 : index
      %290 = memref.load %arg2[%c37] : memref<98xf32, #tpu.memory_space<smem>>
      %c86 = arith.constant 86 : index
      %291 = memref.load %arg2[%c86] : memref<98xf32, #tpu.memory_space<smem>>
      %292 = vector.broadcast %290 : f32 to vector<2x256xf32>
      %293 = arith.mulf %292, %288 : vector<2x256xf32>
      %294 = vector.broadcast %291 : f32 to vector<2x256xf32>
      %295 = arith.mulf %294, %289 : vector<2x256xf32>
      %296 = arith.addf %293, %295 : vector<2x256xf32>
      %cst_122 = arith.constant 0.000000e+00 : f32
      %297 = vector.broadcast %cst_122 : f32 to vector<2x256xf32>
      %298 = arith.select %227, %296, %297 : vector<2x256xi1>, vector<2x256xf32>
      %299 = arith.addf %287, %298 : vector<2x256xf32>
      %c0_123 = arith.constant 0 : index
      %c98 = arith.constant 98 : index
      %300 = vector.load %arg7[%c0_123, %c98] : memref<2x358xf32, #tpu.memory_space<vmem>>, vector<2x256xf32>
      %c0_124 = arith.constant 0 : index
      %c98_125 = arith.constant 98 : index
      %301 = vector.load %arg8[%c0_124, %c98_125] : memref<2x358xf32, #tpu.memory_space<vmem>>, vector<2x256xf32>
      %c44 = arith.constant 44 : index
      %302 = memref.load %arg2[%c44] : memref<98xf32, #tpu.memory_space<smem>>
      %c93 = arith.constant 93 : index
      %303 = memref.load %arg2[%c93] : memref<98xf32, #tpu.memory_space<smem>>
      %304 = vector.broadcast %302 : f32 to vector<2x256xf32>
      %305 = arith.mulf %304, %300 : vector<2x256xf32>
      %306 = vector.broadcast %303 : f32 to vector<2x256xf32>
      %307 = arith.mulf %306, %301 : vector<2x256xf32>
      %308 = arith.addf %305, %307 : vector<2x256xf32>
      %cst_126 = arith.constant 0.000000e+00 : f32
      %309 = vector.broadcast %cst_126 : f32 to vector<2x256xf32>
      %310 = arith.select %227, %308, %309 : vector<2x256xi1>, vector<2x256xf32>
      %311 = arith.addf %299, %310 : vector<2x256xf32>
      %c0_i32_127 = arith.constant 0 : i32
      %312 = vector.broadcast %c0_i32_127 : i32 to vector<2x256xi32>
      %313 = arith.addi %37, %312 : vector<2x256xi32>
      %c0_i32_128 = arith.constant 0 : i32
      %314 = vector.broadcast %c0_i32_128 : i32 to vector<2x256xi32>
      %315 = arith.cmpi sge, %313, %314 : vector<2x256xi32>
      %c16_i32_129 = arith.constant 16 : i32
      %316 = vector.broadcast %c16_i32_129 : i32 to vector<2x256xi32>
      %317 = arith.cmpi slt, %313, %316 : vector<2x256xi32>
      %318 = arith.andi %315, %317 : vector<2x256xi1>
      %c0_130 = arith.constant 0 : index
      %c3 = arith.constant 3 : index
      %319 = vector.load %arg7[%c0_130, %c3] : memref<2x358xf32, #tpu.memory_space<vmem>>, vector<2x256xf32>
      %c0_131 = arith.constant 0 : index
      %c3_132 = arith.constant 3 : index
      %320 = vector.load %arg8[%c0_131, %c3_132] : memref<2x358xf32, #tpu.memory_space<vmem>>, vector<2x256xf32>
      %c3_133 = arith.constant 3 : index
      %321 = memref.load %arg2[%c3_133] : memref<98xf32, #tpu.memory_space<smem>>
      %c52 = arith.constant 52 : index
      %322 = memref.load %arg2[%c52] : memref<98xf32, #tpu.memory_space<smem>>
      %323 = vector.broadcast %321 : f32 to vector<2x256xf32>
      %324 = arith.mulf %323, %319 : vector<2x256xf32>
      %325 = vector.broadcast %322 : f32 to vector<2x256xf32>
      %326 = arith.mulf %325, %320 : vector<2x256xf32>
      %327 = arith.addf %324, %326 : vector<2x256xf32>
      %cst_134 = arith.constant 0.000000e+00 : f32
      %328 = vector.broadcast %cst_134 : f32 to vector<2x256xf32>
      %329 = arith.select %318, %327, %328 : vector<2x256xi1>, vector<2x256xf32>
      %330 = arith.addf %311, %329 : vector<2x256xf32>
      %c0_135 = arith.constant 0 : index
      %c19 = arith.constant 19 : index
      %331 = vector.load %arg7[%c0_135, %c19] : memref<2x358xf32, #tpu.memory_space<vmem>>, vector<2x256xf32>
      %c0_136 = arith.constant 0 : index
      %c19_137 = arith.constant 19 : index
      %332 = vector.load %arg8[%c0_136, %c19_137] : memref<2x358xf32, #tpu.memory_space<vmem>>, vector<2x256xf32>
      %c10 = arith.constant 10 : index
      %333 = memref.load %arg2[%c10] : memref<98xf32, #tpu.memory_space<smem>>
      %c59 = arith.constant 59 : index
      %334 = memref.load %arg2[%c59] : memref<98xf32, #tpu.memory_space<smem>>
      %335 = vector.broadcast %333 : f32 to vector<2x256xf32>
      %336 = arith.mulf %335, %331 : vector<2x256xf32>
      %337 = vector.broadcast %334 : f32 to vector<2x256xf32>
      %338 = arith.mulf %337, %332 : vector<2x256xf32>
      %339 = arith.addf %336, %338 : vector<2x256xf32>
      %cst_138 = arith.constant 0.000000e+00 : f32
      %340 = vector.broadcast %cst_138 : f32 to vector<2x256xf32>
      %341 = arith.select %318, %339, %340 : vector<2x256xi1>, vector<2x256xf32>
      %342 = arith.addf %330, %341 : vector<2x256xf32>
      %c0_139 = arith.constant 0 : index
      %c35_140 = arith.constant 35 : index
      %343 = vector.load %arg7[%c0_139, %c35_140] : memref<2x358xf32, #tpu.memory_space<vmem>>, vector<2x256xf32>
      %c0_141 = arith.constant 0 : index
      %c35_142 = arith.constant 35 : index
      %344 = vector.load %arg8[%c0_141, %c35_142] : memref<2x358xf32, #tpu.memory_space<vmem>>, vector<2x256xf32>
      %c17_143 = arith.constant 17 : index
      %345 = memref.load %arg2[%c17_143] : memref<98xf32, #tpu.memory_space<smem>>
      %c66_144 = arith.constant 66 : index
      %346 = memref.load %arg2[%c66_144] : memref<98xf32, #tpu.memory_space<smem>>
      %347 = vector.broadcast %345 : f32 to vector<2x256xf32>
      %348 = arith.mulf %347, %343 : vector<2x256xf32>
      %349 = vector.broadcast %346 : f32 to vector<2x256xf32>
      %350 = arith.mulf %349, %344 : vector<2x256xf32>
      %351 = arith.addf %348, %350 : vector<2x256xf32>
      %cst_145 = arith.constant 0.000000e+00 : f32
      %352 = vector.broadcast %cst_145 : f32 to vector<2x256xf32>
      %353 = arith.select %318, %351, %352 : vector<2x256xi1>, vector<2x256xf32>
      %354 = arith.addf %342, %353 : vector<2x256xf32>
      %c0_146 = arith.constant 0 : index
      %c51_147 = arith.constant 51 : index
      %355 = vector.load %arg7[%c0_146, %c51_147] : memref<2x358xf32, #tpu.memory_space<vmem>>, vector<2x256xf32>
      %c0_148 = arith.constant 0 : index
      %c51_149 = arith.constant 51 : index
      %356 = vector.load %arg8[%c0_148, %c51_149] : memref<2x358xf32, #tpu.memory_space<vmem>>, vector<2x256xf32>
      %c24 = arith.constant 24 : index
      %357 = memref.load %arg2[%c24] : memref<98xf32, #tpu.memory_space<smem>>
      %c73 = arith.constant 73 : index
      %358 = memref.load %arg2[%c73] : memref<98xf32, #tpu.memory_space<smem>>
      %359 = vector.broadcast %357 : f32 to vector<2x256xf32>
      %360 = arith.mulf %359, %355 : vector<2x256xf32>
      %361 = vector.broadcast %358 : f32 to vector<2x256xf32>
      %362 = arith.mulf %361, %356 : vector<2x256xf32>
      %363 = arith.addf %360, %362 : vector<2x256xf32>
      %cst_150 = arith.constant 0.000000e+00 : f32
      %364 = vector.broadcast %cst_150 : f32 to vector<2x256xf32>
      %365 = arith.select %318, %363, %364 : vector<2x256xi1>, vector<2x256xf32>
      %366 = arith.addf %354, %365 : vector<2x256xf32>
      %c0_151 = arith.constant 0 : index
      %c67 = arith.constant 67 : index
      %367 = vector.load %arg7[%c0_151, %c67] : memref<2x358xf32, #tpu.memory_space<vmem>>, vector<2x256xf32>
      %c0_152 = arith.constant 0 : index
      %c67_153 = arith.constant 67 : index
      %368 = vector.load %arg8[%c0_152, %c67_153] : memref<2x358xf32, #tpu.memory_space<vmem>>, vector<2x256xf32>
      %c31 = arith.constant 31 : index
      %369 = memref.load %arg2[%c31] : memref<98xf32, #tpu.memory_space<smem>>
      %c80_154 = arith.constant 80 : index
      %370 = memref.load %arg2[%c80_154] : memref<98xf32, #tpu.memory_space<smem>>
      %371 = vector.broadcast %369 : f32 to vector<2x256xf32>
      %372 = arith.mulf %371, %367 : vector<2x256xf32>
      %373 = vector.broadcast %370 : f32 to vector<2x256xf32>
      %374 = arith.mulf %373, %368 : vector<2x256xf32>
      %375 = arith.addf %372, %374 : vector<2x256xf32>
      %cst_155 = arith.constant 0.000000e+00 : f32
      %376 = vector.broadcast %cst_155 : f32 to vector<2x256xf32>
      %377 = arith.select %318, %375, %376 : vector<2x256xi1>, vector<2x256xf32>
      %378 = arith.addf %366, %377 : vector<2x256xf32>
      %c0_156 = arith.constant 0 : index
      %c83 = arith.constant 83 : index
      %379 = vector.load %arg7[%c0_156, %c83] : memref<2x358xf32, #tpu.memory_space<vmem>>, vector<2x256xf32>
      %c0_157 = arith.constant 0 : index
      %c83_158 = arith.constant 83 : index
      %380 = vector.load %arg8[%c0_157, %c83_158] : memref<2x358xf32, #tpu.memory_space<vmem>>, vector<2x256xf32>
      %c38 = arith.constant 38 : index
      %381 = memref.load %arg2[%c38] : memref<98xf32, #tpu.memory_space<smem>>
      %c87 = arith.constant 87 : index
      %382 = memref.load %arg2[%c87] : memref<98xf32, #tpu.memory_space<smem>>
      %383 = vector.broadcast %381 : f32 to vector<2x256xf32>
      %384 = arith.mulf %383, %379 : vector<2x256xf32>
      %385 = vector.broadcast %382 : f32 to vector<2x256xf32>
      %386 = arith.mulf %385, %380 : vector<2x256xf32>
      %387 = arith.addf %384, %386 : vector<2x256xf32>
      %cst_159 = arith.constant 0.000000e+00 : f32
      %388 = vector.broadcast %cst_159 : f32 to vector<2x256xf32>
      %389 = arith.select %318, %387, %388 : vector<2x256xi1>, vector<2x256xf32>
      %390 = arith.addf %378, %389 : vector<2x256xf32>
      %c0_160 = arith.constant 0 : index
      %c99 = arith.constant 99 : index
      %391 = vector.load %arg7[%c0_160, %c99] : memref<2x358xf32, #tpu.memory_space<vmem>>, vector<2x256xf32>
      %c0_161 = arith.constant 0 : index
      %c99_162 = arith.constant 99 : index
      %392 = vector.load %arg8[%c0_161, %c99_162] : memref<2x358xf32, #tpu.memory_space<vmem>>, vector<2x256xf32>
      %c45 = arith.constant 45 : index
      %393 = memref.load %arg2[%c45] : memref<98xf32, #tpu.memory_space<smem>>
      %c94 = arith.constant 94 : index
      %394 = memref.load %arg2[%c94] : memref<98xf32, #tpu.memory_space<smem>>
      %395 = vector.broadcast %393 : f32 to vector<2x256xf32>
      %396 = arith.mulf %395, %391 : vector<2x256xf32>
      %397 = vector.broadcast %394 : f32 to vector<2x256xf32>
      %398 = arith.mulf %397, %392 : vector<2x256xf32>
      %399 = arith.addf %396, %398 : vector<2x256xf32>
      %cst_163 = arith.constant 0.000000e+00 : f32
      %400 = vector.broadcast %cst_163 : f32 to vector<2x256xf32>
      %401 = arith.select %318, %399, %400 : vector<2x256xi1>, vector<2x256xf32>
      %402 = arith.addf %390, %401 : vector<2x256xf32>
      %c1_i32_164 = arith.constant 1 : i32
      %403 = vector.broadcast %c1_i32_164 : i32 to vector<2x256xi32>
      %404 = arith.addi %37, %403 : vector<2x256xi32>
      %c0_i32_165 = arith.constant 0 : i32
      %405 = vector.broadcast %c0_i32_165 : i32 to vector<2x256xi32>
      %406 = arith.cmpi sge, %404, %405 : vector<2x256xi32>
      %c16_i32_166 = arith.constant 16 : i32
      %407 = vector.broadcast %c16_i32_166 : i32 to vector<2x256xi32>
      %408 = arith.cmpi slt, %404, %407 : vector<2x256xi32>
      %409 = arith.andi %406, %408 : vector<2x256xi1>
      %c0_167 = arith.constant 0 : index
      %c4 = arith.constant 4 : index
      %410 = vector.load %arg7[%c0_167, %c4] : memref<2x358xf32, #tpu.memory_space<vmem>>, vector<2x256xf32>
      %c0_168 = arith.constant 0 : index
      %c4_169 = arith.constant 4 : index
      %411 = vector.load %arg8[%c0_168, %c4_169] : memref<2x358xf32, #tpu.memory_space<vmem>>, vector<2x256xf32>
      %c4_170 = arith.constant 4 : index
      %412 = memref.load %arg2[%c4_170] : memref<98xf32, #tpu.memory_space<smem>>
      %c53 = arith.constant 53 : index
      %413 = memref.load %arg2[%c53] : memref<98xf32, #tpu.memory_space<smem>>
      %414 = vector.broadcast %412 : f32 to vector<2x256xf32>
      %415 = arith.mulf %414, %410 : vector<2x256xf32>
      %416 = vector.broadcast %413 : f32 to vector<2x256xf32>
      %417 = arith.mulf %416, %411 : vector<2x256xf32>
      %418 = arith.addf %415, %417 : vector<2x256xf32>
      %cst_171 = arith.constant 0.000000e+00 : f32
      %419 = vector.broadcast %cst_171 : f32 to vector<2x256xf32>
      %420 = arith.select %409, %418, %419 : vector<2x256xi1>, vector<2x256xf32>
      %421 = arith.addf %402, %420 : vector<2x256xf32>
      %c0_172 = arith.constant 0 : index
      %c20 = arith.constant 20 : index
      %422 = vector.load %arg7[%c0_172, %c20] : memref<2x358xf32, #tpu.memory_space<vmem>>, vector<2x256xf32>
      %c0_173 = arith.constant 0 : index
      %c20_174 = arith.constant 20 : index
      %423 = vector.load %arg8[%c0_173, %c20_174] : memref<2x358xf32, #tpu.memory_space<vmem>>, vector<2x256xf32>
      %c11 = arith.constant 11 : index
      %424 = memref.load %arg2[%c11] : memref<98xf32, #tpu.memory_space<smem>>
      %c60 = arith.constant 60 : index
      %425 = memref.load %arg2[%c60] : memref<98xf32, #tpu.memory_space<smem>>
      %426 = vector.broadcast %424 : f32 to vector<2x256xf32>
      %427 = arith.mulf %426, %422 : vector<2x256xf32>
      %428 = vector.broadcast %425 : f32 to vector<2x256xf32>
      %429 = arith.mulf %428, %423 : vector<2x256xf32>
      %430 = arith.addf %427, %429 : vector<2x256xf32>
      %cst_175 = arith.constant 0.000000e+00 : f32
      %431 = vector.broadcast %cst_175 : f32 to vector<2x256xf32>
      %432 = arith.select %409, %430, %431 : vector<2x256xi1>, vector<2x256xf32>
      %433 = arith.addf %421, %432 : vector<2x256xf32>
      %c0_176 = arith.constant 0 : index
      %c36_177 = arith.constant 36 : index
      %434 = vector.load %arg7[%c0_176, %c36_177] : memref<2x358xf32, #tpu.memory_space<vmem>>, vector<2x256xf32>
      %c0_178 = arith.constant 0 : index
      %c36_179 = arith.constant 36 : index
      %435 = vector.load %arg8[%c0_178, %c36_179] : memref<2x358xf32, #tpu.memory_space<vmem>>, vector<2x256xf32>
      %c18_180 = arith.constant 18 : index
      %436 = memref.load %arg2[%c18_180] : memref<98xf32, #tpu.memory_space<smem>>
      %c67_181 = arith.constant 67 : index
      %437 = memref.load %arg2[%c67_181] : memref<98xf32, #tpu.memory_space<smem>>
      %438 = vector.broadcast %436 : f32 to vector<2x256xf32>
      %439 = arith.mulf %438, %434 : vector<2x256xf32>
      %440 = vector.broadcast %437 : f32 to vector<2x256xf32>
      %441 = arith.mulf %440, %435 : vector<2x256xf32>
      %442 = arith.addf %439, %441 : vector<2x256xf32>
      %cst_182 = arith.constant 0.000000e+00 : f32
      %443 = vector.broadcast %cst_182 : f32 to vector<2x256xf32>
      %444 = arith.select %409, %442, %443 : vector<2x256xi1>, vector<2x256xf32>
      %445 = arith.addf %433, %444 : vector<2x256xf32>
      %c0_183 = arith.constant 0 : index
      %c52_184 = arith.constant 52 : index
      %446 = vector.load %arg7[%c0_183, %c52_184] : memref<2x358xf32, #tpu.memory_space<vmem>>, vector<2x256xf32>
      %c0_185 = arith.constant 0 : index
      %c52_186 = arith.constant 52 : index
      %447 = vector.load %arg8[%c0_185, %c52_186] : memref<2x358xf32, #tpu.memory_space<vmem>>, vector<2x256xf32>
      %c25 = arith.constant 25 : index
      %448 = memref.load %arg2[%c25] : memref<98xf32, #tpu.memory_space<smem>>
      %c74 = arith.constant 74 : index
      %449 = memref.load %arg2[%c74] : memref<98xf32, #tpu.memory_space<smem>>
      %450 = vector.broadcast %448 : f32 to vector<2x256xf32>
      %451 = arith.mulf %450, %446 : vector<2x256xf32>
      %452 = vector.broadcast %449 : f32 to vector<2x256xf32>
      %453 = arith.mulf %452, %447 : vector<2x256xf32>
      %454 = arith.addf %451, %453 : vector<2x256xf32>
      %cst_187 = arith.constant 0.000000e+00 : f32
      %455 = vector.broadcast %cst_187 : f32 to vector<2x256xf32>
      %456 = arith.select %409, %454, %455 : vector<2x256xi1>, vector<2x256xf32>
      %457 = arith.addf %445, %456 : vector<2x256xf32>
      %c0_188 = arith.constant 0 : index
      %c68 = arith.constant 68 : index
      %458 = vector.load %arg7[%c0_188, %c68] : memref<2x358xf32, #tpu.memory_space<vmem>>, vector<2x256xf32>
      %c0_189 = arith.constant 0 : index
      %c68_190 = arith.constant 68 : index
      %459 = vector.load %arg8[%c0_189, %c68_190] : memref<2x358xf32, #tpu.memory_space<vmem>>, vector<2x256xf32>
      %c32_191 = arith.constant 32 : index
      %460 = memref.load %arg2[%c32_191] : memref<98xf32, #tpu.memory_space<smem>>
      %c81_192 = arith.constant 81 : index
      %461 = memref.load %arg2[%c81_192] : memref<98xf32, #tpu.memory_space<smem>>
      %462 = vector.broadcast %460 : f32 to vector<2x256xf32>
      %463 = arith.mulf %462, %458 : vector<2x256xf32>
      %464 = vector.broadcast %461 : f32 to vector<2x256xf32>
      %465 = arith.mulf %464, %459 : vector<2x256xf32>
      %466 = arith.addf %463, %465 : vector<2x256xf32>
      %cst_193 = arith.constant 0.000000e+00 : f32
      %467 = vector.broadcast %cst_193 : f32 to vector<2x256xf32>
      %468 = arith.select %409, %466, %467 : vector<2x256xi1>, vector<2x256xf32>
      %469 = arith.addf %457, %468 : vector<2x256xf32>
      %c0_194 = arith.constant 0 : index
      %c84_195 = arith.constant 84 : index
      %470 = vector.load %arg7[%c0_194, %c84_195] : memref<2x358xf32, #tpu.memory_space<vmem>>, vector<2x256xf32>
      %c0_196 = arith.constant 0 : index
      %c84_197 = arith.constant 84 : index
      %471 = vector.load %arg8[%c0_196, %c84_197] : memref<2x358xf32, #tpu.memory_space<vmem>>, vector<2x256xf32>
      %c39 = arith.constant 39 : index
      %472 = memref.load %arg2[%c39] : memref<98xf32, #tpu.memory_space<smem>>
      %c88 = arith.constant 88 : index
      %473 = memref.load %arg2[%c88] : memref<98xf32, #tpu.memory_space<smem>>
      %474 = vector.broadcast %472 : f32 to vector<2x256xf32>
      %475 = arith.mulf %474, %470 : vector<2x256xf32>
      %476 = vector.broadcast %473 : f32 to vector<2x256xf32>
      %477 = arith.mulf %476, %471 : vector<2x256xf32>
      %478 = arith.addf %475, %477 : vector<2x256xf32>
      %cst_198 = arith.constant 0.000000e+00 : f32
      %479 = vector.broadcast %cst_198 : f32 to vector<2x256xf32>
      %480 = arith.select %409, %478, %479 : vector<2x256xi1>, vector<2x256xf32>
      %481 = arith.addf %469, %480 : vector<2x256xf32>
      %c0_199 = arith.constant 0 : index
      %c100 = arith.constant 100 : index
      %482 = vector.load %arg7[%c0_199, %c100] : memref<2x358xf32, #tpu.memory_space<vmem>>, vector<2x256xf32>
      %c0_200 = arith.constant 0 : index
      %c100_201 = arith.constant 100 : index
      %483 = vector.load %arg8[%c0_200, %c100_201] : memref<2x358xf32, #tpu.memory_space<vmem>>, vector<2x256xf32>
      %c46 = arith.constant 46 : index
      %484 = memref.load %arg2[%c46] : memref<98xf32, #tpu.memory_space<smem>>
      %c95 = arith.constant 95 : index
      %485 = memref.load %arg2[%c95] : memref<98xf32, #tpu.memory_space<smem>>
      %486 = vector.broadcast %484 : f32 to vector<2x256xf32>
      %487 = arith.mulf %486, %482 : vector<2x256xf32>
      %488 = vector.broadcast %485 : f32 to vector<2x256xf32>
      %489 = arith.mulf %488, %483 : vector<2x256xf32>
      %490 = arith.addf %487, %489 : vector<2x256xf32>
      %cst_202 = arith.constant 0.000000e+00 : f32
      %491 = vector.broadcast %cst_202 : f32 to vector<2x256xf32>
      %492 = arith.select %409, %490, %491 : vector<2x256xi1>, vector<2x256xf32>
      %493 = arith.addf %481, %492 : vector<2x256xf32>
      %c2_i32 = arith.constant 2 : i32
      %494 = vector.broadcast %c2_i32 : i32 to vector<2x256xi32>
      %495 = arith.addi %37, %494 : vector<2x256xi32>
      %c0_i32_203 = arith.constant 0 : i32
      %496 = vector.broadcast %c0_i32_203 : i32 to vector<2x256xi32>
      %497 = arith.cmpi sge, %495, %496 : vector<2x256xi32>
      %c16_i32_204 = arith.constant 16 : i32
      %498 = vector.broadcast %c16_i32_204 : i32 to vector<2x256xi32>
      %499 = arith.cmpi slt, %495, %498 : vector<2x256xi32>
      %500 = arith.andi %497, %499 : vector<2x256xi1>
      %c0_205 = arith.constant 0 : index
      %c5 = arith.constant 5 : index
      %501 = vector.load %arg7[%c0_205, %c5] : memref<2x358xf32, #tpu.memory_space<vmem>>, vector<2x256xf32>
      %c0_206 = arith.constant 0 : index
      %c5_207 = arith.constant 5 : index
      %502 = vector.load %arg8[%c0_206, %c5_207] : memref<2x358xf32, #tpu.memory_space<vmem>>, vector<2x256xf32>
      %c5_208 = arith.constant 5 : index
      %503 = memref.load %arg2[%c5_208] : memref<98xf32, #tpu.memory_space<smem>>
      %c54 = arith.constant 54 : index
      %504 = memref.load %arg2[%c54] : memref<98xf32, #tpu.memory_space<smem>>
      %505 = vector.broadcast %503 : f32 to vector<2x256xf32>
      %506 = arith.mulf %505, %501 : vector<2x256xf32>
      %507 = vector.broadcast %504 : f32 to vector<2x256xf32>
      %508 = arith.mulf %507, %502 : vector<2x256xf32>
      %509 = arith.addf %506, %508 : vector<2x256xf32>
      %cst_209 = arith.constant 0.000000e+00 : f32
      %510 = vector.broadcast %cst_209 : f32 to vector<2x256xf32>
      %511 = arith.select %500, %509, %510 : vector<2x256xi1>, vector<2x256xf32>
      %512 = arith.addf %493, %511 : vector<2x256xf32>
      %c0_210 = arith.constant 0 : index
      %c21_211 = arith.constant 21 : index
      %513 = vector.load %arg7[%c0_210, %c21_211] : memref<2x358xf32, #tpu.memory_space<vmem>>, vector<2x256xf32>
      %c0_212 = arith.constant 0 : index
      %c21_213 = arith.constant 21 : index
      %514 = vector.load %arg8[%c0_212, %c21_213] : memref<2x358xf32, #tpu.memory_space<vmem>>, vector<2x256xf32>
      %c12 = arith.constant 12 : index
      %515 = memref.load %arg2[%c12] : memref<98xf32, #tpu.memory_space<smem>>
      %c61 = arith.constant 61 : index
      %516 = memref.load %arg2[%c61] : memref<98xf32, #tpu.memory_space<smem>>
      %517 = vector.broadcast %515 : f32 to vector<2x256xf32>
      %518 = arith.mulf %517, %513 : vector<2x256xf32>
      %519 = vector.broadcast %516 : f32 to vector<2x256xf32>
      %520 = arith.mulf %519, %514 : vector<2x256xf32>
      %521 = arith.addf %518, %520 : vector<2x256xf32>
      %cst_214 = arith.constant 0.000000e+00 : f32
      %522 = vector.broadcast %cst_214 : f32 to vector<2x256xf32>
      %523 = arith.select %500, %521, %522 : vector<2x256xi1>, vector<2x256xf32>
      %524 = arith.addf %512, %523 : vector<2x256xf32>
      %c0_215 = arith.constant 0 : index
      %c37_216 = arith.constant 37 : index
      %525 = vector.load %arg7[%c0_215, %c37_216] : memref<2x358xf32, #tpu.memory_space<vmem>>, vector<2x256xf32>
      %c0_217 = arith.constant 0 : index
      %c37_218 = arith.constant 37 : index
      %526 = vector.load %arg8[%c0_217, %c37_218] : memref<2x358xf32, #tpu.memory_space<vmem>>, vector<2x256xf32>
      %c19_219 = arith.constant 19 : index
      %527 = memref.load %arg2[%c19_219] : memref<98xf32, #tpu.memory_space<smem>>
      %c68_220 = arith.constant 68 : index
      %528 = memref.load %arg2[%c68_220] : memref<98xf32, #tpu.memory_space<smem>>
      %529 = vector.broadcast %527 : f32 to vector<2x256xf32>
      %530 = arith.mulf %529, %525 : vector<2x256xf32>
      %531 = vector.broadcast %528 : f32 to vector<2x256xf32>
      %532 = arith.mulf %531, %526 : vector<2x256xf32>
      %533 = arith.addf %530, %532 : vector<2x256xf32>
      %cst_221 = arith.constant 0.000000e+00 : f32
      %534 = vector.broadcast %cst_221 : f32 to vector<2x256xf32>
      %535 = arith.select %500, %533, %534 : vector<2x256xi1>, vector<2x256xf32>
      %536 = arith.addf %524, %535 : vector<2x256xf32>
      %c0_222 = arith.constant 0 : index
      %c53_223 = arith.constant 53 : index
      %537 = vector.load %arg7[%c0_222, %c53_223] : memref<2x358xf32, #tpu.memory_space<vmem>>, vector<2x256xf32>
      %c0_224 = arith.constant 0 : index
      %c53_225 = arith.constant 53 : index
      %538 = vector.load %arg8[%c0_224, %c53_225] : memref<2x358xf32, #tpu.memory_space<vmem>>, vector<2x256xf32>
      %c26 = arith.constant 26 : index
      %539 = memref.load %arg2[%c26] : memref<98xf32, #tpu.memory_space<smem>>
      %c75 = arith.constant 75 : index
      %540 = memref.load %arg2[%c75] : memref<98xf32, #tpu.memory_space<smem>>
      %541 = vector.broadcast %539 : f32 to vector<2x256xf32>
      %542 = arith.mulf %541, %537 : vector<2x256xf32>
      %543 = vector.broadcast %540 : f32 to vector<2x256xf32>
      %544 = arith.mulf %543, %538 : vector<2x256xf32>
      %545 = arith.addf %542, %544 : vector<2x256xf32>
      %cst_226 = arith.constant 0.000000e+00 : f32
      %546 = vector.broadcast %cst_226 : f32 to vector<2x256xf32>
      %547 = arith.select %500, %545, %546 : vector<2x256xi1>, vector<2x256xf32>
      %548 = arith.addf %536, %547 : vector<2x256xf32>
      %c0_227 = arith.constant 0 : index
      %c69 = arith.constant 69 : index
      %549 = vector.load %arg7[%c0_227, %c69] : memref<2x358xf32, #tpu.memory_space<vmem>>, vector<2x256xf32>
      %c0_228 = arith.constant 0 : index
      %c69_229 = arith.constant 69 : index
      %550 = vector.load %arg8[%c0_228, %c69_229] : memref<2x358xf32, #tpu.memory_space<vmem>>, vector<2x256xf32>
      %c33_230 = arith.constant 33 : index
      %551 = memref.load %arg2[%c33_230] : memref<98xf32, #tpu.memory_space<smem>>
      %c82_231 = arith.constant 82 : index
      %552 = memref.load %arg2[%c82_231] : memref<98xf32, #tpu.memory_space<smem>>
      %553 = vector.broadcast %551 : f32 to vector<2x256xf32>
      %554 = arith.mulf %553, %549 : vector<2x256xf32>
      %555 = vector.broadcast %552 : f32 to vector<2x256xf32>
      %556 = arith.mulf %555, %550 : vector<2x256xf32>
      %557 = arith.addf %554, %556 : vector<2x256xf32>
      %cst_232 = arith.constant 0.000000e+00 : f32
      %558 = vector.broadcast %cst_232 : f32 to vector<2x256xf32>
      %559 = arith.select %500, %557, %558 : vector<2x256xi1>, vector<2x256xf32>
      %560 = arith.addf %548, %559 : vector<2x256xf32>
      %c0_233 = arith.constant 0 : index
      %c85_234 = arith.constant 85 : index
      %561 = vector.load %arg7[%c0_233, %c85_234] : memref<2x358xf32, #tpu.memory_space<vmem>>, vector<2x256xf32>
      %c0_235 = arith.constant 0 : index
      %c85_236 = arith.constant 85 : index
      %562 = vector.load %arg8[%c0_235, %c85_236] : memref<2x358xf32, #tpu.memory_space<vmem>>, vector<2x256xf32>
      %c40 = arith.constant 40 : index
      %563 = memref.load %arg2[%c40] : memref<98xf32, #tpu.memory_space<smem>>
      %c89 = arith.constant 89 : index
      %564 = memref.load %arg2[%c89] : memref<98xf32, #tpu.memory_space<smem>>
      %565 = vector.broadcast %563 : f32 to vector<2x256xf32>
      %566 = arith.mulf %565, %561 : vector<2x256xf32>
      %567 = vector.broadcast %564 : f32 to vector<2x256xf32>
      %568 = arith.mulf %567, %562 : vector<2x256xf32>
      %569 = arith.addf %566, %568 : vector<2x256xf32>
      %cst_237 = arith.constant 0.000000e+00 : f32
      %570 = vector.broadcast %cst_237 : f32 to vector<2x256xf32>
      %571 = arith.select %500, %569, %570 : vector<2x256xi1>, vector<2x256xf32>
      %572 = arith.addf %560, %571 : vector<2x256xf32>
      %c0_238 = arith.constant 0 : index
      %c101 = arith.constant 101 : index
      %573 = vector.load %arg7[%c0_238, %c101] : memref<2x358xf32, #tpu.memory_space<vmem>>, vector<2x256xf32>
      %c0_239 = arith.constant 0 : index
      %c101_240 = arith.constant 101 : index
      %574 = vector.load %arg8[%c0_239, %c101_240] : memref<2x358xf32, #tpu.memory_space<vmem>>, vector<2x256xf32>
      %c47 = arith.constant 47 : index
      %575 = memref.load %arg2[%c47] : memref<98xf32, #tpu.memory_space<smem>>
      %c96_241 = arith.constant 96 : index
      %576 = memref.load %arg2[%c96_241] : memref<98xf32, #tpu.memory_space<smem>>
      %577 = vector.broadcast %575 : f32 to vector<2x256xf32>
      %578 = arith.mulf %577, %573 : vector<2x256xf32>
      %579 = vector.broadcast %576 : f32 to vector<2x256xf32>
      %580 = arith.mulf %579, %574 : vector<2x256xf32>
      %581 = arith.addf %578, %580 : vector<2x256xf32>
      %cst_242 = arith.constant 0.000000e+00 : f32
      %582 = vector.broadcast %cst_242 : f32 to vector<2x256xf32>
      %583 = arith.select %500, %581, %582 : vector<2x256xi1>, vector<2x256xf32>
      %584 = arith.addf %572, %583 : vector<2x256xf32>
      %c3_i32 = arith.constant 3 : i32
      %585 = vector.broadcast %c3_i32 : i32 to vector<2x256xi32>
      %586 = arith.addi %37, %585 : vector<2x256xi32>
      %c0_i32_243 = arith.constant 0 : i32
      %587 = vector.broadcast %c0_i32_243 : i32 to vector<2x256xi32>
      %588 = arith.cmpi sge, %586, %587 : vector<2x256xi32>
      %c16_i32_244 = arith.constant 16 : i32
      %589 = vector.broadcast %c16_i32_244 : i32 to vector<2x256xi32>
      %590 = arith.cmpi slt, %586, %589 : vector<2x256xi32>
      %591 = arith.andi %588, %590 : vector<2x256xi1>
      %c0_245 = arith.constant 0 : index
      %c6 = arith.constant 6 : index
      %592 = vector.load %arg7[%c0_245, %c6] : memref<2x358xf32, #tpu.memory_space<vmem>>, vector<2x256xf32>
      %c0_246 = arith.constant 0 : index
      %c6_247 = arith.constant 6 : index
      %593 = vector.load %arg8[%c0_246, %c6_247] : memref<2x358xf32, #tpu.memory_space<vmem>>, vector<2x256xf32>
      %c6_248 = arith.constant 6 : index
      %594 = memref.load %arg2[%c6_248] : memref<98xf32, #tpu.memory_space<smem>>
      %c55 = arith.constant 55 : index
      %595 = memref.load %arg2[%c55] : memref<98xf32, #tpu.memory_space<smem>>
      %596 = vector.broadcast %594 : f32 to vector<2x256xf32>
      %597 = arith.mulf %596, %592 : vector<2x256xf32>
      %598 = vector.broadcast %595 : f32 to vector<2x256xf32>
      %599 = arith.mulf %598, %593 : vector<2x256xf32>
      %600 = arith.addf %597, %599 : vector<2x256xf32>
      %cst_249 = arith.constant 0.000000e+00 : f32
      %601 = vector.broadcast %cst_249 : f32 to vector<2x256xf32>
      %602 = arith.select %591, %600, %601 : vector<2x256xi1>, vector<2x256xf32>
      %603 = arith.addf %584, %602 : vector<2x256xf32>
      %c0_250 = arith.constant 0 : index
      %c22_251 = arith.constant 22 : index
      %604 = vector.load %arg7[%c0_250, %c22_251] : memref<2x358xf32, #tpu.memory_space<vmem>>, vector<2x256xf32>
      %c0_252 = arith.constant 0 : index
      %c22_253 = arith.constant 22 : index
      %605 = vector.load %arg8[%c0_252, %c22_253] : memref<2x358xf32, #tpu.memory_space<vmem>>, vector<2x256xf32>
      %c13 = arith.constant 13 : index
      %606 = memref.load %arg2[%c13] : memref<98xf32, #tpu.memory_space<smem>>
      %c62 = arith.constant 62 : index
      %607 = memref.load %arg2[%c62] : memref<98xf32, #tpu.memory_space<smem>>
      %608 = vector.broadcast %606 : f32 to vector<2x256xf32>
      %609 = arith.mulf %608, %604 : vector<2x256xf32>
      %610 = vector.broadcast %607 : f32 to vector<2x256xf32>
      %611 = arith.mulf %610, %605 : vector<2x256xf32>
      %612 = arith.addf %609, %611 : vector<2x256xf32>
      %cst_254 = arith.constant 0.000000e+00 : f32
      %613 = vector.broadcast %cst_254 : f32 to vector<2x256xf32>
      %614 = arith.select %591, %612, %613 : vector<2x256xi1>, vector<2x256xf32>
      %615 = arith.addf %603, %614 : vector<2x256xf32>
      %c0_255 = arith.constant 0 : index
      %c38_256 = arith.constant 38 : index
      %616 = vector.load %arg7[%c0_255, %c38_256] : memref<2x358xf32, #tpu.memory_space<vmem>>, vector<2x256xf32>
      %c0_257 = arith.constant 0 : index
      %c38_258 = arith.constant 38 : index
      %617 = vector.load %arg8[%c0_257, %c38_258] : memref<2x358xf32, #tpu.memory_space<vmem>>, vector<2x256xf32>
      %c20_259 = arith.constant 20 : index
      %618 = memref.load %arg2[%c20_259] : memref<98xf32, #tpu.memory_space<smem>>
      %c69_260 = arith.constant 69 : index
      %619 = memref.load %arg2[%c69_260] : memref<98xf32, #tpu.memory_space<smem>>
      %620 = vector.broadcast %618 : f32 to vector<2x256xf32>
      %621 = arith.mulf %620, %616 : vector<2x256xf32>
      %622 = vector.broadcast %619 : f32 to vector<2x256xf32>
      %623 = arith.mulf %622, %617 : vector<2x256xf32>
      %624 = arith.addf %621, %623 : vector<2x256xf32>
      %cst_261 = arith.constant 0.000000e+00 : f32
      %625 = vector.broadcast %cst_261 : f32 to vector<2x256xf32>
      %626 = arith.select %591, %624, %625 : vector<2x256xi1>, vector<2x256xf32>
      %627 = arith.addf %615, %626 : vector<2x256xf32>
      %c0_262 = arith.constant 0 : index
      %c54_263 = arith.constant 54 : index
      %628 = vector.load %arg7[%c0_262, %c54_263] : memref<2x358xf32, #tpu.memory_space<vmem>>, vector<2x256xf32>
      %c0_264 = arith.constant 0 : index
      %c54_265 = arith.constant 54 : index
      %629 = vector.load %arg8[%c0_264, %c54_265] : memref<2x358xf32, #tpu.memory_space<vmem>>, vector<2x256xf32>
      %c27 = arith.constant 27 : index
      %630 = memref.load %arg2[%c27] : memref<98xf32, #tpu.memory_space<smem>>
      %c76 = arith.constant 76 : index
      %631 = memref.load %arg2[%c76] : memref<98xf32, #tpu.memory_space<smem>>
      %632 = vector.broadcast %630 : f32 to vector<2x256xf32>
      %633 = arith.mulf %632, %628 : vector<2x256xf32>
      %634 = vector.broadcast %631 : f32 to vector<2x256xf32>
      %635 = arith.mulf %634, %629 : vector<2x256xf32>
      %636 = arith.addf %633, %635 : vector<2x256xf32>
      %cst_266 = arith.constant 0.000000e+00 : f32
      %637 = vector.broadcast %cst_266 : f32 to vector<2x256xf32>
      %638 = arith.select %591, %636, %637 : vector<2x256xi1>, vector<2x256xf32>
      %639 = arith.addf %627, %638 : vector<2x256xf32>
      %c0_267 = arith.constant 0 : index
      %c70_268 = arith.constant 70 : index
      %640 = vector.load %arg7[%c0_267, %c70_268] : memref<2x358xf32, #tpu.memory_space<vmem>>, vector<2x256xf32>
      %c0_269 = arith.constant 0 : index
      %c70_270 = arith.constant 70 : index
      %641 = vector.load %arg8[%c0_269, %c70_270] : memref<2x358xf32, #tpu.memory_space<vmem>>, vector<2x256xf32>
      %c34_271 = arith.constant 34 : index
      %642 = memref.load %arg2[%c34_271] : memref<98xf32, #tpu.memory_space<smem>>
      %c83_272 = arith.constant 83 : index
      %643 = memref.load %arg2[%c83_272] : memref<98xf32, #tpu.memory_space<smem>>
      %644 = vector.broadcast %642 : f32 to vector<2x256xf32>
      %645 = arith.mulf %644, %640 : vector<2x256xf32>
      %646 = vector.broadcast %643 : f32 to vector<2x256xf32>
      %647 = arith.mulf %646, %641 : vector<2x256xf32>
      %648 = arith.addf %645, %647 : vector<2x256xf32>
      %cst_273 = arith.constant 0.000000e+00 : f32
      %649 = vector.broadcast %cst_273 : f32 to vector<2x256xf32>
      %650 = arith.select %591, %648, %649 : vector<2x256xi1>, vector<2x256xf32>
      %651 = arith.addf %639, %650 : vector<2x256xf32>
      %c0_274 = arith.constant 0 : index
      %c86_275 = arith.constant 86 : index
      %652 = vector.load %arg7[%c0_274, %c86_275] : memref<2x358xf32, #tpu.memory_space<vmem>>, vector<2x256xf32>
      %c0_276 = arith.constant 0 : index
      %c86_277 = arith.constant 86 : index
      %653 = vector.load %arg8[%c0_276, %c86_277] : memref<2x358xf32, #tpu.memory_space<vmem>>, vector<2x256xf32>
      %c41 = arith.constant 41 : index
      %654 = memref.load %arg2[%c41] : memref<98xf32, #tpu.memory_space<smem>>
      %c90 = arith.constant 90 : index
      %655 = memref.load %arg2[%c90] : memref<98xf32, #tpu.memory_space<smem>>
      %656 = vector.broadcast %654 : f32 to vector<2x256xf32>
      %657 = arith.mulf %656, %652 : vector<2x256xf32>
      %658 = vector.broadcast %655 : f32 to vector<2x256xf32>
      %659 = arith.mulf %658, %653 : vector<2x256xf32>
      %660 = arith.addf %657, %659 : vector<2x256xf32>
      %cst_278 = arith.constant 0.000000e+00 : f32
      %661 = vector.broadcast %cst_278 : f32 to vector<2x256xf32>
      %662 = arith.select %591, %660, %661 : vector<2x256xi1>, vector<2x256xf32>
      %663 = arith.addf %651, %662 : vector<2x256xf32>
      %c0_279 = arith.constant 0 : index
      %c102 = arith.constant 102 : index
      %664 = vector.load %arg7[%c0_279, %c102] : memref<2x358xf32, #tpu.memory_space<vmem>>, vector<2x256xf32>
      %c0_280 = arith.constant 0 : index
      %c102_281 = arith.constant 102 : index
      %665 = vector.load %arg8[%c0_280, %c102_281] : memref<2x358xf32, #tpu.memory_space<vmem>>, vector<2x256xf32>
      %c48_282 = arith.constant 48 : index
      %666 = memref.load %arg2[%c48_282] : memref<98xf32, #tpu.memory_space<smem>>
      %c97_283 = arith.constant 97 : index
      %667 = memref.load %arg2[%c97_283] : memref<98xf32, #tpu.memory_space<smem>>
      %668 = vector.broadcast %666 : f32 to vector<2x256xf32>
      %669 = arith.mulf %668, %664 : vector<2x256xf32>
      %670 = vector.broadcast %667 : f32 to vector<2x256xf32>
      %671 = arith.mulf %670, %665 : vector<2x256xf32>
      %672 = arith.addf %669, %671 : vector<2x256xf32>
      %cst_284 = arith.constant 0.000000e+00 : f32
      %673 = vector.broadcast %cst_284 : f32 to vector<2x256xf32>
      %674 = arith.select %591, %672, %673 : vector<2x256xi1>, vector<2x256xf32>
      %675 = arith.addf %663, %674 : vector<2x256xf32>
      %676 = arith.negf %675 : vector<2x256xf32>
      %677 = math.exp %676 : vector<2x256xf32>
      %cst_285 = arith.constant 1.000000e+00 : f32
      %678 = vector.broadcast %cst_285 : f32 to vector<2x256xf32>
      %679 = arith.addf %678, %677 : vector<2x256xf32>
      %680 = arith.divf %678, %679 : vector<2x256xf32>
      %c0_286 = arith.constant 0 : index
      %c0_287 = arith.constant 0 : index
      %681 = vector.load %arg4[%c0_286, %c0_287] : memref<2x256xf32, #tpu.memory_space<vmem>>, vector<2x256xf32>
      tpu.vector_store %arg4[%c0_286, %c0_287], %680 {strides = array<i32>} : memref<2x256xf32, #tpu.memory_space<vmem>>, vector<2x256xf32>,
    } else {
    }
    return
  }
  func.func @transform_0(%arg0: i32, %arg1: i32, %arg2: memref<98xf32, #tpu.memory_space<smem>>) -> (i32, i32, i32) {
    %c0_i32 = arith.constant 0 : i32
    %c0_i32_0 = arith.constant 0 : i32
    return %arg0, %arg1, %c0_i32 : i32, i32, i32
  }
  func.func @transform_1(%arg0: i32, %arg1: i32, %arg2: memref<98xf32, #tpu.memory_space<smem>>) -> (i32, i32) {
    %c0_i32 = arith.constant 0 : i32
    %c0_i32_0 = arith.constant 0 : i32
    return %arg0, %c0_i32 : i32, i32
  }
}

</mosaic_0001>

<bundles_post_ra>
// kernel: tpu_custom_call.1
= control target key start
LH: loop header
LB: loop body
LE: loop exit
PB: predicated region body
PF: predicated region fallthrough
CT: control target
= control target key end

     0   :  { %s1983_s12 = smov [#allocation7]   ;;  %s2482_s0 = inlined_call_operand.hbm [shape: f32[98], index: 0, kind: input, shape index: {}]   ;;  %s2483_s1 = inlined_call_operand.hbm [shape: f32[2,4,256], index: 1, kind: input, shape index: {}]   ;;  %s2484_s2 = inlined_call_operand.hbm [shape: f32[2,256], index: 2, kind: output, shape index: {}]  }
   0x1   :  { %s8_s11 = sshll.u32 %s2482_s0, 4  ;;  %s9_s11 = int_to_ptr.hbm [resolvable:$true] %s8_s11 }
   0x2   :  { %11 = dma.hbm_to_smem %s9_s11, 16, %s1983_s12, [#allocation6] }
   0x3   :  { %1977 = dma.done.wait [#allocation6], 16 }
   0x4   :  { %1978 = vsyncadd [#allocation6], 4294967280 }
   0x5   :  { %14 = sfence }
   0x6   :  { %15 = vsyncpa [#allocation9], 0 }
   0x7   :  { %16 = vsyncpa [#allocation10], 0  ;;  %s21_s15 = sshll.u32 %s2483_s1, 4  ;;  %s1984_s16 = smov [#allocation8]   ;;  %s22_s15 = int_to_ptr.hbm [resolvable:$true] %s21_s15 }
   0x8   :  { %s23_s17 = sshll.u32 %s1984_s16, 4  ;;  %s1985_s18 = smov 128   ;;  %s24_s17 = int_to_ptr.vmem [resolvable:$true] %s23_s17 }
   0x9   :  { %s1986_s19 = smov 8  }
   0xa   :  { %29 = dma.hbm_to_vmem [thread:$0]  %s22_s15, 256, %s24_s17, [#allocation9], %s1985_s18, %s1985_s18, %s1986_s19  }
   0xb   :  { %1979 = dma.done.wait [#allocation9], 256  }
   0xc   :  { %1980 = vsyncadd [#allocation9], 4294967040  ;;  %vm40_vm0 = vcmask 1041408   ;;  %vm41_vm1 = vcmask 1043458   ;;  %vm43_vm2 = vcmask 832516   ;;  %v1987_v0 = vmov 0.0  }
   0xd   :  { %38 = vst [vmem:[#allocation2] sm:$0xf] %v1987_v0  ;;  %vm42_vm3 = vmor %vm41_vm1, %vm40_vm0  ;;  %v47_v1 = vld [vmem:[#allocation8] sm:$0xff]  ;;  %v48_v2 = vld [vmem:[#allocation8 + $0x8] sm:$0xff]  ;;  %v1988_v3 = vmov -inf   ;;  %vm63_vm5 = vcmask 1043456  }
   0xe   :  { %vm44_vm4 = vmor %vm43_vm2, %vm42_vm3  ;;  %52 = vst [vmem:[#allocation1] ss:$2 sm:$0xff] %v47_v1  ;;  %vm106_vm6 = vcmask 1041409   ;;  %vm108_vm7 = vcmask 1043459   ;;  %vm110_vm8 = vcmask 1045509   ;;  %vm112_vm9 = vcmask 1047559  }
   0xf   :  { %45 = vst.msk [vmem:[#allocation4] sm:$0x3f] %vm44_vm4, %v1987_v0  ;;  %s1989_s0 = smov 51   ;;  %vm187_vm10 = vcmask 1041816   ;;  %vm190_vm12 = vcmask 414724   ;;  %vm184_vm13 = vcmask 416768  }
  0x10   :  { %46 = vst.msk [vmem:[#allocation5] sm:$0x3f] %vm44_vm4, %v1987_v0  ;;  %vm189_vm11 = vmor %vm41_vm1, %vm187_vm10  ;;  %s238_s1 = sld [smem:[#allocation7]]  ;;  %s1990_s27 = smov 112   ;;  %vm275_vm15 = vcmask 916480   ;;  %vm304_vm2 = vcmask 785408  }
  0x11   :  { %56 = vst [vmem:[#allocation1 + $0x10] ss:$2 sm:$0xff] %v48_v2  ;;  %vm191_vm14 = vmor %vm190_vm12, %vm189_vm11  ;;  %s1754_s20 = sld [smem:[#allocation7 + $0x31]]  ;;  %s1991_s30 = smov 96   ;;  %vm333_vm4 = vcmask 654336   ;;  %vm486_vm11 = vcmask 908288  }
  0x12   :  { %39 = vst [vmem:[#allocation3] sm:$0xf] %v1988_v3  ;;  %s1756_s21 = sld [smem:[#allocation7 + $0x38]]  ;;  %s1992_s5 = smov 80   ;;  %vm515_vm12 = vcmask 777216  }
  0x13   :  { %s1755_s22 = sld [smem:[#allocation7 + $0x7]]  ;;  %s1993_s8 = smov 64  }
  0x14   :  { %s1758_s23 = sld [smem:[#allocation7 + $0x3f]]  ;;  %s1994_s11 = smov 48  }
  0x15   :  { %v53_v4 = vld.sshfl [vmem:[#allocation1] sm:$0xff pattern:$0x75316420]  ;;  %v54_v5 = vld.sshfl [vmem:[#allocation1 + $0x8] sm:$0xff pattern:$0x75316420] }
  0x16   :  { %v64_v8 = vsel %vm63_vm5, %v53_v4, 0.0  ;;  %v71_v9 = vsel %vm63_vm5, %v54_v5, 0.0  ;;  %118 = vst [vmem:[#allocation1] ss:$2 sm:$0xff] %v47_v1  ;;  %v49_v1 = vld [vmem:[#allocation2] sm:$0xf] }
  0x17   :  { %v65_v12 = vrot.slane %v64_v8, 4  ;;  %v72_v13 = vrot.slane %v71_v9, 4  ;;  %s1757_s24 = sld [smem:[#allocation7 + $0xe]]  ;;  %s1995_s14 = smov 32  }
  0x18   :  { %v57_v6 = vld.sshfl [vmem:[#allocation1 + $0x10] sm:$0xff pattern:$0x75316420]  ;;  %v58_v7 = vld.sshfl [vmem:[#allocation1 + $0x18] sm:$0xff pattern:$0x75316420] }
  0x19   :  { %v78_v10 = vsel %vm63_vm5, %v57_v6, 0.0  ;;  %v85_v11 = vsel %vm63_vm5, %v58_v7, 0.0  ;;  %122 = vst [vmem:[#allocation1 + $0x10] ss:$2 sm:$0xff] %v48_v2  ;;  %v66_v16 = vadd.f32 %v65_v12, %v64_v8  ;;  %v73_v17 = vadd.f32 %v72_v13, %v71_v9  ;;  %s1760_s25 = sld [smem:[#allocation7 + $0x46]]  ;;  %s1996_s17 = smov 127  }
  0x1a   :  { %v79_v14 = vrot.slane %v78_v10, 4  ;;  %v86_v15 = vrot.slane %v85_v11, 4  ;;  %s1759_s26 = sld [smem:[#allocation7 + $0x15]] }
  0x1b   :  { %v67_v20 = vrot.slane %v66_v16, 2  ;;  %v74_v21 = vrot.slane %v73_v17, 2  ;;  %s1762_s28 = sld [smem:[#allocation7 + $0x4d]] }
  0x1c   :  { %v80_v18 = vadd.f32 %v79_v14, %v78_v10  ;;  %v87_v19 = vadd.f32 %v86_v15, %v85_v11  ;;  %s1761_s29 = sld [smem:[#allocation7 + $0x1c]] }
  0x1d   :  { %v68_v24 = vadd.f32 %v67_v20, %v66_v16  ;;  %v75_v25 = vadd.f32 %v74_v21, %v73_v17  ;;  %v119_v28 = vld.sshfl [vmem:[#allocation1] sm:$0xff pattern:$0x75316420]  ;;  %v120_v29 = vld.sshfl [vmem:[#allocation1 + $0x8] sm:$0xff pattern:$0x75316420] }
  0x1e   :  { %v81_v22 = vrot.slane %v80_v18, 2  ;;  %v88_v23 = vrot.slane %v87_v19, 2  ;;  %v129_v36 = vsel %vm63_vm5, %v119_v28, -inf  ;;  %v136_v37 = vsel %vm63_vm5, %v120_v29, -inf  ;;  %s1764_s3 = sld [smem:[#allocation7 + $0x54]] }
  0x1f   :  { %v69_v32 = vrot.slane %v68_v24, 1  ;;  %v76_v33 = vrot.slane %v75_v25, 1  ;;  %v130_v44 = vrot.slane %v129_v36, 4  ;;  %v137_v45 = vrot.slane %v136_v37, 4  ;;  %s1763_s4 = sld [smem:[#allocation7 + $0x23]] }
  0x20   :  { %v82_v26 = vadd.f32 %v81_v22, %v80_v18  ;;  %v89_v27 = vadd.f32 %v88_v23, %v87_v19  ;;  %v123_v30 = vld.sshfl [vmem:[#allocation1 + $0x10] sm:$0xff pattern:$0x75316420]  ;;  %v124_v31 = vld.sshfl [vmem:[#allocation1 + $0x18] sm:$0xff pattern:$0x75316420] }
  0x21   :  { %v143_v38 = vsel %vm63_vm5, %v123_v30, -inf  ;;  %v150_v39 = vsel %vm63_vm5, %v124_v31, -inf  ;;  %v70_v40 = vadd.f32 %v69_v32, %v68_v24  ;;  %v77_v41 = vadd.f32 %v76_v33, %v75_v25  ;;  %v117_v22 = vld [vmem:[#allocation3] sm:$0xf]  ;;  %s1766_s6 = sld [smem:[#allocation7 + $0x5b]] }
  0x22   :  { %v83_v34 = vrot.slane %v82_v26, 1  ;;  %v90_v35 = vrot.slane %v89_v27, 1  ;;  %v144_v46 = vrot.slane %v143_v38, 4  ;;  %v151_v47 = vrot.slane %v150_v39, 4  ;;  %s1765_s7 = sld [smem:[#allocation7 + $0x2a]] }
  0x23   :  { %v96_v48 = vrot.slane %v77_v41, 6  ;;  %v131_v50 = vmax.f32 %v129_v36, %v130_v44  ;;  %v138_v51 = vmax.f32 %v136_v37, %v137_v45  ;;  %v240_v36 = vstv %s238_s1  ;;  %s1768_s9 = sld [smem:[#allocation7 + $0x32]] }
  0x24   :  { %v84_v42 = vadd.f32 %v83_v34, %v82_v26  ;;  %v91_v43 = vadd.f32 %v90_v35, %v89_v27  ;;  %v145_v52 = vmax.f32 %v143_v38, %v144_v46  ;;  %v152_v53 = vmax.f32 %v150_v39, %v151_v47  ;;  %s1767_s10 = sld [smem:[#allocation7 + $0x1]] }
  0x25   :  { %v99_v54 = vsel %vm40_vm0, %v70_v40, %v96_v48  ;;  %v132_v57 = vrot.slane %v131_v50, 2  ;;  %v139_v58 = vrot.slane %v138_v51, 2  ;;  %v242_v37 = vstv %s1754_s20  ;;  %s1770_s12 = sld [smem:[#allocation7 + $0x39]] }
  0x26   :  { %v97_v49 = vrot.slane %v91_v43, 6  ;;  %v146_v59 = vrot.slane %v145_v52, 2  ;;  %v153_v60 = vrot.slane %v152_v53, 2  ;;  %v261_v43 = vstv %s1756_s21  ;;  %s1769_s13 = sld [smem:[#allocation7 + $0x8]]  ;;  %s1998_s21 = smov 95  }
  0x27   :  { %v133_v62 = vmax.f32 %v131_v50, %v132_v57  ;;  %v140_v63 = vmax.f32 %v138_v51, %v139_v58  ;;  %v259_v45 = vstv %s1755_s22  ;;  %s1772_s15 = sld [smem:[#allocation7 + $0x40]]  ;;  %vm362_vm5 = vcmask 523264  }
  0x28   :  { %v100_v55 = vsel %vm40_vm0, %v84_v42, %v97_v49  ;;  %v147_v0 = vmax.f32 %v145_v52, %v146_v59  ;;  %v154_v3 = vmax.f32 %v152_v53, %v153_v60  ;;  %v290_v52 = vstv %s1758_s23  ;;  %s1771_s16 = sld [smem:[#allocation7 + $0xf]] }
  0x29   :  { %v105_v56 = vrot.slane %v100_v55, 7  ;;  %v134_v5 = vrot.slane %v133_v62, 1  ;;  %v141_v6 = vrot.slane %v140_v63, 1  ;;  %s1774_s18 = sld [smem:[#allocation7 + $0x47]] }
  0x2a   :  { %v148_v7 = vrot.slane %v147_v0, 1  ;;  %v155_v9 = vrot.slane %v154_v3, 1  ;;  %s1773_s19 = sld [smem:[#allocation7 + $0x16]] }
  0x2b   :  { %v107_v61 = vsel %vm106_vm6, %v105_v56, %v99_v54  ;;  %v142_v11 = vmax.f32 %v140_v63, %v141_v6  ;;  %v135_v12 = vmax.f32 %v133_v62, %v134_v5  ;;  %v288_v54 = vstv %s1757_s24  ;;  %s1776_s1 = sld [smem:[#allocation7 + $0x4e]]  ;;  %s1999_s24 = smov 79  }
  0x2c   :  { %v109_v2 = vsel %vm108_vm7, %v105_v56, %v107_v61  ;;  %v149_v13 = vmax.f32 %v147_v0, %v148_v7  ;;  %v156_v14 = vmax.f32 %v154_v3, %v155_v9  ;;  %v319_v62 = vstv %s1760_s25  ;;  %s1775_s20 = sld [smem:[#allocation7 + $0x1d]] }
  0x2d   :  { %v111_v4 = vsel %vm110_vm8, %v105_v56, %v109_v2  ;;  %v161_v15 = vrot.slane %v142_v11, 6  ;;  %v317_v0 = vstv %s1759_s26  ;;  %s1778_s22 = sld [smem:[#allocation7 + $0x55]] }
  0x2e   :  { %v113_v8 = vsel %vm112_vm9, %v105_v56, %v111_v4  ;;  %v162_v16 = vrot.slane %v156_v14, 6  ;;  %s1777_s23 = sld [smem:[#allocation7 + $0x24]] }
  0x2f   :  { %v115_v10 = vadd.f32 %v113_v8, %v49_v1  ;;  %v163_v17 = vsel %vm40_vm0, %v135_v12, %v161_v15  ;;  %v348_v8 = vstv %s1762_s28  ;;  %s1780_s25 = sld [smem:[#allocation7 + $0x5c]] }
  0x30   :  { %v164_v18 = vsel %vm40_vm0, %v149_v13, %v162_v16  ;;  %s1779_s26 = sld [smem:[#allocation7 + $0x2b]] }
  0x31   :  { %116 = vst [vmem:[#allocation2] sm:$0xf] %v115_v10  ;;  %v167_v19 = vrot.slane %v164_v18, 7  ;;  %v346_v10 = vstv %s1761_s29  ;;  %v377_v18 = vstv %s1764_s3  ;;  %s1782_s28 = sld [smem:[#allocation7 + $0x33]] }
  0x32   :  { %s1781_s29 = sld [smem:[#allocation7 + $0x2]] }
  0x33   :  { %v168_v20 = vsel %vm106_vm6, %v167_v19, %v163_v17  ;;  %s1784_s3 = sld [smem:[#allocation7 + $0x3a]]  ;;  %vm391_vm6 = vcmask 392192  }
  0x34   :  { %v169_v23 = vsel %vm108_vm7, %v167_v19, %v168_v20  ;;  %v375_v20 = vstv %s1763_s4  ;;  %s1783_s4 = sld [smem:[#allocation7 + $0x9]]  ;;  %vm420_vm7 = vcmask 261120  }
  0x35   :  { %v170_v25 = vsel %vm110_vm8, %v167_v19, %v169_v23  ;;  %vm457_vm8 = vcmask 1039360  }
  0x36   :  { %v171_v26 = vsel %vm112_vm9, %v167_v19, %v170_v25 }
  0x37   :  { %v173_v27 = vmax.f32 %v117_v22, %v171_v26 }
  0x38   :  { %v178_v21 = vld [vmem:[#allocation2] sm:$0xf] }
  0x39   :  { %v179_v24 = vmul.f32 0.25, %v178_v21  ;;  %174 = vst [vmem:[#allocation3] sm:$0xf] %v173_v27 }
  0x3b   :  { %181 = vrot.lane.b32.xlu0 %v179_v24, %s1989_s0 }
  0x40   :  { %v193_v28 = vld [vmem:[#allocation3] sm:$0xf] }
  0x43   :  { %195 = vrot.lane.b32.xlu0 %v193_v28, %s1989_s0  ;;  %v406_v28 = vstv %s1766_s6  ;;  %s1997_s0 = smov 111   ;;  %s1786_s6 = sld [smem:[#allocation7 + $0x41]] }
  0xad   :  { %v182_v29 = vpop.permute.xlu0 %181 }
  0xae   :  { %v183_v30 = vrot.slane %v182_v29, 6 }
  0xb0   :  { %v185_v31 = vsel %vm184_vm13, %v183_v30, %v182_v29  ;;  %v404_v30 = vstv %s1765_s7  ;;  %s1785_s7 = sld [smem:[#allocation7 + $0x10]] }
  0xb1   :  { %192 = vst.msk [vmem:[#allocation4] sm:$0x3f] %vm191_vm14, %v185_v31 }
  0xb5   :  { %v196_v32 = vpop.permute.xlu0 %195 }
  0xb6   :  { %v197_v33 = vrot.slane %v196_v32, 6 }
  0xb8   :  { %v198_v34 = vsel %vm184_vm13, %v197_v33, %v196_v32  ;;  %v236_v35 = vld [vmem:[#allocation4] sm:$0xf]  ;;  %vm544_vm13 = vcmask 646144  }
  0xb9   :  { %200 = vst.msk [vmem:[#allocation5] sm:$0x3f] %vm191_vm14, %v198_v34  ;;  %v241_v39 = vmul.f32 %v240_v36, %v236_v35  ;;  %v255_v44 = vld [vmem:[#allocation4] sm:$0x3f]  ;;  %vm573_vm14 = vcmask 515072  }
  0xba   :  { %v260_v47 = vmul.f32 %v259_v45, %v255_v44  ;;  %v284_v53 = vld [vmem:[#allocation4] sm:$0x3f] }
  0xbb   :  { %v289_v56 = vmul.f32 %v288_v54, %v284_v53  ;;  %v313_v63 = vld [vmem:[#allocation4] sm:$0x3f] }
  0xbc   :  { %v318_v2 = vmul.f32 %v317_v0, %v313_v63  ;;  %v342_v9 = vld [vmem:[#allocation4] sm:$0x3f] }
  0xbd   :  { %v347_v12 = vmul.f32 %v346_v10, %v342_v9  ;;  %v371_v19 = vld [vmem:[#allocation4] sm:$0x3f] }
  0xbe   :  { %v376_v22 = vmul.f32 %v375_v20, %v371_v19  ;;  %v400_v29 = vld [vmem:[#allocation4] sm:$0x3f] }
  0xbf   :  { %v405_v32 = vmul.f32 %v404_v30, %v400_v29 }
  0xc0   :  { %v237_v38 = vld [vmem:[#allocation5] sm:$0xf] }
  0xc1   :  { %v243_v40 = vmul.f32 %v242_v37, %v237_v38  ;;  %v256_v42 = vld [vmem:[#allocation5] sm:$0x3f]  ;;  %v443_v38 = vstv %s1768_s9  ;;  %s2102_s9 = sld [smem:[#allocation7 + $0x48]] }
  0xc2   :  { %v262_v46 = vmul.f32 %v261_v43, %v256_v42  ;;  %v285_v51 = vld [vmem:[#allocation5] sm:$0x3f] }
  0xc3   :  { %v244_v41 = vadd.f32 %v243_v40, %v241_v39  ;;  %v291_v55 = vmul.f32 %v290_v52, %v285_v51  ;;  %v314_v61 = vld [vmem:[#allocation5] sm:$0x3f]  ;;  %v437_v39 = vld [vmem:[#allocation4] sm:$0x3f]  ;;  %v441_v40 = vstv %s1767_s10  ;;  %v470_v52 = vstv %s1769_s13  ;;  %s2105_s10 = sld [smem:[#allocation7 + $0x17]] }
  0xc4   :  { %v263_v48 = vadd.f32 %v262_v46, %v260_v47  ;;  %v320_v1 = vmul.f32 %v319_v62, %v314_v61  ;;  %v343_v7 = vld [vmem:[#allocation5] sm:$0x3f]  ;;  %v442_v42 = vmul.f32 %v441_v40, %v437_v39  ;;  %v466_v51 = vld [vmem:[#allocation4] sm:$0x3f]  ;;  %v499_v62 = vstv %s1771_s16  ;;  %s2132_s13 = sld [smem:[#allocation7 + $0x1e]] }
  0xc5   :  { %246 = vst [vmem:[#allocation1] ss:$4 sm:$0xff] %v244_v41  ;;  %v292_v59 = vadd.f32 %v291_v55, %v289_v56  ;;  %v349_v11 = vmul.f32 %v348_v8, %v343_v7  ;;  %v372_v17 = vld [vmem:[#allocation5] sm:$0x3f]  ;;  %v471_v54 = vmul.f32 %v470_v52, %v466_v51  ;;  %v495_v61 = vld [vmem:[#allocation4] sm:$0x3f]  ;;  %v528_v8 = vstv %s1773_s19 }
  0xc6   :  { %v321_v5 = vadd.f32 %v320_v1, %v318_v2  ;;  %v378_v21 = vmul.f32 %v377_v18, %v372_v17  ;;  %v401_v27 = vld [vmem:[#allocation5] sm:$0x3f]  ;;  %v500_v0 = vmul.f32 %v499_v62, %v495_v61  ;;  %v524_v7 = vld [vmem:[#allocation4] sm:$0x3f]  ;;  %v557_v18 = vstv %s1775_s20  ;;  %s1791_s16 = sld [smem:[#allocation7 + $0x25]] }
  0xc7   :  { %v350_v15 = vadd.f32 %v349_v11, %v347_v12  ;;  %v407_v31 = vmul.f32 %v406_v28, %v401_v27  ;;  %v438_v37 = vld [vmem:[#allocation5] sm:$0x3f]  ;;  %v529_v10 = vmul.f32 %v528_v8, %v524_v7  ;;  %v553_v17 = vld [vmem:[#allocation4] sm:$0x3f]  ;;  %v586_v28 = vstv %s1777_s23  ;;  %s1793_s19 = sld [smem:[#allocation7 + $0x2c]] }
  0xc8   :  { %v379_v25 = vadd.f32 %v378_v21, %v376_v22  ;;  %v444_v41 = vmul.f32 %v443_v38, %v438_v37  ;;  %v467_v47 = vld [vmem:[#allocation5] sm:$0x3f]  ;;  %v558_v20 = vmul.f32 %v557_v18, %v553_v17  ;;  %v582_v27 = vld [vmem:[#allocation4] sm:$0x3f]  ;;  %v617_v37 = vstv %s1780_s25  ;;  %s1795_s20 = sld [smem:[#allocation7 + $0x3]] }
  0xc9   :  { %v408_v35 = vadd.f32 %v407_v31, %v405_v32  ;;  %v587_v30 = vmul.f32 %v586_v28, %v582_v27  ;;  %v611_v38 = vld [vmem:[#allocation4] sm:$0x3f]  ;;  %v615_v39 = vstv %s1779_s26  ;;  %v652_v52 = vstv %s1781_s29  ;;  %v678_v61 = vld [vmem:[#allocation5] sm:$0x3f]  ;;  %s1797_s23 = sld [smem:[#allocation7 + $0xa]] }
  0xca   :  { %v445_v45 = vadd.f32 %v444_v41, %v442_v42  ;;  %v616_v41 = vmul.f32 %v615_v39, %v611_v38  ;;  %v648_v51 = vld [vmem:[#allocation4] sm:$0x3f]  ;;  %v683_v62 = vstv %s1784_s3  ;;  %v710_v17 = vstv %s1785_s7  ;;  %s2204_s25 = sld [smem:[#allocation7 + $0x42]] }
  0xcb   :  { %v735_v38 = vld [vmem:[#allocation4] sm:$0x3f]  ;;  %v739_v39 = vstv %s2105_s10  ;;  %s1799_s26 = sld [smem:[#allocation7 + $0x11]] }
  0xcc   :  { %v2083_v49 = vld.sshfl [vmem:[#allocation1] sm:$0xff pattern:$0x73625140]  ;;  %v2085_v50 = vld.sshfl [vmem:[#allocation1 + $0x8] sm:$0xff pattern:$0x73625140] }
  0xcd   :  { %265 = vst [vmem:[#allocation1] ss:$4 sm:$0xff] %v263_v48  ;;  %v472_v48 = vstv %s1770_s12  ;;  %s2126_s12 = sld [smem:[#allocation7 + $0x4f]] }
  0xce   :  { %v473_v53 = vmul.f32 %v472_v48, %v467_v47  ;;  %v649_v47 = vld [vmem:[#allocation5] sm:$0x3f]  ;;  %v654_v48 = vstv %s1782_s28  ;;  %s2214_s28 = sld [smem:[#allocation7 + $0x49]] }
  0xcf   :  { %s1801_s29 = sld [smem:[#allocation7 + $0x18]] }
  0xd0   :  { %s2224_s3 = sld [smem:[#allocation7 + $0x50]] }
  0xd1   :  { %s1805_s7 = sld [smem:[#allocation7 + $0x26]] }
  0xd2   :  { %s1807_s10 = sld [smem:[#allocation7 + $0x2d]] }
  0xd4   :  { %v268_v57 = vld.sshfl [vmem:[#allocation1 + $0x10] sm:$0xff pattern:$0x73625140]  ;;  %v266_v58 = vld.sshfl [vmem:[#allocation1] sm:$0xff pattern:$0x73625140] }
  0xd5   :  { %273 = vrot.lane.b32.xlu2 %v268_v57, %s1990_s27  ;;  %269 = vrot.lane.b32.xlu1 %v266_v58, %s1990_s27  ;;  %v267_v60 = vld.sshfl [vmem:[#allocation1 + $0x8] sm:$0xff pattern:$0x73625140]  ;;  %v474_v57 = vadd.f32 %v473_v53, %v471_v54  ;;  %v655_v53 = vmul.f32 %v654_v48, %v649_v47  ;;  %v653_v54 = vmul.f32 %v652_v52, %v648_v51 }
  0xd6   :  { %294 = vst [vmem:[#allocation1] ss:$4 sm:$0xff] %v292_v59  ;;  %v496_v59 = vld [vmem:[#allocation5] sm:$0x3f] }
  0xdd   :  { %271 = vrot.lane.b32.xlu1 %v267_v60, %s1990_s27  ;;  %v296_v3 = vld.sshfl [vmem:[#allocation1 + $0x8] sm:$0xff pattern:$0x73625140]  ;;  %v295_v4 = vld.sshfl [vmem:[#allocation1] sm:$0xff pattern:$0x73625140]  ;;  %v501_v60 = vstv %s1772_s15 }
  0xde   :  { %300 = vrot.lane.b32.xlu0 %v296_v3, %s1991_s30  ;;  %298 = vrot.lane.b32.xlu2 %v295_v4, %s1991_s30  ;;  %v297_v6 = vld.sshfl [vmem:[#allocation1 + $0x10] sm:$0xff pattern:$0x73625140]  ;;  %v502_v63 = vmul.f32 %v501_v60, %v496_v59  ;;  %s2000_s27 = smov 63   ;;  %s2144_s15 = sld [smem:[#allocation7 + $0x56]] }
  0xdf   :  { %323 = vst [vmem:[#allocation1] ss:$4 sm:$0xff] %v321_v5  ;;  %v525_v5 = vld [vmem:[#allocation5] sm:$0x3f] }
  0xe0   :  { %v503_v3 = vadd.f32 %v502_v63, %v500_v0  ;;  %v677_v63 = vld [vmem:[#allocation4] sm:$0x3f]  ;;  %v681_v0 = vstv %s1783_s4  ;;  %s1803_s4 = sld [smem:[#allocation7 + $0x1f]] }
  0xe5   :  { %302 = vrot.lane.b32.xlu1 %v297_v6, %s1991_s30  ;;  %v530_v6 = vstv %s1774_s18  ;;  %s2001_s30 = smov 47   ;;  %s2157_s18 = sld [smem:[#allocation7 + $0x5d]] }
  0xe6   :  { %v325_v13 = vld.sshfl [vmem:[#allocation1 + $0x8] sm:$0xff pattern:$0x73625140]  ;;  %v324_v14 = vld.sshfl [vmem:[#allocation1] sm:$0xff pattern:$0x73625140]  ;;  %v531_v9 = vmul.f32 %v530_v6, %v525_v5 }
  0xe7   :  { %329 = vrot.lane.b32.xlu0 %v325_v13, %s1992_s5  ;;  %327 = vrot.lane.b32.xlu2 %v324_v14, %s1992_s5  ;;  %v326_v16 = vld.sshfl [vmem:[#allocation1 + $0x10] sm:$0xff pattern:$0x73625140] }
  0xe8   :  { %352 = vst [vmem:[#allocation1] ss:$4 sm:$0xff] %v350_v15  ;;  %v532_v13 = vadd.f32 %v531_v9, %v529_v10  ;;  %v554_v15 = vld [vmem:[#allocation5] sm:$0x3f] }
  0xed   :  { %331 = vrot.lane.b32.xlu1 %v326_v16, %s1992_s5  ;;  %v559_v16 = vstv %s1776_s1  ;;  %s2002_s5 = smov 31   ;;  %s2170_s1 = sld [smem:[#allocation7 + $0x34]] }
  0xee   :  { %v560_v19 = vmul.f32 %v559_v16, %v554_v15  ;;  %v706_v16 = vld [vmem:[#allocation4] sm:$0x3f] }
  0xef   :  { %v354_v23 = vld.sshfl [vmem:[#allocation1 + $0x8] sm:$0xff pattern:$0x73625140]  ;;  %v353_v24 = vld.sshfl [vmem:[#allocation1] sm:$0xff pattern:$0x73625140] }
  0xf0   :  { %358 = vrot.lane.b32.xlu0 %v354_v23, %s1993_s8  ;;  %356 = vrot.lane.b32.xlu2 %v353_v24, %s1993_s8  ;;  %v355_v26 = vld.sshfl [vmem:[#allocation1 + $0x10] sm:$0xff pattern:$0x73625140]  ;;  %v561_v23 = vadd.f32 %v560_v19, %v558_v20  ;;  %v711_v20 = vmul.f32 %v710_v17, %v706_v16 }
  0xf1   :  { %381 = vst [vmem:[#allocation1] ss:$4 sm:$0xff] %v379_v25  ;;  %v583_v25 = vld [vmem:[#allocation5] sm:$0x3f] }
  0xf2   :  { %v794_v17 = vld [vmem:[#allocation5] sm:$0x3f] }
  0xf5   :  { %360 = vrot.lane.b32.xlu1 %v355_v26, %s1993_s8  ;;  %v588_v26 = vstv %s1778_s22  ;;  %s2003_s8 = smov 126   ;;  %s2187_s22 = sld [smem:[#allocation7 + $0x3b]] }
  0xf6   :  { %v589_v29 = vmul.f32 %v588_v26, %v583_v25 }
  0xf8   :  { %v383_v33 = vld.sshfl [vmem:[#allocation1 + $0x8] sm:$0xff pattern:$0x73625140]  ;;  %v382_v34 = vld.sshfl [vmem:[#allocation1] sm:$0xff pattern:$0x73625140] }
  0xf9   :  { %387 = vrot.lane.b32.xlu0 %v383_v33, %s1994_s11  ;;  %385 = vrot.lane.b32.xlu2 %v382_v34, %s1994_s11  ;;  %v384_v36 = vld.sshfl [vmem:[#allocation1 + $0x10] sm:$0xff pattern:$0x73625140]  ;;  %v590_v33 = vadd.f32 %v589_v29, %v587_v30 }
  0xfa   :  { %410 = vst [vmem:[#allocation1] ss:$4 sm:$0xff] %v408_v35 }
  0xfd   :  { %389 = vrot.lane.b32.xlu1 %v384_v36, %s1994_s11  ;;  %v612_v36 = vld [vmem:[#allocation5] sm:$0x3f]  ;;  %s2004_s11 = smov 110  }
  0xfe   :  { %v618_v40 = vmul.f32 %v617_v37, %v612_v36  ;;  %v741_v36 = vstv %s2102_s9  ;;  %s2244_s9 = sld [smem:[#allocation7 + $0x5e]] }
 0x101   :  { %v412_v43 = vld.sshfl [vmem:[#allocation1 + $0x8] sm:$0xff pattern:$0x73625140]  ;;  %v411_v44 = vld.sshfl [vmem:[#allocation1] sm:$0xff pattern:$0x73625140] }
 0x102   :  { %416 = vrot.lane.b32.xlu0 %v412_v43, %s1995_s14  ;;  %414 = vrot.lane.b32.xlu2 %v411_v44, %s1995_s14  ;;  %v413_v46 = vld.sshfl [vmem:[#allocation1 + $0x10] sm:$0xff pattern:$0x73625140]  ;;  %v619_v44 = vadd.f32 %v618_v40, %v616_v41 }
 0x103   :  { %447 = vst [vmem:[#allocation1] ss:$4 sm:$0xff] %v445_v45 }
 0x105   :  { %418 = vrot.lane.b32.xlu1 %v413_v46, %s1995_s14  ;;  %s2005_s14 = smov 94  }
 0x10a   :  { %v449_v55 = vld.sshfl [vmem:[#allocation1 + $0x8] sm:$0xff pattern:$0x73625140]  ;;  %v448_v56 = vld.sshfl [vmem:[#allocation1] sm:$0xff pattern:$0x73625140] }
 0x10b   :  { %453 = vrot.lane.b32.xlu0 %v449_v55, %s1996_s17  ;;  %451 = vrot.lane.b32.xlu2 %v448_v56, %s1996_s17  ;;  %v450_v58 = vld.sshfl [vmem:[#allocation1 + $0x10] sm:$0xff pattern:$0x73625140] }
 0x10c   :  { %476 = vst [vmem:[#allocation1] ss:$4 sm:$0xff] %v474_v57  ;;  %v656_v57 = vadd.f32 %v655_v53, %v653_v54 }
 0x10d   :  { %455 = vrot.lane.b32.xlu1 %v450_v58, %s1996_s17  ;;  %v201_v58 = vlaneseq  ;;  %s2006_s17 = smov 78  }
 0x113   :  { %v478_v1 = vld.sshfl [vmem:[#allocation1 + $0x8] sm:$0xff pattern:$0x73625140]  ;;  %v477_v2 = vld.sshfl [vmem:[#allocation1] sm:$0xff pattern:$0x73625140] }
 0x114   :  { %482 = vrot.lane.b32.xlu0 %v478_v1, %s1997_s0  ;;  %480 = vrot.lane.b32.xlu2 %v477_v2, %s1997_s0  ;;  %v479_v4 = vld.sshfl [vmem:[#allocation1 + $0x10] sm:$0xff pattern:$0x73625140]  ;;  %v202_v1 = vand.u32 127, %v201_v58  ;;  %v684_v2 = vmul.f32 %v683_v62, %v678_v61  ;;  %v768_v61 = vstv %s2132_s13  ;;  %s1809_s13 = sld [smem:[#allocation7 + $0x4]] }
 0x115   :  { %484 = vrot.lane.b32.xlu1 %v479_v4, %s1997_s0  ;;  %505 = vst [vmem:[#allocation1] ss:$4 sm:$0xff] %v503_v3  ;;  %v682_v4 = vmul.f32 %v681_v0, %v677_v63  ;;  %v765_v58 = vld [vmem:[#allocation5] sm:$0x3f]  ;;  %s2007_s0 = smov 62  }
 0x116   :  { %v2093_v3 = vand.u32 15, %v202_v1  ;;  %v203_v6 = vadd.s32 128, %v202_v1 }
 0x117   :  { %v685_v9 = vadd.f32 %v684_v2, %v682_v4 }
 0x118   :  { %v2100_v15 = vand.u32 15, %v203_v6 }
 0x11c   :  { %v507_v11 = vld.sshfl [vmem:[#allocation1 + $0x8] sm:$0xff pattern:$0x73625140]  ;;  %v506_v12 = vld.sshfl [vmem:[#allocation1] sm:$0xff pattern:$0x73625140] }
 0x11d   :  { %511 = vrot.lane.b32.xlu0 %v507_v11, %s1998_s21  ;;  %509 = vrot.lane.b32.xlu2 %v506_v12, %s1998_s21  ;;  %v508_v14 = vld.sshfl [vmem:[#allocation1 + $0x10] sm:$0xff pattern:$0x73625140]  ;;  %v2098_v12 = vadd.s32 4294967293, %v2093_v3 }
 0x11e   :  { %513 = vrot.lane.b32.xlu1 %v508_v14, %s1998_s21  ;;  %534 = vst [vmem:[#allocation1] ss:$4 sm:$0xff] %v532_v13  ;;  %v707_v13 = vld [vmem:[#allocation5] sm:$0x3f]  ;;  %v712_v14 = vstv %s1786_s6  ;;  %s2008_s21 = smov 46   ;;  %s2234_s6 = sld [smem:[#allocation7 + $0x57]] }
 0x11f   :  { %v713_v18 = vmul.f32 %v712_v14, %v707_v13  ;;  %vm230_vm1 = vcmp.ge.s32.totalorder %v2098_v12, 0  ;;  %v857_v12 = vld [vmem:[#allocation4] sm:$0x3f] }
 0x120   :  { %v251_v25 = vsel %vm230_vm1, %v2083_v49, 0.0 }
 0x121   :  { %v714_v30 = vadd.f32 %v713_v18, %v711_v20  ;;  %v799_v18 = vstv %s2144_s15  ;;  %v797_v20 = vstv %s1791_s16  ;;  %s2267_s15 = sld [smem:[#allocation7 + $0x3c]] }
 0x122   :  { %s1811_s16 = sld [smem:[#allocation7 + $0xb]] }
 0x125   :  { %v536_v21 = vld.sshfl [vmem:[#allocation1 + $0x8] sm:$0xff pattern:$0x73625140]  ;;  %v535_v22 = vld.sshfl [vmem:[#allocation1] sm:$0xff pattern:$0x73625140] }
 0x126   :  { %540 = vrot.lane.b32.xlu0 %v536_v21, %s1999_s24  ;;  %538 = vrot.lane.b32.xlu2 %v535_v22, %s1999_s24  ;;  %v537_v24 = vld.sshfl [vmem:[#allocation1 + $0x10] sm:$0xff pattern:$0x73625140]  ;;  %v2108_v21 = vadd.s32 4294967293, %v2100_v15 }
 0x127   :  { %542 = vrot.lane.b32.xlu1 %v537_v24, %s1999_s24  ;;  %563 = vst [vmem:[#allocation1] ss:$4 sm:$0xff] %v561_v23  ;;  %s2009_s24 = smov 30  }
 0x128   :  { %vm231_vm3 = vcmp.ge.s32.totalorder %v2108_v21, 0 }
 0x129   :  { %v252_v40 = vsel %vm231_vm3, %v2085_v50, 0.0 }
 0x12e   :  { %v565_v31 = vld.sshfl [vmem:[#allocation1 + $0x8] sm:$0xff pattern:$0x73625140]  ;;  %v564_v32 = vld.sshfl [vmem:[#allocation1] sm:$0xff pattern:$0x73625140] }
 0x12f   :  { %569 = vrot.lane.b32.xlu0 %v565_v31, %s2000_s27  ;;  %567 = vrot.lane.b32.xlu2 %v564_v32, %s2000_s27  ;;  %v566_v34 = vld.sshfl [vmem:[#allocation1 + $0x10] sm:$0xff pattern:$0x73625140]  ;;  %v2087_v35 = vpop.permute.xlu2 %273 }
 0x130   :  { %571 = vrot.lane.b32.xlu1 %v566_v34, %s2000_s27  ;;  %592 = vst [vmem:[#allocation1] ss:$4 sm:$0xff] %v590_v33  ;;  %s2010_s27 = smov 125  }
 0x137   :  { %v594_v42 = vld.sshfl [vmem:[#allocation1 + $0x8] sm:$0xff pattern:$0x73625140]  ;;  %v593_v43 = vld.sshfl [vmem:[#allocation1] sm:$0xff pattern:$0x73625140] }
 0x138   :  { %598 = vrot.lane.b32.xlu0 %v594_v42, %s2001_s30  ;;  %596 = vrot.lane.b32.xlu2 %v593_v43, %s2001_s30  ;;  %v595_v45 = vld.sshfl [vmem:[#allocation1 + $0x10] sm:$0xff pattern:$0x73625140]  ;;  %v2089_v46 = vpop.permute.xlu2 %298 }
 0x139   :  { %600 = vrot.lane.b32.xlu1 %v595_v45, %s2001_s30  ;;  %621 = vst [vmem:[#allocation1] ss:$4 sm:$0xff] %v619_v44  ;;  %v740_v45 = vmul.f32 %v739_v39, %v735_v38  ;;  %v822_v39 = vld [vmem:[#allocation4] sm:$0x3f]  ;;  %s2011_s30 = smov 109  }
 0x140   :  { %v623_v55 = vld.sshfl [vmem:[#allocation1 + $0x8] sm:$0xff pattern:$0x73625140]  ;;  %v622_v56 = vld.sshfl [vmem:[#allocation1] sm:$0xff pattern:$0x73625140] }
 0x141   :  { %627 = vrot.lane.b32.xlu0 %v623_v55, %s2002_s5  ;;  %625 = vrot.lane.b32.xlu2 %v622_v56, %s2002_s5  ;;  %v624_v59 = vld.sshfl [vmem:[#allocation1 + $0x10] sm:$0xff pattern:$0x73625140]  ;;  %v2091_v60 = vpop.permute.xlu2 %327 }
 0x142   :  { %629 = vrot.lane.b32.xlu1 %v624_v59, %s2002_s5  ;;  %658 = vst [vmem:[#allocation1] ss:$4 sm:$0xff] %v656_v57  ;;  %v770_v59 = vstv %s2126_s12  ;;  %s2012_s5 = smov 93   ;;  %s2254_s12 = sld [smem:[#allocation7 + $0x35]] }
 0x143   :  { %v771_v63 = vmul.f32 %v770_v59, %v765_v58  ;;  %v863_v58 = vstv %s2170_s1  ;;  %s2292_s1 = sld [smem:[#allocation7 + $0x4a]] }
 0x147   :  { %v270_v5 = vpop.permute.xlu1 %269 }
 0x149   :  { %v660_v7 = vld.sshfl [vmem:[#allocation1 + $0x8] sm:$0xff pattern:$0x73625140]  ;;  %v659_v8 = vld.sshfl [vmem:[#allocation1] sm:$0xff pattern:$0x73625140] }
 0x14a   :  { %664 = vrot.lane.b32.xlu0 %v660_v7, %s2003_s8  ;;  %662 = vrot.lane.b32.xlu2 %v659_v8, %s2003_s8  ;;  %v661_v10 = vld.sshfl [vmem:[#allocation1 + $0x10] sm:$0xff pattern:$0x73625140]  ;;  %v2095_v11 = vpop.permute.xlu2 %356 }
 0x14b   :  { %666 = vrot.lane.b32.xlu1 %v661_v10, %s2003_s8  ;;  %687 = vst [vmem:[#allocation1] ss:$4 sm:$0xff] %v685_v9  ;;  %s2013_s8 = smov 77  }
 0x14f   :  { %v272_v19 = vpop.permute.xlu1 %271 }
 0x150   :  { %v276_v22 = vsel %vm275_vm15, %v270_v5, %v272_v19  ;;  %v277_v23 = vsel %vm275_vm15, %v272_v19, %v2087_v35  ;;  %v301_v24 = vpop.permute.xlu0 %300  ;;  %v736_v35 = vld [vmem:[#allocation5] sm:$0x3f]  ;;  %vm602_vm15 = vcmask 384000  }
 0x151   :  { %v280_v26 = vsel %vm230_vm1, %v276_v22, 0.0  ;;  %v305_v27 = vsel %vm304_vm2, %v2089_v46, %v301_v24  ;;  %v281_v37 = vsel %vm231_vm3, %v277_v23, 0.0  ;;  %v742_v41 = vmul.f32 %v741_v36, %v736_v35  ;;  %v823_v36 = vld [vmem:[#allocation5] sm:$0x3f] }
 0x152   :  { %v689_v28 = vld.sshfl [vmem:[#allocation1 + $0x8] sm:$0xff pattern:$0x73625140]  ;;  %v688_v29 = vld.sshfl [vmem:[#allocation1] sm:$0xff pattern:$0x73625140]  ;;  %v282_v31 = vadd.f32 %v280_v26, %v251_v25  ;;  %v283_v43 = vadd.f32 %v281_v37, %v252_v40  ;;  %v800_v23 = vmul.f32 %v799_v18, %v794_v17  ;;  %v828_v37 = vstv %s2157_s18 }
 0x153   :  { %693 = vrot.lane.b32.xlu0 %v689_v28, %s2004_s11  ;;  %691 = vrot.lane.b32.xlu2 %v688_v29, %s2004_s11  ;;  %v690_v32 = vld.sshfl [vmem:[#allocation1 + $0x10] sm:$0xff pattern:$0x73625140]  ;;  %v309_v33 = vsel %vm230_vm1, %v305_v27, 0.0  ;;  %v2120_v49 = vpop.permute.xlu2 %385  ;;  %v743_v53 = vadd.f32 %v742_v41, %v740_v45  ;;  %v826_v40 = vstv %s1793_s19  ;;  %v892_v17 = vstv %s2187_s22  ;;  %s2282_s18 = sld [smem:[#allocation7 + $0x43]] }
 0x154   :  { %695 = vrot.lane.b32.xlu1 %v690_v32, %s2004_s11  ;;  %716 = vst [vmem:[#allocation1] ss:$4 sm:$0xff] %v714_v30  ;;  %v311_v34 = vadd.f32 %v309_v33, %v282_v31  ;;  %s2014_s11 = smov 61   ;;  %s1813_s19 = sld [smem:[#allocation7 + $0x12]] }
 0x155   :  { %s2302_s22 = sld [smem:[#allocation7 + $0x51]] }
 0x157   :  { %v303_v42 = vpop.permute.xlu1 %302 }
 0x158   :  { %v306_v44 = vsel %vm304_vm2, %v301_v24, %v303_v42  ;;  %v829_v42 = vmul.f32 %v828_v37, %v823_v36  ;;  %v916_v36 = vld [vmem:[#allocation5] sm:$0x3f]  ;;  %v921_v37 = vstv %s2204_s25  ;;  %vm668_vm2 = vcmask 1031168   ;;  %s2312_s25 = sld [smem:[#allocation7 + $0x58]] }
 0x159   :  { %v310_v46 = vsel %vm231_vm3, %v306_v44, 0.0  ;;  %v330_v47 = vpop.permute.xlu0 %329  ;;  %v827_v44 = vmul.f32 %v826_v40, %v822_v39  ;;  %v919_v39 = vstv %s1799_s26  ;;  %v922_v40 = vmul.f32 %v921_v37, %v916_v36  ;;  %v1002_v36 = vld [vmem:[#allocation4] sm:$0x3f]  ;;  %s1819_s26 = sld [smem:[#allocation7 + $0x27]] }
 0x15a   :  { %v312_v48 = vadd.f32 %v310_v46, %v283_v43  ;;  %v334_v51 = vsel %vm333_vm4, %v2091_v60, %v330_v47  ;;  %v764_v60 = vld [vmem:[#allocation4] sm:$0x3f]  ;;  %v1006_v37 = vstv %s1805_s7  ;;  %s1825_s7 = sld [smem:[#allocation7 + $0xc]] }
 0x15b   :  { %v718_v52 = vld.sshfl [vmem:[#allocation1 + $0x8] sm:$0xff pattern:$0x73625140]  ;;  %v717_v50 = vld.sshfl [vmem:[#allocation1] sm:$0xff pattern:$0x73625140]  ;;  %v769_v2 = vmul.f32 %v768_v61, %v764_v60  ;;  %v861_v61 = vstv %s1795_s20 }
 0x15c   :  { %722 = vrot.lane.b32.xlu0 %v718_v52, %s2005_s14  ;;  %720 = vrot.lane.b32.xlu2 %v717_v50, %s2005_s14  ;;  %v719_v54 = vld.sshfl [vmem:[#allocation1 + $0x10] sm:$0xff pattern:$0x73625140]  ;;  %v338_v55 = vsel %vm230_vm1, %v334_v51, 0.0  ;;  %v2141_v56 = vpop.permute.xlu2 %414  ;;  %v830_v51 = vadd.f32 %v829_v42, %v827_v44  ;;  %v2185_v60 = vadd.s32 4294967294, %v2093_v3  ;;  %s1815_s20 = sld [smem:[#allocation7 + $0x19]] }
 0x15d   :  { %724 = vrot.lane.b32.xlu1 %v719_v54, %s2005_s14  ;;  %745 = vst [vmem:[#allocation1] ss:$4 sm:$0xff] %v743_v53  ;;  %v340_v57 = vadd.f32 %v338_v55, %v311_v34  ;;  %v772_v9 = vadd.f32 %v771_v63, %v769_v2  ;;  %v2190_v63 = vadd.s32 4294967294, %v2100_v15  ;;  %s2015_s14 = smov 45  }
 0x15e   :  { %vm431_vm9 = vcmp.ge.s32.totalorder %v2185_v60, 0  ;;  %v1068_v60 = vld [vmem:[#allocation4] sm:$0x3f] }
 0x15f   :  { %v332_v62 = vpop.permute.xlu1 %331  ;;  %vm432_vm10 = vcmp.ge.s32.totalorder %v2190_v63, 0 }
 0x160   :  { %v335_v0 = vsel %vm333_vm4, %v330_v47, %v332_v62 }
 0x161   :  { %v339_v1 = vsel %vm231_vm3, %v335_v0, 0.0 }
 0x162   :  { %v341_v4 = vadd.f32 %v339_v1, %v312_v48  ;;  %v359_v5 = vpop.permute.xlu0 %358  ;;  %v862_v1 = vmul.f32 %v861_v61, %v857_v12 }
 0x163   :  { %v363_v6 = vsel %vm362_vm5, %v2095_v11, %v359_v5  ;;  %v793_v11 = vld [vmem:[#allocation4] sm:$0x3f] }
 0x164   :  { %v747_v7 = vld.sshfl [vmem:[#allocation1 + $0x8] sm:$0xff pattern:$0x73625140]  ;;  %v746_v8 = vld.sshfl [vmem:[#allocation1] sm:$0xff pattern:$0x73625140]  ;;  %v798_v26 = vmul.f32 %v797_v20, %v793_v11  ;;  %v890_v20 = vstv %s1797_s23 }
 0x165   :  { %751 = vrot.lane.b32.xlu0 %v747_v7, %s2006_s17  ;;  %749 = vrot.lane.b32.xlu2 %v746_v8, %s2006_s17  ;;  %v748_v10 = vld.sshfl [vmem:[#allocation1 + $0x10] sm:$0xff pattern:$0x73625140]  ;;  %v367_v13 = vsel %vm230_vm1, %v363_v6, 0.0  ;;  %v2154_v14 = vpop.permute.xlu2 %451  ;;  %s1817_s23 = sld [smem:[#allocation7 + $0x20]] }
 0x166   :  { %753 = vrot.lane.b32.xlu1 %v748_v10, %s2006_s17  ;;  %774 = vst [vmem:[#allocation1] ss:$4 sm:$0xff] %v772_v9  ;;  %v369_v16 = vadd.f32 %v367_v13, %v340_v57  ;;  %v801_v31 = vadd.f32 %v800_v23, %v798_v26  ;;  %v858_v57 = vld [vmem:[#allocation5] sm:$0x3f]  ;;  %v886_v11 = vld [vmem:[#allocation4] sm:$0x3f] }
 0x167   :  { %v361_v19 = vpop.permute.xlu1 %360  ;;  %v864_v0 = vmul.f32 %v863_v58, %v858_v57  ;;  %v891_v23 = vmul.f32 %v890_v20, %v886_v11  ;;  %v950_v57 = vstv %s2214_s28  ;;  %s2016_s17 = smov 29   ;;  %s2322_s28 = sld [smem:[#allocation7 + $0x5f]] }
 0x168   :  { %v364_v22 = vsel %vm362_vm5, %v359_v5, %v361_v19  ;;  %vm697_vm5 = vcmask 900096  }
 0x169   :  { %v368_v24 = vsel %vm231_vm3, %v364_v22, 0.0  ;;  %v865_v6 = vadd.f32 %v864_v0, %v862_v1 }
 0x16a   :  { %v370_v25 = vadd.f32 %v368_v24, %v341_v4 }
 0x16b   :  { %v388_v27 = vpop.permute.xlu0 %387 }
 0x16c   :  { %v392_v28 = vsel %vm391_vm6, %v2120_v49, %v388_v27 }
 0x16d   :  { %v776_v29 = vld.sshfl [vmem:[#allocation1 + $0x8] sm:$0xff pattern:$0x73625140]  ;;  %v775_v30 = vld.sshfl [vmem:[#allocation1] sm:$0xff pattern:$0x73625140] }
 0x16e   :  { %780 = vrot.lane.b32.xlu0 %v776_v29, %s2007_s0  ;;  %778 = vrot.lane.b32.xlu2 %v775_v30, %s2007_s0  ;;  %v777_v32 = vld.sshfl [vmem:[#allocation1 + $0x10] sm:$0xff pattern:$0x73625140]  ;;  %v396_v33 = vsel %vm230_vm1, %v392_v28, 0.0  ;;  %v2166_v34 = vpop.permute.xlu2 %480 }
 0x16f   :  { %782 = vrot.lane.b32.xlu1 %v777_v32, %s2007_s0  ;;  %803 = vst [vmem:[#allocation1] ss:$4 sm:$0xff] %v801_v31  ;;  %v398_v35 = vadd.f32 %v396_v33, %v369_v16  ;;  %v390_v38 = vpop.permute.xlu1 %389  ;;  %v887_v16 = vld [vmem:[#allocation5] sm:$0x3f]  ;;  %s2017_s0 = smov 124  }
 0x170   :  { %v393_v49 = vsel %vm391_vm6, %v388_v27, %v390_v38  ;;  %v893_v22 = vmul.f32 %v892_v17, %v887_v16  ;;  %v973_v17 = vld [vmem:[#allocation4] sm:$0x3f]  ;;  %vm726_vm6 = vcmask 769024  }
 0x171   :  { %v397_v41 = vsel %vm231_vm3, %v393_v49, 0.0  ;;  %v915_v49 = vld [vmem:[#allocation4] sm:$0x3f] }
 0x172   :  { %v399_v43 = vadd.f32 %v397_v41, %v370_v25  ;;  %v894_v29 = vadd.f32 %v893_v22, %v891_v23  ;;  %v920_v41 = vmul.f32 %v919_v39, %v915_v49  ;;  %v1007_v49 = vmul.f32 %v1006_v37, %v1002_v36 }
 0x174   :  { %v417_v45 = vpop.permute.xlu0 %416 }
 0x175   :  { %v421_v46 = vsel %vm420_vm7, %v2141_v56, %v417_v45 }
 0x176   :  { %v805_v47 = vld.sshfl [vmem:[#allocation1 + $0x8] sm:$0xff pattern:$0x73625140]  ;;  %v804_v48 = vld.sshfl [vmem:[#allocation1] sm:$0xff pattern:$0x73625140] }
 0x177   :  { %809 = vrot.lane.b32.xlu0 %v805_v47, %s2008_s21  ;;  %807 = vrot.lane.b32.xlu2 %v804_v48, %s2008_s21  ;;  %v806_v52 = vld.sshfl [vmem:[#allocation1 + $0x10] sm:$0xff pattern:$0x73625140]  ;;  %v425_v50 = vsel %vm230_vm1, %v421_v46, 0.0  ;;  %v2178_v53 = vpop.permute.xlu2 %509  ;;  %v419_v54 = vpop.permute.xlu1 %418  ;;  %v923_v47 = vadd.f32 %v922_v40, %v920_v41  ;;  %vm631_vm1 = vcmask 252928  }
 0x178   :  { %811 = vrot.lane.b32.xlu1 %v806_v52, %s2008_s21  ;;  %832 = vst [vmem:[#allocation1] ss:$4 sm:$0xff] %v830_v51  ;;  %v427_v55 = vadd.f32 %v425_v50, %v398_v35  ;;  %v422_v56 = vsel %vm420_vm7, %v417_v45, %v419_v54  ;;  %s2018_s21 = smov 108   ;;  %vm755_vm7 = vcmask 637952  }
 0x179   :  { %v426_v59 = vsel %vm231_vm3, %v422_v56, 0.0  ;;  %v944_v56 = vld [vmem:[#allocation4] sm:$0x3f] }
 0x17a   :  { %v428_v62 = vadd.f32 %v426_v59, %v399_v43  ;;  %v948_v59 = vstv %s1801_s29  ;;  %s1821_s29 = sld [smem:[#allocation7 + $0x2e]] }
 0x17b   :  { %v949_v61 = vmul.f32 %v948_v59, %v944_v56 }
 0x17d   :  { %v454_v2 = vpop.permute.xlu0 %453 }
 0x17e   :  { %v458_v21 = vsel %vm457_vm8, %v2154_v14, %v454_v2 }
 0x17f   :  { %v834_v4 = vld.sshfl [vmem:[#allocation1 + $0x8] sm:$0xff pattern:$0x73625140]  ;;  %v833_v5 = vld.sshfl [vmem:[#allocation1] sm:$0xff pattern:$0x73625140]  ;;  %v456_v7 = vpop.permute.xlu1 %455 }
 0x180   :  { %838 = vrot.lane.b32.xlu0 %v834_v4, %s2009_s24  ;;  %836 = vrot.lane.b32.xlu2 %v833_v5, %s2009_s24  ;;  %v835_v8 = vld.sshfl [vmem:[#allocation1 + $0x10] sm:$0xff pattern:$0x73625140]  ;;  %v462_v9 = vsel %vm431_vm9, %v458_v21, 0.0  ;;  %v2198_v10 = vpop.permute.xlu2 %538  ;;  %v459_v13 = vsel %vm457_vm8, %v454_v2, %v456_v7  ;;  %vm784_vm8 = vcmask 506880  }
 0x181   :  { %840 = vrot.lane.b32.xlu1 %v835_v8, %s2009_s24  ;;  %867 = vst [vmem:[#allocation1] ss:$4 sm:$0xff] %v865_v6  ;;  %v464_v14 = vadd.f32 %v462_v9, %v427_v55  ;;  %v463_v18 = vsel %vm432_vm10, %v459_v13, 0.0  ;;  %v945_v55 = vld [vmem:[#allocation5] sm:$0x3f]  ;;  %s2019_s24 = smov 92  }
 0x182   :  { %v465_v19 = vadd.f32 %v463_v18, %v428_v62  ;;  %v951_v12 = vmul.f32 %v950_v57, %v945_v55  ;;  %v974_v13 = vld [vmem:[#allocation5] sm:$0x3f]  ;;  %v977_v18 = vstv %s1803_s4  ;;  %v1031_v55 = vld [vmem:[#allocation4] sm:$0x3f]  ;;  %v1035_v57 = vstv %s1807_s10  ;;  %s1823_s4 = sld [smem:[#allocation7 + $0x5]] }
 0x183   :  { %v978_v11 = vmul.f32 %v977_v18, %v973_v17  ;;  %v1036_v56 = vmul.f32 %v1035_v57, %v1031_v55  ;;  %s1827_s10 = sld [smem:[#allocation7 + $0x13]] }
 0x184   :  { %v952_v4 = vadd.f32 %v951_v12, %v949_v61 }
 0x186   :  { %v483_v24 = vpop.permute.xlu0 %482 }
 0x187   :  { %v487_v25 = vsel %vm486_vm11, %v2166_v34, %v483_v24  ;;  %v485_v26 = vpop.permute.xlu1 %484 }
 0x188   :  { %v869_v27 = vld.sshfl [vmem:[#allocation1 + $0x8] sm:$0xff pattern:$0x73625140]  ;;  %v868_v28 = vld.sshfl [vmem:[#allocation1] sm:$0xff pattern:$0x73625140]  ;;  %v488_v30 = vsel %vm486_vm11, %v483_v24, %v485_v26 }
 0x189   :  { %873 = vrot.lane.b32.xlu0 %v869_v27, %s2010_s27  ;;  %871 = vrot.lane.b32.xlu2 %v868_v28, %s2010_s27  ;;  %v870_v31 = vld.sshfl [vmem:[#allocation1 + $0x10] sm:$0xff pattern:$0x73625140]  ;;  %v491_v32 = vsel %vm431_vm9, %v487_v25, 0.0  ;;  %v2209_v33 = vpop.permute.xlu2 %567  ;;  %v492_v35 = vsel %vm432_vm10, %v488_v30, 0.0  ;;  %vm877_vm11 = vcmask 1022976  }
 0x18a   :  { %875 = vrot.lane.b32.xlu1 %v870_v31, %s2010_s27  ;;  %896 = vst [vmem:[#allocation1] ss:$4 sm:$0xff] %v894_v29  ;;  %v493_v34 = vadd.f32 %v491_v32, %v464_v14  ;;  %v494_v38 = vadd.f32 %v492_v35, %v465_v19  ;;  %v979_v14 = vstv %s2224_s3  ;;  %v1008_v35 = vstv %s2234_s6  ;;  %s2020_s27 = smov 76   ;;  %s2332_s3 = sld [smem:[#allocation7 + $0x36]] }
 0x18b   :  { %v980_v19 = vmul.f32 %v979_v14, %v974_v13  ;;  %v2265_v13 = vadd.s32 4294967295, %v2093_v3  ;;  %v2270_v14 = vadd.s32 4294967295, %v2100_v15  ;;  %s1826_s6 = sld [smem:[#allocation7 + $0x3d]] }
 0x18d   :  { %v981_v26 = vadd.f32 %v980_v19, %v978_v11  ;;  %vm642_vm3 = vcmp.ge.s32.totalorder %v2265_v13, 0  ;;  %vm643_vm4 = vcmp.ge.s32.totalorder %v2270_v14, 0 }
 0x18f   :  { %v512_v42 = vpop.permute.xlu0 %511 }
 0x190   :  { %v516_v43 = vsel %vm515_vm12, %v2178_v53, %v512_v42  ;;  %v514_v44 = vpop.permute.xlu1 %513 }
 0x191   :  { %v898_v45 = vld.sshfl [vmem:[#allocation1 + $0x8] sm:$0xff pattern:$0x73625140]  ;;  %v897_v46 = vld.sshfl [vmem:[#allocation1] sm:$0xff pattern:$0x73625140]  ;;  %v517_v48 = vsel %vm515_vm12, %v512_v42, %v514_v44 }
 0x192   :  { %902 = vrot.lane.b32.xlu0 %v898_v45, %s2011_s30  ;;  %900 = vrot.lane.b32.xlu2 %v897_v46, %s2011_s30  ;;  %v899_v51 = vld.sshfl [vmem:[#allocation1 + $0x10] sm:$0xff pattern:$0x73625140]  ;;  %v520_v52 = vsel %vm431_vm9, %v516_v43, 0.0  ;;  %v2219_v50 = vpop.permute.xlu2 %596  ;;  %v521_v54 = vsel %vm432_vm10, %v517_v48, 0.0  ;;  %vm906_vm12 = vcmask 891904  }
 0x193   :  { %904 = vrot.lane.b32.xlu1 %v899_v51, %s2011_s30  ;;  %925 = vst [vmem:[#allocation1] ss:$4 sm:$0xff] %v923_v47  ;;  %v522_v53 = vadd.f32 %v520_v52, %v493_v34  ;;  %v523_v58 = vadd.f32 %v521_v54, %v494_v38  ;;  %v1037_v54 = vstv %s2244_s9  ;;  %s2021_s30 = smov 60   ;;  %s1828_s9 = sld [smem:[#allocation7 + $0x44]] }
 0x198   :  { %v541_v62 = vpop.permute.xlu0 %540 }
 0x199   :  { %v545_v0 = vsel %vm544_vm13, %v2198_v10, %v541_v62  ;;  %v543_v1 = vpop.permute.xlu1 %542 }
 0x19a   :  { %v927_v2 = vld.sshfl [vmem:[#allocation1 + $0x8] sm:$0xff pattern:$0x73625140]  ;;  %v926_v21 = vld.sshfl [vmem:[#allocation1] sm:$0xff pattern:$0x73625140]  ;;  %v546_v5 = vsel %vm544_vm13, %v541_v62, %v543_v1 }
 0x19b   :  { %931 = vrot.lane.b32.xlu0 %v927_v2, %s2012_s5  ;;  %929 = vrot.lane.b32.xlu2 %v926_v21, %s2012_s5  ;;  %v928_v6 = vld.sshfl [vmem:[#allocation1 + $0x10] sm:$0xff pattern:$0x73625140]  ;;  %v549_v7 = vsel %vm431_vm9, %v545_v0, 0.0  ;;  %v2229_v8 = vpop.permute.xlu2 %625  ;;  %v550_v9 = vsel %vm432_vm10, %v546_v5, 0.0  ;;  %vm935_vm13 = vcmask 760832  }
 0x19c   :  { %933 = vrot.lane.b32.xlu1 %v928_v6, %s2012_s5  ;;  %954 = vst [vmem:[#allocation1] ss:$4 sm:$0xff] %v952_v4  ;;  %v551_v10 = vadd.f32 %v549_v7, %v522_v53  ;;  %v552_v16 = vadd.f32 %v550_v9, %v523_v58  ;;  %v1074_v9 = vstv %s2254_s12  ;;  %s2022_s5 = smov 44   ;;  %s1830_s12 = sld [smem:[#allocation7 + $0x4b]] }
 0x1a1   :  { %v570_v20 = vpop.permute.xlu0 %569 }
 0x1a2   :  { %v574_v22 = vsel %vm573_vm14, %v2209_v33, %v570_v20  ;;  %v572_v23 = vpop.permute.xlu1 %571  ;;  %v1003_v33 = vld [vmem:[#allocation5] sm:$0x3f] }
 0x1a3   :  { %v956_v24 = vld.sshfl [vmem:[#allocation1 + $0x8] sm:$0xff pattern:$0x73625140]  ;;  %v955_v25 = vld.sshfl [vmem:[#allocation1] sm:$0xff pattern:$0x73625140]  ;;  %v575_v27 = vsel %vm573_vm14, %v570_v20, %v572_v23  ;;  %v1009_v38 = vmul.f32 %v1008_v35, %v1003_v33  ;;  %v1101_v35 = vstv %s1811_s16 }
 0x1a4   :  { %960 = vrot.lane.b32.xlu0 %v956_v24, %s2013_s8  ;;  %958 = vrot.lane.b32.xlu2 %v955_v25, %s2013_s8  ;;  %v957_v28 = vld.sshfl [vmem:[#allocation1 + $0x10] sm:$0xff pattern:$0x73625140]  ;;  %v578_v29 = vsel %vm431_vm9, %v574_v22, 0.0  ;;  %v2239_v30 = vpop.permute.xlu2 %662  ;;  %v579_v31 = vsel %vm432_vm10, %v575_v27, 0.0  ;;  %vm964_vm14 = vcmask 629760  }
 0x1a5   :  { %962 = vrot.lane.b32.xlu1 %v957_v28, %s2013_s8  ;;  %983 = vst [vmem:[#allocation1] ss:$4 sm:$0xff] %v981_v26  ;;  %v580_v32 = vadd.f32 %v578_v29, %v551_v10  ;;  %v581_v34 = vadd.f32 %v579_v31, %v552_v16  ;;  %v1010_v44 = vadd.f32 %v1009_v38, %v1007_v49  ;;  %v1072_v16 = vstv %s1809_s13  ;;  %v1097_v33 = vld [vmem:[#allocation4] sm:$0x3f]  ;;  %s2023_s8 = smov 28   ;;  %s1829_s13 = sld [smem:[#allocation7 + $0x1a]] }
 0x1a6   :  { %v1073_v63 = vmul.f32 %v1072_v16, %v1068_v60  ;;  %v1103_v31 = vstv %s2267_s15  ;;  %v1102_v36 = vmul.f32 %v1101_v35, %v1097_v33  ;;  %s1832_s15 = sld [smem:[#allocation7 + $0x52]] }
 0x1a7   :  { %s1831_s16 = sld [smem:[#allocation7 + $0x21]] }
 0x1aa   :  { %v599_v39 = vpop.permute.xlu0 %598 }
 0x1ab   :  { %v603_v40 = vsel %vm602_vm15, %v2219_v50, %v599_v39  ;;  %v601_v41 = vpop.permute.xlu1 %600  ;;  %v1032_v50 = vld [vmem:[#allocation5] sm:$0x3f] }
 0x1ac   :  { %v985_v42 = vld.sshfl [vmem:[#allocation1 + $0x8] sm:$0xff pattern:$0x73625140]  ;;  %v984_v43 = vld.sshfl [vmem:[#allocation1] sm:$0xff pattern:$0x73625140]  ;;  %v604_v45 = vsel %vm602_vm15, %v599_v39, %v601_v41  ;;  %v1038_v58 = vmul.f32 %v1037_v54, %v1032_v50  ;;  %v1130_v54 = vstv %s1813_s19 }
 0x1ad   :  { %989 = vrot.lane.b32.xlu0 %v985_v42, %s2014_s11  ;;  %987 = vrot.lane.b32.xlu2 %v984_v43, %s2014_s11  ;;  %v986_v46 = vld.sshfl [vmem:[#allocation1 + $0x10] sm:$0xff pattern:$0x73625140]  ;;  %v607_v47 = vsel %vm431_vm9, %v603_v40, 0.0  ;;  %v2249_v48 = vpop.permute.xlu2 %691  ;;  %v608_v51 = vsel %vm432_vm10, %v604_v45, 0.0  ;;  %vm993_vm15 = vcmask 498688  }
 0x1ae   :  { %991 = vrot.lane.b32.xlu1 %v986_v46, %s2014_s11  ;;  %1012 = vst [vmem:[#allocation1] ss:$4 sm:$0xff] %v1010_v44  ;;  %v609_v52 = vadd.f32 %v607_v47, %v580_v32  ;;  %v610_v53 = vadd.f32 %v608_v51, %v581_v34  ;;  %v1039_v1 = vadd.f32 %v1038_v58, %v1036_v56  ;;  %v1132_v51 = vstv %s2282_s18  ;;  %v1126_v50 = vld [vmem:[#allocation4] sm:$0x3f]  ;;  %s2024_s11 = smov 123   ;;  %s1834_s18 = sld [smem:[#allocation7 + $0x59]] }
 0x1af   :  { %v1131_v55 = vmul.f32 %v1130_v54, %v1126_v50  ;;  %s1833_s19 = sld [smem:[#allocation7 + $0x28]] }
 0x1b3   :  { %v628_v59 = vpop.permute.xlu0 %627 }
 0x1b4   :  { %v632_v12 = vsel %vm631_vm1, %v2229_v8, %v628_v59  ;;  %v630_v61 = vpop.permute.xlu1 %629  ;;  %v1069_v8 = vld [vmem:[#allocation5] sm:$0x3f] }
 0x1b5   :  { %v1014_v62 = vld.sshfl [vmem:[#allocation1 + $0x8] sm:$0xff pattern:$0x73625140]  ;;  %v1013_v0 = vld.sshfl [vmem:[#allocation1] sm:$0xff pattern:$0x73625140]  ;;  %v633_v2 = vsel %vm631_vm1, %v628_v59, %v630_v61  ;;  %v1075_v17 = vmul.f32 %v1074_v9, %v1069_v8  ;;  %v1159_v9 = vstv %s1815_s20 }
 0x1b6   :  { %1018 = vrot.lane.b32.xlu0 %v1014_v62, %s2015_s14  ;;  %1016 = vrot.lane.b32.xlu2 %v1013_v0, %s2015_s14  ;;  %v1015_v21 = vld.sshfl [vmem:[#allocation1 + $0x10] sm:$0xff pattern:$0x73625140]  ;;  %v636_v4 = vsel %vm431_vm9, %v632_v12, 0.0  ;;  %v2259_v5 = vpop.permute.xlu2 %720  ;;  %v637_v6 = vsel %vm432_vm10, %v633_v2, 0.0  ;;  %vm813_vm9 = vcmask 375808  }
 0x1b7   :  { %1020 = vrot.lane.b32.xlu1 %v1015_v21, %s2015_s14  ;;  %1041 = vst [vmem:[#allocation1] ss:$4 sm:$0xff] %v1039_v1  ;;  %v638_v7 = vadd.f32 %v636_v4, %v609_v52  ;;  %v639_v10 = vadd.f32 %v637_v6, %v610_v53  ;;  %v1076_v23 = vadd.f32 %v1075_v17, %v1073_v63  ;;  %v1161_v6 = vstv %s2292_s1  ;;  %v1155_v8 = vld [vmem:[#allocation4] sm:$0x3f]  ;;  %s2025_s14 = smov 107   ;;  %s1836_s1 = sld [smem:[#allocation7 + $0x60]] }
 0x1b8   :  { %v1160_v60 = vmul.f32 %v1159_v9, %v1155_v8  ;;  %vm842_vm10 = vcmask 244736   ;;  %vm1022_vm1 = vcmask 367616   ;;  %s1835_s20 = sld [smem:[#allocation7 + $0x2f]] }
 0x1bc   :  { %v665_v18 = vpop.permute.xlu0 %664 }
 0x1bd   :  { %v669_v19 = vsel %vm668_vm2, %v2239_v30, %v665_v18  ;;  %v667_v11 = vpop.permute.xlu1 %666  ;;  %v1098_v30 = vld [vmem:[#allocation5] sm:$0x3f] }
 0x1be   :  { %v1043_v20 = vld.sshfl [vmem:[#allocation1 + $0x8] sm:$0xff pattern:$0x73625140]  ;;  %v1042_v22 = vld.sshfl [vmem:[#allocation1] sm:$0xff pattern:$0x73625140]  ;;  %v670_v24 = vsel %vm668_vm2, %v665_v18, %v667_v11  ;;  %v1104_v34 = vmul.f32 %v1103_v31, %v1098_v30  ;;  %v1188_v31 = vstv %s1817_s23 }
 0x1bf   :  { %1047 = vrot.lane.b32.xlu0 %v1043_v20, %s2016_s17  ;;  %1045 = vrot.lane.b32.xlu2 %v1042_v22, %s2016_s17  ;;  %v1044_v25 = vld.sshfl [vmem:[#allocation1 + $0x10] sm:$0xff pattern:$0x73625140]  ;;  %v673_v26 = vsel %vm642_vm3, %v669_v19, 0.0  ;;  %v2277_v27 = vpop.permute.xlu2 %749  ;;  %v674_v28 = vsel %vm643_vm4, %v670_v24, 0.0  ;;  %vm1051_vm2 = vcmask 236544  }
 0x1c0   :  { %1049 = vrot.lane.b32.xlu1 %v1044_v25, %s2016_s17  ;;  %1078 = vst [vmem:[#allocation1] ss:$4 sm:$0xff] %v1076_v23  ;;  %v675_v29 = vadd.f32 %v673_v26, %v638_v7  ;;  %v676_v32 = vadd.f32 %v674_v28, %v639_v10  ;;  %v1105_v41 = vadd.f32 %v1104_v34, %v1102_v36  ;;  %v1190_v28 = vstv %s2302_s22  ;;  %v1184_v30 = vld [vmem:[#allocation4] sm:$0x3f]  ;;  %s2026_s17 = smov 91   ;;  %s2348_s22 = sld [smem:[#allocation7 + $0x37]] }
 0x1c1   :  { %v1189_v33 = vmul.f32 %v1188_v31, %v1184_v30  ;;  %s1837_s23 = sld [smem:[#allocation7 + $0x6]] }
 0x1c5   :  { %v694_v37 = vpop.permute.xlu0 %693 }
 0x1c6   :  { %v698_v38 = vsel %vm697_vm5, %v2249_v48, %v694_v37  ;;  %v696_v49 = vpop.permute.xlu1 %695  ;;  %v1127_v48 = vld [vmem:[#allocation5] sm:$0x3f] }
 0x1c7   :  { %v1080_v39 = vld.sshfl [vmem:[#allocation1 + $0x8] sm:$0xff pattern:$0x73625140]  ;;  %v1079_v40 = vld.sshfl [vmem:[#allocation1] sm:$0xff pattern:$0x73625140]  ;;  %v699_v42 = vsel %vm697_vm5, %v694_v37, %v696_v49  ;;  %v1133_v53 = vmul.f32 %v1132_v51, %v1127_v48  ;;  %v1217_v51 = vstv %s1819_s26 }
 0x1c8   :  { %1084 = vrot.lane.b32.xlu0 %v1080_v39, %s2017_s0  ;;  %1082 = vrot.lane.b32.xlu2 %v1079_v40, %s2017_s0  ;;  %v1081_v43 = vld.sshfl [vmem:[#allocation1 + $0x10] sm:$0xff pattern:$0x73625140]  ;;  %v702_v44 = vsel %vm642_vm3, %v698_v38, 0.0  ;;  %v2287_v45 = vpop.permute.xlu2 %778  ;;  %v703_v46 = vsel %vm643_vm4, %v699_v42, 0.0  ;;  %s1839_s26 = sld [smem:[#allocation7 + $0xd]] }
 0x1c9   :  { %1086 = vrot.lane.b32.xlu1 %v1081_v43, %s2017_s0  ;;  %1107 = vst [vmem:[#allocation1] ss:$4 sm:$0xff] %v1105_v41  ;;  %v704_v47 = vadd.f32 %v702_v44, %v675_v29  ;;  %v705_v52 = vadd.f32 %v703_v46, %v676_v32  ;;  %v1134_v61 = vadd.f32 %v1133_v53, %v1131_v55  ;;  %v1219_v46 = vstv %s2312_s25  ;;  %v1213_v48 = vld [vmem:[#allocation4] sm:$0x3f]  ;;  %s2027_s0 = smov 75   ;;  %s2354_s25 = sld [smem:[#allocation7 + $0x3e]] }
 0x1ca   :  { %v1218_v50 = vmul.f32 %v1217_v51, %v1213_v48 }
 0x1ce   :  { %v723_v57 = vpop.permute.xlu0 %722 }
 0x1cf   :  { %v727_v58 = vsel %vm726_vm6, %v2259_v5, %v723_v57  ;;  %v725_v56 = vpop.permute.xlu1 %724  ;;  %v1156_v5 = vld [vmem:[#allocation5] sm:$0x3f] }
 0x1d0   :  { %v1109_v59 = vld.sshfl [vmem:[#allocation1 + $0x8] sm:$0xff pattern:$0x73625140]  ;;  %v1108_v12 = vld.sshfl [vmem:[#allocation1] sm:$0xff pattern:$0x73625140]  ;;  %v728_v62 = vsel %vm726_vm6, %v723_v57, %v725_v56  ;;  %v1162_v10 = vmul.f32 %v1161_v6, %v1156_v5  ;;  %v1246_v6 = vstv %s1821_s29 }
 0x1d1   :  { %1113 = vrot.lane.b32.xlu0 %v1109_v59, %s2018_s21  ;;  %1111 = vrot.lane.b32.xlu2 %v1108_v12, %s2018_s21  ;;  %v1110_v0 = vld.sshfl [vmem:[#allocation1 + $0x10] sm:$0xff pattern:$0x73625140]  ;;  %v731_v1 = vsel %vm642_vm3, %v727_v58, 0.0  ;;  %v2297_v2 = vpop.permute.xlu2 %807  ;;  %v732_v21 = vsel %vm643_vm4, %v728_v62, 0.0  ;;  %vm1117_vm6 = vcmask 883712  }
 0x1d2   :  { %1115 = vrot.lane.b32.xlu1 %v1110_v0, %s2018_s21  ;;  %1136 = vst [vmem:[#allocation1] ss:$4 sm:$0xff] %v1134_v61  ;;  %v733_v4 = vadd.f32 %v731_v1, %v704_v47  ;;  %v734_v7 = vadd.f32 %v732_v21, %v705_v52  ;;  %v1163_v11 = vadd.f32 %v1162_v10, %v1160_v60  ;;  %v1248_v21 = vstv %s2322_s28  ;;  %v1242_v5 = vld [vmem:[#allocation4] sm:$0x3f]  ;;  %s2028_s21 = smov 59   ;;  %s2366_s28 = sld [smem:[#allocation7 + $0x45]] }
 0x1d3   :  { %v1247_v8 = vmul.f32 %v1246_v6, %v1242_v5  ;;  %s1841_s29 = sld [smem:[#allocation7 + $0x14]] }
 0x1d7   :  { %v752_v16 = vpop.permute.xlu0 %751 }
 0x1d8   :  { %v756_v17 = vsel %vm755_vm7, %v2277_v27, %v752_v16  ;;  %v754_v63 = vpop.permute.xlu1 %753  ;;  %v1185_v27 = vld [vmem:[#allocation5] sm:$0x3f] }
 0x1d9   :  { %v1138_v18 = vld.sshfl [vmem:[#allocation1 + $0x8] sm:$0xff pattern:$0x73625140]  ;;  %v1137_v19 = vld.sshfl [vmem:[#allocation1] sm:$0xff pattern:$0x73625140]  ;;  %v757_v20 = vsel %vm755_vm7, %v752_v16, %v754_v63  ;;  %v1191_v32 = vmul.f32 %v1190_v28, %v1185_v27  ;;  %v1283_v28 = vstv %s1823_s4 }
 0x1da   :  { %1142 = vrot.lane.b32.xlu0 %v1138_v18, %s2019_s24  ;;  %1140 = vrot.lane.b32.xlu2 %v1137_v19, %s2019_s24  ;;  %v1139_v22 = vld.sshfl [vmem:[#allocation1 + $0x10] sm:$0xff pattern:$0x73625140]  ;;  %v760_v23 = vsel %vm642_vm3, %v756_v17, 0.0  ;;  %v2307_v24 = vpop.permute.xlu2 %836  ;;  %v761_v25 = vsel %vm643_vm4, %v757_v20, 0.0  ;;  %vm1146_vm7 = vcmask 752640  }
 0x1db   :  { %1144 = vrot.lane.b32.xlu1 %v1139_v22, %s2019_s24  ;;  %1165 = vst [vmem:[#allocation1] ss:$4 sm:$0xff] %v1163_v11  ;;  %v762_v26 = vadd.f32 %v760_v23, %v733_v4  ;;  %v763_v29 = vadd.f32 %v761_v25, %v734_v7  ;;  %v1192_v49 = vadd.f32 %v1191_v32, %v1189_v33  ;;  %v1285_v25 = vstv %s2332_s3  ;;  %v1279_v27 = vld [vmem:[#allocation4] sm:$0x3f]  ;;  %s2029_s24 = smov 43   ;;  %s2373_s3 = sld [smem:[#allocation7 + $0x4c]] }
 0x1dc   :  { %v1284_v30 = vmul.f32 %v1283_v28, %v1279_v27  ;;  %s1843_s4 = sld [smem:[#allocation7 + $0x1b]] }
 0x1e0   :  { %v781_v35 = vpop.permute.xlu0 %780 }
 0x1e1   :  { %v785_v34 = vsel %vm784_vm8, %v2287_v45, %v781_v35  ;;  %v783_v36 = vpop.permute.xlu1 %782  ;;  %v1214_v45 = vld [vmem:[#allocation5] sm:$0x3f] }
 0x1e2   :  { %v1167_v37 = vld.sshfl [vmem:[#allocation1 + $0x8] sm:$0xff pattern:$0x73625140]  ;;  %v1166_v38 = vld.sshfl [vmem:[#allocation1] sm:$0xff pattern:$0x73625140]  ;;  %v786_v39 = vsel %vm784_vm8, %v781_v35, %v783_v36  ;;  %v1220_v52 = vmul.f32 %v1219_v46, %v1214_v45 }
 0x1e3   :  { %1171 = vrot.lane.b32.xlu0 %v1167_v37, %s2020_s27  ;;  %1169 = vrot.lane.b32.xlu2 %v1166_v38, %s2020_s27  ;;  %v1168_v40 = vld.sshfl [vmem:[#allocation1 + $0x10] sm:$0xff pattern:$0x73625140]  ;;  %v789_v41 = vsel %vm642_vm3, %v785_v34, 0.0  ;;  %v2317_v42 = vpop.permute.xlu2 %871  ;;  %v790_v43 = vsel %vm643_vm4, %v786_v39, 0.0  ;;  %vm1175_vm8 = vcmask 621568  }
 0x1e4   :  { %1173 = vrot.lane.b32.xlu1 %v1168_v40, %s2020_s27  ;;  %1194 = vst [vmem:[#allocation1] ss:$4 sm:$0xff] %v1192_v49  ;;  %v791_v44 = vadd.f32 %v789_v41, %v762_v26  ;;  %v792_v47 = vadd.f32 %v790_v43, %v763_v29  ;;  %v1221_v56 = vadd.f32 %v1220_v52, %v1218_v50  ;;  %v1309_v39 = vld [vmem:[#allocation5] sm:$0x3f]  ;;  %v1314_v40 = vstv %s1826_s6  ;;  %v1308_v41 = vld [vmem:[#allocation4] sm:$0x3f] }
 0x1e5   :  { %v1315_v43 = vmul.f32 %v1314_v40, %v1309_v39  ;;  %s2030_s27 = smov 27   ;;  %s2380_s6 = sld [smem:[#allocation7 + $0x53]] }
 0x1e9   :  { %v810_v54 = vpop.permute.xlu0 %809 }
 0x1ea   :  { %v814_v53 = vsel %vm813_vm9, %v2297_v2, %v810_v54  ;;  %v812_v55 = vpop.permute.xlu1 %811  ;;  %v1243_v2 = vld [vmem:[#allocation5] sm:$0x3f] }
 0x1eb   :  { %v1196_v57 = vld.sshfl [vmem:[#allocation1 + $0x8] sm:$0xff pattern:$0x73625140]  ;;  %v1195_v58 = vld.sshfl [vmem:[#allocation1] sm:$0xff pattern:$0x73625140]  ;;  %v815_v59 = vsel %vm813_vm9, %v810_v54, %v812_v55  ;;  %v1249_v7 = vmul.f32 %v1248_v21, %v1243_v2 }
 0x1ec   :  { %1200 = vrot.lane.b32.xlu0 %v1196_v57, %s2021_s30  ;;  %1198 = vrot.lane.b32.xlu2 %v1195_v58, %s2021_s30  ;;  %v1197_v12 = vld.sshfl [vmem:[#allocation1 + $0x10] sm:$0xff pattern:$0x73625140]  ;;  %v818_v61 = vsel %vm642_vm3, %v814_v53, 0.0  ;;  %v2327_v62 = vpop.permute.xlu2 %900  ;;  %v819_v0 = vsel %vm643_vm4, %v815_v59, 0.0  ;;  %vm1204_vm9 = vcmask 490496  }
 0x1ed   :  { %1202 = vrot.lane.b32.xlu1 %v1197_v12, %s2021_s30  ;;  %1223 = vst [vmem:[#allocation1] ss:$4 sm:$0xff] %v1221_v56  ;;  %v820_v1 = vadd.f32 %v818_v61, %v791_v44  ;;  %v821_v4 = vadd.f32 %v819_v0, %v792_v47  ;;  %v1250_v63 = vadd.f32 %v1249_v7, %v1247_v8  ;;  %v1338_v58 = vld [vmem:[#allocation5] sm:$0x3f]  ;;  %v1343_v56 = vstv %s1828_s9  ;;  %v1337_v59 = vld [vmem:[#allocation4] sm:$0x3f] }
 0x1ee   :  { %v1341_v12 = vstv %s1827_s10  ;;  %v1344_v61 = vmul.f32 %v1343_v56, %v1338_v58  ;;  %s2031_s30 = smov 122   ;;  %s2387_s9 = sld [smem:[#allocation7 + $0x5a]] }
 0x1ef   :  { %s1847_s10 = sld [smem:[#allocation7 + $0x29]] }
 0x1f2   :  { %v839_v9 = vpop.permute.xlu0 %838 }
 0x1f3   :  { %v843_v10 = vsel %vm842_vm10, %v2307_v24, %v839_v9  ;;  %v841_v60 = vpop.permute.xlu1 %840  ;;  %v1280_v24 = vld [vmem:[#allocation5] sm:$0x3f] }
 0x1f4   :  { %v1225_v16 = vld.sshfl [vmem:[#allocation1 + $0x8] sm:$0xff pattern:$0x73625140]  ;;  %v1224_v17 = vld.sshfl [vmem:[#allocation1] sm:$0xff pattern:$0x73625140]  ;;  %v844_v18 = vsel %vm842_vm10, %v839_v9, %v841_v60  ;;  %v1286_v29 = vmul.f32 %v1285_v25, %v1280_v24  ;;  %v1372_v60 = vstv %s1830_s12 }
 0x1f5   :  { %1229 = vrot.lane.b32.xlu0 %v1225_v16, %s2022_s5  ;;  %1227 = vrot.lane.b32.xlu2 %v1224_v17, %s2022_s5  ;;  %v1226_v19 = vld.sshfl [vmem:[#allocation1 + $0x10] sm:$0xff pattern:$0x73625140]  ;;  %v847_v11 = vsel %vm642_vm3, %v843_v10, 0.0  ;;  %v2337_v20 = vpop.permute.xlu2 %929  ;;  %v848_v22 = vsel %vm643_vm4, %v844_v18, 0.0  ;;  %vm1088_vm3 = vcmask 1014784  }
 0x1f6   :  { %1231 = vrot.lane.b32.xlu1 %v1226_v19, %s2022_s5  ;;  %1252 = vst [vmem:[#allocation1] ss:$4 sm:$0xff] %v1250_v63  ;;  %v849_v23 = vadd.f32 %v847_v11, %v820_v1  ;;  %v850_v26 = vadd.f32 %v848_v22, %v821_v4  ;;  %v1287_v35 = vadd.f32 %v1286_v29, %v1284_v30  ;;  %v1367_v10 = vld [vmem:[#allocation5] sm:$0x3f]  ;;  %v1366_v17 = vld [vmem:[#allocation4] sm:$0x3f]  ;;  %v1370_v63 = vstv %s1829_s13 }
 0x1f7   :  { %v1373_v18 = vmul.f32 %v1372_v60, %v1367_v10  ;;  %v1371_v19 = vmul.f32 %v1370_v63, %v1366_v17  ;;  %v1396_v30 = vld [vmem:[#allocation5] sm:$0x3f]  ;;  %s2032_s5 = smov 106   ;;  %s1850_s12 = sld [smem:[#allocation7 + $0x61]]  ;;  %vm1233_vm10 = vcmask 359424  }
 0x1f8   :  { %s1849_s13 = sld [smem:[#allocation7 + $0x30]] }
 0x1f9   :  { %v1374_v25 = vadd.f32 %v1373_v18, %v1371_v19  ;;  %v1491_v19 = vld [vmem:[#allocation5] sm:$0x3f] }
 0x1fb   :  { %v874_v13 = vpop.permute.xlu0 %873 }
 0x1fc   :  { %v878_v31 = vsel %vm877_vm11, %v2317_v42, %v874_v13  ;;  %v876_v32 = vpop.permute.xlu1 %875  ;;  %v1312_v42 = vstv %s1825_s7  ;;  %s1845_s7 = sld [smem:[#allocation7 + $0x22]] }
 0x1fd   :  { %v1254_v33 = vld.sshfl [vmem:[#allocation1 + $0x8] sm:$0xff pattern:$0x73625140]  ;;  %v1253_v14 = vld.sshfl [vmem:[#allocation1] sm:$0xff pattern:$0x73625140]  ;;  %v884_v34 = vadd.f32 %v878_v31, %v849_v23  ;;  %v879_v36 = vsel %vm877_vm11, %v874_v13, %v876_v32  ;;  %v1313_v44 = vmul.f32 %v1312_v42, %v1308_v41  ;;  %v1401_v13 = vstv %s1832_s15 }
 0x1fe   :  { %1258 = vrot.lane.b32.xlu0 %v1254_v33, %s2023_s8  ;;  %1256 = vrot.lane.b32.xlu2 %v1253_v14, %s2023_s8  ;;  %v1255_v37 = vld.sshfl [vmem:[#allocation1 + $0x10] sm:$0xff pattern:$0x73625140]  ;;  %v2343_v38 = vpop.permute.xlu2 %958  ;;  %v885_v49 = vadd.f32 %v879_v36, %v850_v26  ;;  %v1399_v33 = vstv %s1831_s16  ;;  %v1402_v14 = vmul.f32 %v1401_v13, %v1396_v30  ;;  %vm1262_vm11 = vcmask 228352   ;;  %s2036_s15 = smov 42   ;;  %s2037_s16 = smov 26  }
 0x1ff   :  { %1260 = vrot.lane.b32.xlu1 %v1255_v37, %s2023_s8  ;;  %1289 = vst [vmem:[#allocation1] ss:$4 sm:$0xff] %v1287_v35  ;;  %v1316_v52 = vadd.f32 %v1315_v43, %v1313_v44  ;;  %v1395_v32 = vld [vmem:[#allocation4] sm:$0x3f]  ;;  %v1425_v44 = vld [vmem:[#allocation5] sm:$0x3f] }
 0x200   :  { %v1400_v35 = vmul.f32 %v1399_v33, %v1395_v32  ;;  %s2033_s8 = smov 90  }
 0x202   :  { %v1403_v39 = vadd.f32 %v1402_v14, %v1400_v35 }
 0x204   :  { %v903_v45 = vpop.permute.xlu0 %902 }
 0x205   :  { %v907_v46 = vsel %vm906_vm12, %v2327_v62, %v903_v45  ;;  %v905_v47 = vpop.permute.xlu1 %904  ;;  %v1342_v62 = vmul.f32 %v1341_v12, %v1337_v59 }
 0x206   :  { %v1291_v48 = vld.sshfl [vmem:[#allocation1 + $0x8] sm:$0xff pattern:$0x73625140]  ;;  %v1290_v51 = vld.sshfl [vmem:[#allocation1] sm:$0xff pattern:$0x73625140]  ;;  %v913_v50 = vadd.f32 %v907_v46, %v884_v34  ;;  %v908_v54 = vsel %vm906_vm12, %v903_v45, %v905_v47  ;;  %v1430_v45 = vstv %s1834_s18  ;;  %v1428_v47 = vstv %s1833_s19 }
 0x207   :  { %1295 = vrot.lane.b32.xlu0 %v1291_v48, %s2024_s11  ;;  %1293 = vrot.lane.b32.xlu2 %v1290_v51, %s2024_s11  ;;  %v1292_v53 = vld.sshfl [vmem:[#allocation1 + $0x10] sm:$0xff pattern:$0x73625140]  ;;  %v914_v55 = vadd.f32 %v908_v54, %v885_v49  ;;  %v988_v57 = vpop.permute.xlu2 %987  ;;  %v1345_v5 = vadd.f32 %v1344_v61, %v1342_v62  ;;  %v1431_v51 = vmul.f32 %v1430_v45, %v1425_v44  ;;  %vm1299_vm12 = vcmask 1006592  }
 0x208   :  { %1297 = vrot.lane.b32.xlu1 %v1292_v53, %s2024_s11  ;;  %1318 = vst [vmem:[#allocation1] ss:$4 sm:$0xff] %v1316_v52  ;;  %v1424_v46 = vld [vmem:[#allocation4] sm:$0x3f]  ;;  %v1454_v62 = vld [vmem:[#allocation5] sm:$0x3f] }
 0x209   :  { %v1429_v52 = vmul.f32 %v1428_v47, %v1424_v46  ;;  %s2034_s11 = smov 74  }
 0x20b   :  { %v1432_v58 = vadd.f32 %v1431_v51, %v1429_v52 }
 0x20d   :  { %v932_v0 = vpop.permute.xlu0 %931 }
 0x20e   :  { %v936_v1 = vsel %vm935_vm13, %v2337_v20, %v932_v0  ;;  %v934_v2 = vpop.permute.xlu1 %933 }
 0x20f   :  { %v1320_v21 = vld.sshfl [vmem:[#allocation1 + $0x8] sm:$0xff pattern:$0x73625140]  ;;  %v1319_v4 = vld.sshfl [vmem:[#allocation1] sm:$0xff pattern:$0x73625140]  ;;  %v942_v6 = vadd.f32 %v936_v1, %v913_v50  ;;  %v937_v7 = vsel %vm935_vm13, %v932_v0, %v934_v2  ;;  %v1459_v0 = vstv %s1836_s1  ;;  %v1457_v2 = vstv %s1835_s20 }
 0x210   :  { %1324 = vrot.lane.b32.xlu0 %v1320_v21, %s2025_s14  ;;  %1322 = vrot.lane.b32.xlu2 %v1319_v4, %s2025_s14  ;;  %v1321_v8 = vld.sshfl [vmem:[#allocation1 + $0x10] sm:$0xff pattern:$0x73625140]  ;;  %v943_v9 = vadd.f32 %v937_v7, %v914_v55  ;;  %v1017_v16 = vpop.permute.xlu2 %1016  ;;  %v1460_v21 = vmul.f32 %v1459_v0, %v1454_v62  ;;  %s1744_s1 = sshll.u32 %s2484_s2, 4  ;;  %s1745_s1 = int_to_ptr.hbm [resolvable:$true] %s1744_s1 }
 0x211   :  { %1326 = vrot.lane.b32.xlu1 %v1321_v8, %s2025_s14  ;;  %1347 = vst [vmem:[#allocation1] ss:$4 sm:$0xff] %v1345_v5  ;;  %v1453_v1 = vld [vmem:[#allocation4] sm:$0x3f]  ;;  %s2035_s14 = smov 58  }
 0x212   :  { %v1458_v5 = vmul.f32 %v1457_v2, %v1453_v1 }
 0x214   :  { %v1461_v60 = vadd.f32 %v1460_v21, %v1458_v5 }
 0x216   :  { %v961_v11 = vpop.permute.xlu0 %960 }
 0x217   :  { %v965_v20 = vsel %vm964_vm14, %v2343_v38, %v961_v11  ;;  %v963_v22 = vpop.permute.xlu1 %962 }
 0x218   :  { %v1349_v23 = vld.sshfl [vmem:[#allocation1 + $0x8] sm:$0xff pattern:$0x73625140]  ;;  %v1348_v24 = vld.sshfl [vmem:[#allocation1] sm:$0xff pattern:$0x73625140]  ;;  %v971_v26 = vadd.f32 %v965_v20, %v942_v6  ;;  %v966_v27 = vsel %vm964_vm14, %v961_v11, %v963_v22  ;;  %v1496_v11 = vstv %s2348_s22 }
 0x219   :  { %1353 = vrot.lane.b32.xlu0 %v1349_v23, %s2026_s17  ;;  %1351 = vrot.lane.b32.xlu2 %v1348_v24, %s2026_s17  ;;  %v1350_v28 = vld.sshfl [vmem:[#allocation1 + $0x10] sm:$0xff pattern:$0x73625140]  ;;  %v972_v29 = vadd.f32 %v966_v27, %v943_v9  ;;  %v1046_v31 = vpop.permute.xlu2 %1045  ;;  %v2352_v20 = vadd.s32 1, %v2093_v3  ;;  %v2357_v22 = vadd.s32 1, %v2100_v15  ;;  %v1494_v24 = vstv %s1837_s23 }
 0x21a   :  { %1355 = vrot.lane.b32.xlu1 %v1350_v28, %s2026_s17  ;;  %1376 = vst [vmem:[#allocation1] ss:$4 sm:$0xff] %v1374_v25  ;;  %v1490_v23 = vld [vmem:[#allocation4] sm:$0x3f]  ;;  %v1497_v25 = vmul.f32 %v1496_v11, %v1491_v19  ;;  %v1581_v19 = vstv %s1843_s4  ;;  %s2038_s17 = smov [#allocation11]  }
 0x21b   :  { %v1495_v27 = vmul.f32 %v1494_v24, %v1490_v23  ;;  %vm1064_vm4 = vcmp.lt.s32.totalorder %v2352_v20, 16  ;;  %vm1065_vm5 = vcmp.lt.s32.totalorder %v2357_v22, 16  ;;  %s1742_s18 = sshll.u32 %s2038_s17, 4  ;;  %s1743_s18 = int_to_ptr.vmem [resolvable:$true] %s1742_s18 }
 0x21d   :  { %v1498_v32 = vadd.f32 %v1497_v25, %v1495_v27 }
 0x21f   :  { %v990_v34 = vpop.permute.xlu0 %989 }
 0x220   :  { %v994_v36 = vsel %vm993_vm15, %v988_v57, %v990_v34  ;;  %v992_v37 = vpop.permute.xlu1 %991 }
 0x221   :  { %v1378_v38 = vld.sshfl [vmem:[#allocation1 + $0x8] sm:$0xff pattern:$0x73625140]  ;;  %v1377_v49 = vld.sshfl [vmem:[#allocation1] sm:$0xff pattern:$0x73625140]  ;;  %v1000_v40 = vadd.f32 %v994_v36, %v971_v26  ;;  %v995_v41 = vsel %vm993_vm15, %v990_v34, %v992_v37 }
 0x222   :  { %1382 = vrot.lane.b32.xlu0 %v1378_v38, %s2027_s0  ;;  %1380 = vrot.lane.b32.xlu2 %v1377_v49, %s2027_s0  ;;  %v1379_v42 = vld.sshfl [vmem:[#allocation1 + $0x10] sm:$0xff pattern:$0x73625140]  ;;  %v1001_v43 = vadd.f32 %v995_v41, %v972_v29  ;;  %v1083_v48 = vpop.permute.xlu2 %1082  ;;  %v1525_v38 = vstv %s2354_s25  ;;  %vm1328_vm15 = vcmask 875520  }
 0x223   :  { %1384 = vrot.lane.b32.xlu1 %v1379_v42, %s2027_s0  ;;  %1405 = vst [vmem:[#allocation1] ss:$4 sm:$0xff] %v1403_v39  ;;  %v1520_v37 = vld [vmem:[#allocation5] sm:$0x3f]  ;;  %v1519_v39 = vld [vmem:[#allocation4] sm:$0x3f] }
 0x224   :  { %v1526_v41 = vmul.f32 %v1525_v38, %v1520_v37  ;;  %v1606_v37 = vld [vmem:[#allocation4] sm:$0x3f]  ;;  %v1610_v38 = vstv %s1845_s7 }
 0x228   :  { %v1019_v50 = vpop.permute.xlu0 %1018 }
 0x229   :  { %v1023_v54 = vsel %vm1022_vm1, %v1017_v16, %v1019_v50  ;;  %v1021_v53 = vpop.permute.xlu1 %1020 }
 0x22a   :  { %v1408_v55 = vld.sshfl [vmem:[#allocation1 + $0x10] sm:$0xff pattern:$0x73625140]  ;;  %v1407_v57 = vld.sshfl [vmem:[#allocation1 + $0x8] sm:$0xff pattern:$0x73625140]  ;;  %v1029_v56 = vadd.f32 %v1023_v54, %v1000_v40  ;;  %v1024_v59 = vsel %vm1022_vm1, %v1019_v50, %v1021_v53  ;;  %v1523_v40 = vstv %s1839_s26 }
 0x22b   :  { %1413 = vrot.lane.b32.xlu0 %v1408_v55, %s2028_s21  ;;  %1411 = vrot.lane.b32.xlu2 %v1407_v57, %s2028_s21  ;;  %v1406_v12 = vld.sshfl [vmem:[#allocation1] sm:$0xff pattern:$0x73625140]  ;;  %v1030_v61 = vadd.f32 %v1024_v59, %v1001_v43  ;;  %v1112_v4 = vpop.permute.xlu2 %1111  ;;  %v1524_v42 = vmul.f32 %v1523_v40, %v1519_v39  ;;  %v1549_v57 = vld [vmem:[#allocation5] sm:$0x3f]  ;;  %v1611_v39 = vmul.f32 %v1610_v38, %v1606_v37  ;;  %vm1357_vm1 = vcmask 744448  }
 0x22c   :  { %1409 = vrot.lane.b32.xlu1 %v1406_v12, %s2028_s21  ;;  %1434 = vst [vmem:[#allocation1] ss:$4 sm:$0xff] %v1432_v58  ;;  %v1554_v58 = vstv %s2366_s28  ;;  %v1548_v59 = vld [vmem:[#allocation4] sm:$0x3f]  ;;  %v1552_v12 = vstv %s1841_s29 }
 0x22d   :  { %v1527_v51 = vadd.f32 %v1526_v41, %v1524_v42  ;;  %v1553_v62 = vmul.f32 %v1552_v12, %v1548_v59 }
 0x231   :  { %v1048_v6 = vpop.permute.xlu0 %1047 }
 0x232   :  { %v1052_v7 = vsel %vm1051_vm2, %v1046_v31, %v1048_v6  ;;  %v1050_v8 = vpop.permute.xlu1 %1049 }
 0x233   :  { %v1437_v9 = vld.sshfl [vmem:[#allocation1 + $0x10] sm:$0xff pattern:$0x73625140]  ;;  %v1436_v10 = vld.sshfl [vmem:[#allocation1 + $0x8] sm:$0xff pattern:$0x73625140]  ;;  %v1058_v16 = vadd.f32 %v1052_v7, %v1029_v56  ;;  %v1053_v17 = vsel %vm1051_vm2, %v1048_v6, %v1050_v8 }
 0x234   :  { %1442 = vrot.lane.b32.xlu0 %v1437_v9, %s2029_s24  ;;  %1440 = vrot.lane.b32.xlu2 %v1436_v10, %s2029_s24  ;;  %v1435_v63 = vld.sshfl [vmem:[#allocation1] sm:$0xff pattern:$0x73625140]  ;;  %v1059_v18 = vadd.f32 %v1053_v17, %v1030_v61  ;;  %v1141_v26 = vpop.permute.xlu2 %1140  ;;  %v1555_v61 = vmul.f32 %v1554_v58, %v1549_v57  ;;  %v1583_v17 = vstv %s2373_s3  ;;  %v1635_v57 = vld [vmem:[#allocation4] sm:$0x3f]  ;;  %v1639_v58 = vstv %s1847_s10 }
 0x235   :  { %1438 = vrot.lane.b32.xlu1 %v1435_v63, %s2029_s24  ;;  %1463 = vst [vmem:[#allocation1] ss:$4 sm:$0xff] %v1461_v60  ;;  %v1640_v59 = vmul.f32 %v1639_v58, %v1635_v57  ;;  %vm1386_vm2 = vcmask 613376  }
 0x236   :  { %v1556_v6 = vadd.f32 %v1555_v61, %v1553_v62 }
 0x23a   :  { %v1085_v28 = vpop.permute.xlu0 %1084 }
 0x23b   :  { %v1089_v29 = vsel %vm1088_vm3, %v1083_v48, %v1085_v28  ;;  %v1087_v30 = vpop.permute.xlu1 %1086 }
 0x23c   :  { %v1466_v13 = vld.sshfl [vmem:[#allocation1 + $0x10] sm:$0xff pattern:$0x73625140]  ;;  %v1465_v31 = vld.sshfl [vmem:[#allocation1 + $0x8] sm:$0xff pattern:$0x73625140]  ;;  %v1090_v33 = vsel %vm1088_vm3, %v1085_v28, %v1087_v30 }
 0x23d   :  { %1471 = vrot.lane.b32.xlu0 %v1466_v13, %s2030_s27  ;;  %1469 = vrot.lane.b32.xlu2 %v1465_v31, %s2030_s27  ;;  %v1464_v14 = vld.sshfl [vmem:[#allocation1] sm:$0xff pattern:$0x73625140]  ;;  %v1093_v35 = vsel %vm1064_vm4, %v1089_v29, 0.0  ;;  %v1094_v34 = vsel %vm1065_vm5, %v1090_v33, 0.0  ;;  %v1170_v44 = vpop.permute.xlu2 %1169  ;;  %vm1415_vm3 = vcmask 482304  }
 0x23e   :  { %1467 = vrot.lane.b32.xlu1 %v1464_v14, %s2030_s27  ;;  %1500 = vst [vmem:[#allocation1] ss:$4 sm:$0xff] %v1498_v32  ;;  %v1095_v36 = vadd.f32 %v1093_v35, %v1058_v16  ;;  %v1096_v49 = vadd.f32 %v1094_v34, %v1059_v18  ;;  %v1578_v16 = vld [vmem:[#allocation5] sm:$0x3f]  ;;  %v1577_v18 = vld [vmem:[#allocation4] sm:$0x3f]  ;;  %v1612_v34 = vstv %s2380_s6 }
 0x23f   :  { %v1584_v11 = vmul.f32 %v1583_v17, %v1578_v16  ;;  %v1582_v23 = vmul.f32 %v1581_v19, %v1577_v18  ;;  %v1607_v35 = vld [vmem:[#allocation5] sm:$0x3f]  ;;  %v1664_v16 = vld [vmem:[#allocation4] sm:$0x3f]  ;;  %v1668_v17 = vstv %s1849_s13 }
 0x240   :  { %v1669_v18 = vmul.f32 %v1668_v17, %v1664_v16 }
 0x241   :  { %v1585_v29 = vadd.f32 %v1584_v11, %v1582_v23 }
 0x243   :  { %v1114_v43 = vpop.permute.xlu0 %1113 }
 0x244   :  { %v1118_v45 = vsel %vm1117_vm6, %v1112_v4, %v1114_v43  ;;  %v1116_v46 = vpop.permute.xlu1 %1115 }
 0x245   :  { %v1503_v47 = vld.sshfl [vmem:[#allocation1 + $0x10] sm:$0xff pattern:$0x73625140]  ;;  %v1502_v48 = vld.sshfl [vmem:[#allocation1 + $0x8] sm:$0xff pattern:$0x73625140]  ;;  %v1119_v52 = vsel %vm1117_vm6, %v1114_v43, %v1116_v46 }
 0x246   :  { %1508 = vrot.lane.b32.xlu0 %v1503_v47, %s2031_s30  ;;  %1506 = vrot.lane.b32.xlu2 %v1502_v48, %s2031_s30  ;;  %v1501_v50 = vld.sshfl [vmem:[#allocation1] sm:$0xff pattern:$0x73625140]  ;;  %v1122_v54 = vsel %vm1064_vm4, %v1118_v45, 0.0  ;;  %v1123_v53 = vsel %vm1065_vm5, %v1119_v52, 0.0  ;;  %v1199_v5 = vpop.permute.xlu2 %1198  ;;  %vm1510_vm6 = vcmask 998400  }
 0x247   :  { %1504 = vrot.lane.b32.xlu1 %v1501_v50, %s2031_s30  ;;  %1529 = vst [vmem:[#allocation1] ss:$4 sm:$0xff] %v1527_v51  ;;  %v1124_v55 = vadd.f32 %v1122_v54, %v1095_v36  ;;  %v1125_v56 = vadd.f32 %v1123_v53, %v1096_v49  ;;  %v1613_v49 = vmul.f32 %v1612_v34, %v1607_v35  ;;  %v1636_v54 = vld [vmem:[#allocation5] sm:$0x3f]  ;;  %v1641_v53 = vstv %s2387_s9 }
 0x249   :  { %v1614_v45 = vadd.f32 %v1613_v49, %v1611_v39 }
 0x24c   :  { %v1143_v0 = vpop.permute.xlu0 %1142 }
 0x24d   :  { %v1147_v1 = vsel %vm1146_vm7, %v1141_v26, %v1143_v0  ;;  %v1145_v2 = vpop.permute.xlu1 %1144 }
 0x24e   :  { %v1532_v21 = vld.sshfl [vmem:[#allocation1 + $0x10] sm:$0xff pattern:$0x73625140]  ;;  %v1531_v4 = vld.sshfl [vmem:[#allocation1 + $0x8] sm:$0xff pattern:$0x73625140]  ;;  %v1148_v7 = vsel %vm1146_vm7, %v1143_v0, %v1145_v2 }
 0x24f   :  { %1537 = vrot.lane.b32.xlu0 %v1532_v21, %s2032_s5  ;;  %1535 = vrot.lane.b32.xlu2 %v1531_v4, %s2032_s5  ;;  %v1530_v8 = vld.sshfl [vmem:[#allocation1] sm:$0xff pattern:$0x73625140]  ;;  %v1151_v9 = vsel %vm1064_vm4, %v1147_v1, 0.0  ;;  %v1152_v10 = vsel %vm1065_vm5, %v1148_v7, 0.0  ;;  %v1228_v13 = vpop.permute.xlu2 %1227 }
 0x250   :  { %1533 = vrot.lane.b32.xlu1 %v1530_v8, %s2032_s5  ;;  %1558 = vst [vmem:[#allocation1] ss:$4 sm:$0xff] %v1556_v6  ;;  %v1153_v60 = vadd.f32 %v1151_v9, %v1124_v55  ;;  %v1154_v63 = vadd.f32 %v1152_v10, %v1125_v56  ;;  %v1642_v56 = vmul.f32 %v1641_v53, %v1636_v54  ;;  %v1665_v8 = vld [vmem:[#allocation5] sm:$0x3f]  ;;  %v1670_v9 = vstv %s1850_s12 }
 0x252   :  { %v1643_v2 = vadd.f32 %v1642_v56, %v1640_v59 }
 0x255   :  { %v1172_v24 = vpop.permute.xlu0 %1171 }
 0x256   :  { %v1176_v25 = vsel %vm1175_vm8, %v1170_v44, %v1172_v24  ;;  %v1174_v26 = vpop.permute.xlu1 %1173 }
 0x257   :  { %v1561_v27 = vld.sshfl [vmem:[#allocation1 + $0x10] sm:$0xff pattern:$0x73625140]  ;;  %v1560_v28 = vld.sshfl [vmem:[#allocation1 + $0x8] sm:$0xff pattern:$0x73625140]  ;;  %v1177_v30 = vsel %vm1175_vm8, %v1172_v24, %v1174_v26 }
 0x258   :  { %1566 = vrot.lane.b32.xlu0 %v1561_v27, %s2033_s8  ;;  %1564 = vrot.lane.b32.xlu2 %v1560_v28, %s2033_s8  ;;  %v1559_v31 = vld.sshfl [vmem:[#allocation1] sm:$0xff pattern:$0x73625140]  ;;  %v1180_v32 = vsel %vm1064_vm4, %v1176_v25, 0.0  ;;  %v1181_v33 = vsel %vm1065_vm5, %v1177_v30, 0.0  ;;  %v1257_v52 = vpop.permute.xlu2 %1256  ;;  %vm1539_vm8 = vcmask 867328  }
 0x259   :  { %1562 = vrot.lane.b32.xlu1 %v1559_v31, %s2033_s8  ;;  %1587 = vst [vmem:[#allocation1] ss:$4 sm:$0xff] %v1585_v29  ;;  %v1182_v14 = vadd.f32 %v1180_v32, %v1153_v60  ;;  %v1183_v36 = vadd.f32 %v1181_v33, %v1154_v63  ;;  %v1671_v63 = vmul.f32 %v1670_v9, %v1665_v8  ;;  %v2403_v32 = vadd.s32 2, %v2093_v3 }
 0x25a   :  { %v2406_v33 = vadd.s32 2, %v2100_v15 }
 0x25b   :  { %v1672_v26 = vadd.f32 %v1671_v63, %v1669_v18  ;;  %vm1275_vm13 = vcmp.lt.s32.totalorder %v2403_v32, 16 }
 0x25c   :  { %vm1276_vm14 = vcmp.lt.s32.totalorder %v2406_v33, 16 }
 0x25e   :  { %v1201_v40 = vpop.permute.xlu0 %1200 }
 0x25f   :  { %v1205_v41 = vsel %vm1204_vm9, %v1199_v5, %v1201_v40  ;;  %v1203_v42 = vpop.permute.xlu1 %1202 }
 0x260   :  { %v1590_v43 = vld.sshfl [vmem:[#allocation1 + $0x10] sm:$0xff pattern:$0x73625140]  ;;  %v1589_v44 = vld.sshfl [vmem:[#allocation1 + $0x8] sm:$0xff pattern:$0x73625140]  ;;  %v1206_v46 = vsel %vm1204_vm9, %v1201_v40, %v1203_v42 }
 0x261   :  { %1595 = vrot.lane.b32.xlu0 %v1590_v43, %s2034_s11  ;;  %1593 = vrot.lane.b32.xlu2 %v1589_v44, %s2034_s11  ;;  %v1588_v47 = vld.sshfl [vmem:[#allocation1] sm:$0xff pattern:$0x73625140]  ;;  %v1209_v48 = vsel %vm1064_vm4, %v1205_v41, 0.0  ;;  %v1210_v51 = vsel %vm1065_vm5, %v1206_v46, 0.0  ;;  %v1294_v60 = vpop.permute.xlu2 %1293 }
 0x262   :  { %1591 = vrot.lane.b32.xlu1 %v1588_v47, %s2034_s11  ;;  %1616 = vst [vmem:[#allocation1] ss:$4 sm:$0xff] %v1614_v45  ;;  %v1211_v50 = vadd.f32 %v1209_v48, %v1182_v14  ;;  %v1212_v55 = vadd.f32 %v1210_v51, %v1183_v36 }
 0x267   :  { %v1230_v12 = vpop.permute.xlu0 %1229 }
 0x268   :  { %v1234_v61 = vsel %vm1233_vm10, %v1228_v13, %v1230_v12  ;;  %v1232_v62 = vpop.permute.xlu1 %1231 }
 0x269   :  { %v1619_v0 = vld.sshfl [vmem:[#allocation1 + $0x10] sm:$0xff pattern:$0x73625140]  ;;  %v1618_v1 = vld.sshfl [vmem:[#allocation1 + $0x8] sm:$0xff pattern:$0x73625140]  ;;  %v1235_v21 = vsel %vm1233_vm10, %v1230_v12, %v1232_v62 }
 0x26a   :  { %1624 = vrot.lane.b32.xlu0 %v1619_v0, %s2035_s14  ;;  %1622 = vrot.lane.b32.xlu2 %v1618_v1, %s2035_s14  ;;  %v1617_v4 = vld.sshfl [vmem:[#allocation1] sm:$0xff pattern:$0x73625140]  ;;  %v1238_v5 = vsel %vm1064_vm4, %v1234_v61, 0.0  ;;  %v1239_v6 = vsel %vm1065_vm5, %v1235_v21, 0.0  ;;  %v1323_v14 = vpop.permute.xlu2 %1322  ;;  %vm1568_vm10 = vcmask 736256  }
 0x26b   :  { %1620 = vrot.lane.b32.xlu1 %v1617_v4, %s2035_s14  ;;  %1645 = vst [vmem:[#allocation1] ss:$4 sm:$0xff] %v1643_v2  ;;  %v1240_v7 = vadd.f32 %v1238_v5, %v1211_v50  ;;  %v1241_v10 = vadd.f32 %v1239_v6, %v1212_v55 }
 0x270   :  { %v1259_v19 = vpop.permute.xlu0 %1258 }
 0x271   :  { %v1263_v11 = vsel %vm1262_vm11, %v1257_v52, %v1259_v19  ;;  %v1261_v23 = vpop.permute.xlu1 %1260 }
 0x272   :  { %v1648_v24 = vld.sshfl [vmem:[#allocation1 + $0x10] sm:$0xff pattern:$0x73625140]  ;;  %v1647_v25 = vld.sshfl [vmem:[#allocation1 + $0x8] sm:$0xff pattern:$0x73625140]  ;;  %v1264_v27 = vsel %vm1262_vm11, %v1259_v19, %v1261_v23 }
 0x273   :  { %1653 = vrot.lane.b32.xlu0 %v1648_v24, %s2036_s15  ;;  %1651 = vrot.lane.b32.xlu2 %v1647_v25, %s2036_s15  ;;  %v1646_v28 = vld.sshfl [vmem:[#allocation1] sm:$0xff pattern:$0x73625140]  ;;  %v1267_v29 = vsel %vm1064_vm4, %v1263_v11, 0.0  ;;  %v1268_v30 = vsel %vm1065_vm5, %v1264_v27, 0.0  ;;  %v1352_v42 = vpop.permute.xlu2 %1351  ;;  %vm1444_vm4 = vcmask 351232  }
 0x274   :  { %1649 = vrot.lane.b32.xlu1 %v1646_v28, %s2036_s15  ;;  %1674 = vst [vmem:[#allocation1] ss:$4 sm:$0xff] %v1672_v26  ;;  %v1269_v13 = vadd.f32 %v1267_v29, %v1240_v7  ;;  %v1270_v31 = vadd.f32 %v1268_v30, %v1241_v10  ;;  %v2425_v29 = vadd.s32 3, %v2100_v15  ;;  %vm1473_vm5 = vcmask 220160  }
 0x275   :  { %vm1597_vm11 = vcmask 605184  }
 0x276   :  { %vm1487_vm7 = vcmp.lt.s32.totalorder %v2425_v29, 16 }
 0x279   :  { %v1296_v35 = vpop.permute.xlu0 %1295 }
 0x27a   :  { %v1300_v20 = vsel %vm1299_vm12, %v1294_v60, %v1296_v35  ;;  %v1298_v22 = vpop.permute.xlu1 %1297 }
 0x27b   :  { %v1677_v34 = vld.sshfl [vmem:[#allocation1 + $0x10] sm:$0xff pattern:$0x73625140]  ;;  %v1676_v36 = vld.sshfl [vmem:[#allocation1 + $0x8] sm:$0xff pattern:$0x73625140]  ;;  %v1301_v37 = vsel %vm1299_vm12, %v1296_v35, %v1298_v22 }
 0x27c   :  { %1682 = vrot.lane.b32.xlu0 %v1677_v34, %s2037_s16  ;;  %1680 = vrot.lane.b32.xlu2 %v1676_v36, %s2037_s16  ;;  %v1675_v38 = vld.sshfl [vmem:[#allocation1] sm:$0xff pattern:$0x73625140]  ;;  %v1304_v49 = vsel %vm1275_vm13, %v1300_v20, 0.0  ;;  %v1305_v39 = vsel %vm1276_vm14, %v1301_v37, 0.0  ;;  %v1381_v50 = vpop.permute.xlu2 %1380  ;;  %v2430_v22 = vadd.s32 3, %v2093_v3 }
 0x27d   :  { %1678 = vrot.lane.b32.xlu1 %v1675_v38, %s2037_s16  ;;  %v1306_v40 = vadd.f32 %v1304_v49, %v1269_v13  ;;  %v1307_v41 = vadd.f32 %v1305_v39, %v1270_v31  ;;  %vm1626_vm12 = vcmask 474112  }
 0x27e   :  { %vm1486_vm9 = vcmp.lt.s32.totalorder %v2430_v22, 16 }
 0x282   :  { %v1325_v43 = vpop.permute.xlu0 %1324 }
 0x283   :  { %v1329_v44 = vsel %vm1328_vm15, %v1323_v14, %v1325_v43  ;;  %v1327_v45 = vpop.permute.xlu1 %1326 }
 0x284   :  { %v1333_v46 = vsel %vm1275_vm13, %v1329_v44, 0.0  ;;  %v1330_v47 = vsel %vm1328_vm15, %v1325_v43, %v1327_v45 }
 0x285   :  { %v1335_v48 = vadd.f32 %v1333_v46, %v1306_v40  ;;  %v1334_v51 = vsel %vm1276_vm14, %v1330_v47, 0.0  ;;  %v1412_v61 = vpop.permute.xlu2 %1411 }
 0x286   :  { %v1336_v52 = vadd.f32 %v1334_v51, %v1307_v41 }
 0x28b   :  { %v1354_v54 = vpop.permute.xlu0 %1353 }
 0x28c   :  { %v1358_v53 = vsel %vm1357_vm1, %v1352_v42, %v1354_v54  ;;  %v1356_v55 = vpop.permute.xlu1 %1355 }
 0x28d   :  { %v1362_v57 = vsel %vm1275_vm13, %v1358_v53, 0.0  ;;  %v1359_v58 = vsel %vm1357_vm1, %v1354_v54, %v1356_v55 }
 0x28e   :  { %v1364_v56 = vadd.f32 %v1362_v57, %v1335_v48  ;;  %v1363_v59 = vsel %vm1276_vm14, %v1359_v58, 0.0  ;;  %v1441_v2 = vpop.permute.xlu2 %1440 }
 0x28f   :  { %v1365_v12 = vadd.f32 %v1363_v59, %v1336_v52 }
 0x294   :  { %v1383_v62 = vpop.permute.xlu0 %1382 }
 0x295   :  { %v1385_v0 = vpop.permute.xlu1 %1384  ;;  %v1387_v27 = vsel %vm1386_vm2, %v1381_v50, %v1383_v62 }
 0x296   :  { %v1388_v26 = vsel %vm1386_vm2, %v1383_v62, %v1385_v0  ;;  %v1391_v30 = vsel %vm1275_vm13, %v1387_v27, 0.0 }
 0x297   :  { %v1470_v6 = vpop.permute.xlu2 %1469  ;;  %v1392_v28 = vsel %vm1276_vm14, %v1388_v26, 0.0  ;;  %v1393_v37 = vadd.f32 %v1391_v30, %v1364_v56 }
 0x298   :  { %v1394_v14 = vadd.f32 %v1392_v28, %v1365_v12 }
 0x29d   :  { %v1414_v1 = vpop.permute.xlu0 %1413 }
 0x29e   :  { %v1410_v21 = vpop.permute.xlu1 %1409  ;;  %v1417_v35 = vsel %vm1415_vm3, %v1412_v61, %v1414_v1 }
 0x29f   :  { %v1416_v13 = vsel %vm1415_vm3, %v1410_v21, %v1412_v61  ;;  %v1421_v39 = vsel %vm1276_vm14, %v1417_v35, 0.0 }
 0x2a0   :  { %v1507_v9 = vpop.permute.xlu2 %1506  ;;  %v1420_v15 = vsel %vm1275_vm13, %v1416_v13, 0.0  ;;  %v1423_v41 = vadd.f32 %v1421_v39, %v1394_v14 }
 0x2a1   :  { %v1422_v44 = vadd.f32 %v1420_v15, %v1393_v37 }
 0x2a6   :  { %v1443_v4 = vpop.permute.xlu0 %1442 }
 0x2a7   :  { %v1439_v5 = vpop.permute.xlu1 %1438  ;;  %v1446_v20 = vsel %vm1444_vm4, %v1441_v2, %v1443_v4 }
 0x2a8   :  { %v1445_v34 = vsel %vm1444_vm4, %v1439_v5, %v1441_v2  ;;  %v1450_v40 = vsel %vm1276_vm14, %v1446_v20, 0.0 }
 0x2a9   :  { %v1536_v16 = vpop.permute.xlu2 %1535  ;;  %v1449_v42 = vsel %vm1275_vm13, %v1445_v34, 0.0  ;;  %v1452_v47 = vadd.f32 %v1450_v40, %v1423_v41 }
 0x2aa   :  { %v1451_v52 = vadd.f32 %v1449_v42, %v1422_v44 }
 0x2af   :  { %v1472_v7 = vpop.permute.xlu0 %1471 }
 0x2b0   :  { %v1468_v8 = vpop.permute.xlu1 %1467  ;;  %v1475_v38 = vsel %vm1473_vm5, %v1470_v6, %v1472_v7 }
 0x2b1   :  { %v1474_v3 = vsel %vm1473_vm5, %v1468_v8, %v1470_v6  ;;  %v1479_v45 = vsel %vm1276_vm14, %v1475_v38, 0.0  ;;  %vm1684_vm14 = vcmask 211968  }
 0x2b2   :  { %v1565_v18 = vpop.permute.xlu2 %1564  ;;  %v1478_v48 = vsel %vm1275_vm13, %v1474_v3, 0.0  ;;  %v1481_v53 = vadd.f32 %v1479_v45, %v1452_v47  ;;  %vm1655_vm13 = vcmask 343040  }
 0x2b3   :  { %v1480_v57 = vadd.f32 %v1478_v48, %v1451_v52 }
 0x2b8   :  { %v1509_v10 = vpop.permute.xlu0 %1508 }
 0x2b9   :  { %v1505_v60 = vpop.permute.xlu1 %1504  ;;  %v1512_v43 = vsel %vm1510_vm6, %v1507_v9, %v1509_v10 }
 0x2ba   :  { %v1511_v46 = vsel %vm1510_vm6, %v1505_v60, %v1507_v9  ;;  %v1516_v50 = vsel %vm1487_vm7, %v1512_v43, 0.0 }
 0x2bb   :  { %v1594_v23 = vpop.permute.xlu2 %1593  ;;  %v1515_v55 = vsel %vm1486_vm9, %v1511_v46, 0.0  ;;  %v1518_v32 = vadd.f32 %v1516_v50, %v1481_v53 }
 0x2bc   :  { %v1517_v0 = vadd.f32 %v1515_v55, %v1480_v57 }
 0x2c1   :  { %v1538_v17 = vpop.permute.xlu0 %1537 }
 0x2c2   :  { %v1534_v63 = vpop.permute.xlu1 %1533  ;;  %v1541_v51 = vsel %vm1539_vm8, %v1536_v16, %v1538_v17 }
 0x2c3   :  { %v1540_v54 = vsel %vm1539_vm8, %v1534_v63, %v1536_v16  ;;  %v1545_v58 = vsel %vm1487_vm7, %v1541_v51, 0.0 }
 0x2c4   :  { %v1623_v31 = vpop.permute.xlu2 %1622  ;;  %v1544_v12 = vsel %vm1486_vm9, %v1540_v54, 0.0  ;;  %v1547_v4 = vadd.f32 %v1545_v58, %v1518_v32 }
 0x2c5   :  { %v1546_v7 = vadd.f32 %v1544_v12, %v1517_v0 }
 0x2ca   :  { %v1567_v19 = vpop.permute.xlu0 %1566 }
 0x2cb   :  { %v1563_v11 = vpop.permute.xlu1 %1562  ;;  %v1570_v33 = vsel %vm1568_vm10, %v1565_v18, %v1567_v19 }
 0x2cc   :  { %v1569_v59 = vsel %vm1568_vm10, %v1563_v11, %v1565_v18  ;;  %v1574_v1 = vsel %vm1487_vm7, %v1570_v33, 0.0 }
 0x2cd   :  { %v1652_v56 = vpop.permute.xlu2 %1651  ;;  %v1573_v5 = vsel %vm1486_vm9, %v1569_v59, 0.0  ;;  %v1576_v10 = vadd.f32 %v1574_v1, %v1547_v4 }
 0x2ce   :  { %v1575_v17 = vadd.f32 %v1573_v5, %v1546_v7 }
 0x2d3   :  { %v1596_v24 = vpop.permute.xlu0 %1595 }
 0x2d4   :  { %v1592_v25 = vpop.permute.xlu1 %1591  ;;  %v1599_v61 = vsel %vm1597_vm11, %v1594_v23, %v1596_v24 }
 0x2d5   :  { %v1598_v2 = vsel %vm1597_vm11, %v1592_v25, %v1594_v23  ;;  %v1603_v8 = vsel %vm1487_vm7, %v1599_v61, 0.0 }
 0x2d6   :  { %v1602_v60 = vsel %vm1486_vm9, %v1598_v2, 0.0  ;;  %v1605_v19 = vadd.f32 %v1603_v8, %v1576_v10  ;;  %v1681_v27 = vpop.permute.xlu2 %1680 }
 0x2d7   :  { %v1604_v23 = vadd.f32 %v1602_v60, %v1575_v17 }
 0x2dc   :  { %v1625_v36 = vpop.permute.xlu0 %1624 }
 0x2dd   :  { %v1621_v49 = vpop.permute.xlu1 %1620  ;;  %v1628_v6 = vsel %vm1626_vm12, %v1623_v31, %v1625_v36 }
 0x2de   :  { %v1627_v9 = vsel %vm1626_vm12, %v1621_v49, %v1623_v31  ;;  %v1632_v63 = vsel %vm1487_vm7, %v1628_v6, 0.0 }
 0x2df   :  { %v1631_v11 = vsel %vm1486_vm9, %v1627_v9, 0.0  ;;  %v1634_v25 = vadd.f32 %v1632_v63, %v1605_v19 }
 0x2e0   :  { %v1633_v28 = vadd.f32 %v1631_v11, %v1604_v23 }
 0x2e5   :  { %v1654_v62 = vpop.permute.xlu0 %1653 }
 0x2e6   :  { %v1650_v21 = vpop.permute.xlu1 %1649  ;;  %v1657_v16 = vsel %vm1655_vm13, %v1652_v56, %v1654_v62 }
 0x2e7   :  { %v1656_v18 = vsel %vm1655_vm13, %v1650_v21, %v1652_v56  ;;  %v1661_v24 = vsel %vm1487_vm7, %v1657_v16, 0.0 }
 0x2e8   :  { %v1660_v26 = vsel %vm1486_vm9, %v1656_v18, 0.0  ;;  %v1663_v13 = vadd.f32 %v1661_v24, %v1634_v25 }
 0x2e9   :  { %v1662_v35 = vadd.f32 %v1660_v26, %v1633_v28 }
 0x2ee   :  { %v1683_v30 = vpop.permute.xlu0 %1682 }
 0x2ef   :  { %v1686_v31 = vsel %vm1684_vm14, %v1681_v27, %v1683_v30  ;;  %v1679_v14 = vpop.permute.xlu1 %1678 }
 0x2f0   :  { %v1690_v20 = vsel %vm1487_vm7, %v1686_v31, 0.0  ;;  %v1685_v34 = vsel %vm1684_vm14, %v1679_v14, %v1681_v27 }
 0x2f1   :  { %v1692_v36 = vadd.f32 %v1690_v20, %v1663_v13  ;;  %v1689_v37 = vsel %vm1486_vm9, %v1685_v34, 0.0 }
 0x2f2   :  { %v1691_v15 = vadd.f32 %v1689_v37, %v1662_v35 }
 0x2f3   :  { %v1852_v38 = vmul.f32 -1.442695, %v1692_v36 }
 0x2f4   :  { %v1851_v49 = vmul.f32 -1.442695, %v1691_v15 }
 0x2f5   :  { %1909 = vpow2.f32 %v1852_v38 }
 0x2f6   :  { %1911 = vpow2.f32 %v1851_v49 }
 0x2fb   :  { %v1910_v39 = vpop.eup %1909 }
 0x2fc   :  { %v1912_v40 = vpop.eup %1911  ;;  %v1700_v3 = vadd.f32 1.0, %v1910_v39 }
 0x2fd   :  { %v1699_v41 = vadd.f32 1.0, %v1912_v40 }
 0x2fe   :  { %1913 = vrcp.f32 %v1700_v3  ;;  %v1727_v47 = vand.u32 2147483648, %v1700_v3  ;;  %v1725_v51 = vand.u32 2147483647, %v1700_v3  ;;  %vm1721_vm2 = vweird.f32 %v1700_v3 }
 0x2ff   :  { %1915 = vrcp.f32 %v1699_v41  ;;  %v1712_v22 = vand.u32 2147483648, %v1699_v41  ;;  %v1710_v50 = vand.u32 2147483647, %v1699_v41  ;;  %vm1706_vm3 = vweird.f32 %v1699_v41 }
 0x300   :  { %v1728_v55 = vor.u32 1.1754944e-38, %v1727_v47  ;;  %vm1726_vm6 = vcmp.eq.f32.partialorder %v1725_v51, 8.507059e+37 }
 0x301   :  { %v1713_v33 = vor.u32 1.1754944e-38, %v1712_v22  ;;  %vm1711_vm7 = vcmp.eq.f32.partialorder %v1710_v50, 8.507059e+37 }
 0x304   :  { %v1914_v42 = vpop.eup %1913 }
 0x305   :  { %v1916_v43 = vpop.eup %1915  ;;  %v1717_v29 = vmul.f32 %v1914_v42, %v1700_v3  ;;  %vm1722_vm15 = vweird.f32 %v1914_v42 }
 0x306   :  { %v1702_v44 = vmul.f32 %v1916_v43, %v1699_v41  ;;  %vm1707_vm1 = vweird.f32 %v1916_v43  ;;  %vm1723_vm4 = vmor %vm1721_vm2, %vm1722_vm15 }
 0x307   :  { %v1718_v45 = vsub.f32 1.0, %v1717_v29  ;;  %vm1708_vm5 = vmor %vm1706_vm3, %vm1707_vm1 }
 0x308   :  { %v1703_v46 = vsub.f32 1.0, %v1702_v44 }
 0x309   :  { %v1719_v48 = vmul.f32 %v1914_v42, %v1718_v45 }
 0x30a   :  { %v1704_v52 = vmul.f32 %v1916_v43, %v1703_v46 }
 0x30b   :  { %v1720_v54 = vadd.f32 %v1914_v42, %v1719_v48 }
 0x30c   :  { %v1705_v53 = vadd.f32 %v1916_v43, %v1704_v52 }
 0x30d   :  { %v1724_v57 = vsel %vm1723_vm4, %v1914_v42, %v1720_v54 }
 0x30e   :  { %v1709_v58 = vsel %vm1708_vm5, %v1916_v43, %v1705_v53  ;;  %v1729_v56 = vsel %vm1726_vm6, %v1728_v55, %v1724_v57 }
 0x30f   :  { %v1714_v59 = vsel %vm1711_vm7, %v1713_v33, %v1709_v58  ;;  %v1733_v32 = vrot.slane %v1729_v56, 6 }
 0x311   :  { %v1734_v12 = vsel %vm40_vm0, %v1714_v59, %v1733_v32 }
 0x312   :  { %1736 = vst [vmem:[#allocation11] sm:$0xf] %v1734_v12 }
 0x313   :  { %1747 = dma.vmem_to_hbm [thread:$0]  %s1743_s18, 64, %s1745_s1, [#allocation10]  }
 0x314   :  { %1981 = dma.done.wait [#allocation10], 64  }
 0x315   :  { %1982 = vsyncadd [#allocation10], 4294967232 }
 0x316   :  { %1752 = vsyncpa [#allocation9], 1 }
 0x317   :  { %1753 = vsyncpa [#allocation10], 1 }

</bundles_post_ra>
